<compile_context>
chip_gen: v6e
topology: v6e:2x2x1
jax: 0.10.0
libtpu: 0.0.40
codegen_flags: <defaults>
</compile_context>

<pallas_src>
import jax
import jax.numpy as jnp
from jax.experimental import pallas as pl
from jax.experimental.pallas import tpu as pltpu

LANE = 128  # lane-dense output width for every kernel


def _round_up(x, m):
    return ((x + m - 1) // m) * m


# ---------------------------------------------------------------------------
# Pallas kernels
# ---------------------------------------------------------------------------
def _conv_relu_pool_kernel(p_ref, w_ref, b_ref, o_ref):
    """Fused conv(as im2col matmul) + 2x2 maxpool + bias + ReLU.

    p_ref : [4, TR, C*K*K]  im2col patches; leading axis = pool-window offset
    w_ref : [C*K*K, 128]    zero-padded on the output-channel (lane) dim
    b_ref : [1, 128]
    o_ref : [TR, 128]       rows = flattened (n, ph, pw)
    """
    w = w_ref[...]
    # Running max over the 4 pool offsets keeps only one live accumulator.
    m = jnp.dot(p_ref[0], w, preferred_element_type=jnp.float32)
    for j in range(1, 4):
        m = jnp.maximum(m, jnp.dot(p_ref[j], w, preferred_element_type=jnp.float32))
    # Bias + ReLU hoisted out of the branches (bias shared, ReLU monotone).
    o_ref[...] = jnp.maximum(m + b_ref[...], 0.0)


def _fused_mlp_kernel(x_ref, w1_ref, b1_ref, w2_ref, b2_ref, w3_ref, b3_ref, o_ref):
    """fc1 -> ReLU -> fc2 -> ReLU -> fc3, all weights VMEM-resident.

    x_ref : [TM, F]; w*_ref lane/row padded to 128; o_ref : [TM, 128].
    """
    h = jnp.dot(x_ref[...], w1_ref[...], preferred_element_type=jnp.float32) + b1_ref[...]
    h = jnp.maximum(h, 0.0)
    h = jnp.dot(h, w2_ref[...], preferred_element_type=jnp.float32) + b2_ref[...]
    h = jnp.maximum(h, 0.0)
    o_ref[...] = jnp.dot(h, w3_ref[...], preferred_element_type=jnp.float32) + b3_ref[...]


# ---------------------------------------------------------------------------
# Wrappers (glue: im2col packing, padding, pallas_call plumbing)
# ---------------------------------------------------------------------------
def conv_relu_pool_nhwc(x, w, b):
    """x: (N, H, W, C) NHWC fp32; w: (O, C, K, K) torch OIHW; b: (O,).

    Returns (N, OH//2, OW//2, 128) NHWC with channels zero-padded to 128,
    plus the true output-channel count O.
    """
    N, H, W, C = x.shape
    O, _, K, _ = w.shape
    OH, OW = H - K + 1, W - K + 1
    PH, PW = OH // 2, OW // 2
    CKK = K * K * C

    # Single non-duplicated im2col tensor; contraction index = (kh*K + kw)*C + c.
    cols = [x[:, kh:kh + OH, kw:kw + OW, :] for kh in range(K) for kw in range(K)]
    p = jnp.stack(cols, axis=3).reshape(N, OH, OW, CKK)
    p = p[:, :2 * PH, :2 * PW, :]
    # Leading axis = pool-window offset (a, b); rows ordered (n, ph, pw).
    p4 = jnp.stack([p[:, a::2, b::2, :] for a in (0, 1) for b in (0, 1)], axis=0)
    p4 = p4.reshape(4, N * PH * PW, CKK)

    R = N * PH * PW
    TR = 512 if R >= 512 else _round_up(R, 8)      # (8,128)-aligned row tile
    Rp = _round_up(R, TR)
    if Rp != R:
        p4 = jnp.pad(p4, ((0, 0), (0, Rp - R), (0, 0)))

    # Weight rows match the patch contraction index; lane dim padded to 128.
    w2 = jnp.transpose(w, (2, 3, 1, 0)).reshape(CKK, O)
    w2 = jnp.pad(w2, ((0, 0), (0, LANE - O)))
    b2 = jnp.pad(b, (0, LANE - O)).reshape(1, LANE)

    grid = (Rp // TR,)
    out = pl.pallas_call(
        _conv_relu_pool_kernel,
        out_shape=jax.ShapeDtypeStruct((Rp, LANE), jnp.float32),
        grid=grid,
        in_specs=[
            pl.BlockSpec((4, TR, CKK), lambda i: (0, i, 0)),   # streamed rows
            pl.BlockSpec((CKK, LANE), lambda i: (0, 0)),       # resident weight
            pl.BlockSpec((1, LANE), lambda i: (0, 0)),         # resident bias
        ],
        out_specs=pl.BlockSpec((TR, LANE), lambda i: (i, 0)),
        compiler_params=pltpu.CompilerParams(
            dimension_semantics=("parallel",)),
        cost_estimate=pl.CostEstimate(
            flops=2 * 4 * Rp * CKK * LANE,
            transcendentals=0,
            bytes_accessed=4 * (4 * Rp * CKK + CKK * LANE + LANE + Rp * LANE),
        ),
    )(p4, w2, b2)

    return out[:R].reshape(N, PH, PW, LANE), O


def fused_mlp(x, params, chw):
    """x: (N, F) NHWC-flattened conv features; returns (N, out_dim) logits."""
    C2, PH2, PW2 = chw
    N, F = x.shape
    H1 = params["fc1_w"].shape[0]
    H2 = params["fc2_w"].shape[0]
    OD = params["fc3_w"].shape[0]

    # Fold the NCHW-flatten ordering of fc1 into a one-time column permutation:
    # torch columns are (c, ph, pw); our rows are NHWC-flattened (ph, pw, c).
    w1 = params["fc1_w"].reshape(H1, C2, PH2, PW2).transpose(0, 2, 3, 1).reshape(H1, F)
    w1 = jnp.pad(w1.T, ((0, 0), (0, LANE - H1)))                       # (F, 128)
    b1 = jnp.pad(params["fc1_b"], (0, LANE - H1)).reshape(1, LANE)
    w2 = jnp.pad(params["fc2_w"].T, ((0, LANE - H1), (0, LANE - H2)))  # (128, 128)
    b2 = jnp.pad(params["fc2_b"], (0, LANE - H2)).reshape(1, LANE)
    w3 = jnp.pad(params["fc3_w"].T, ((0, LANE - H2), (0, LANE - OD)))  # (128, 128)
    b3 = jnp.pad(params["fc3_b"], (0, LANE - OD)).reshape(1, LANE)

    TM = 256 if N >= 256 else _round_up(N, 8)
    Np = _round_up(N, TM)
    xp = jnp.pad(x, ((0, Np - N), (0, 0)))

    grid = (Np // TM,)
    out = pl.pallas_call(
        _fused_mlp_kernel,
        out_shape=jax.ShapeDtypeStruct((Np, LANE), jnp.float32),
        grid=grid,
        in_specs=[
            pl.BlockSpec((TM, F), lambda i: (i, 0)),
            pl.BlockSpec((F, LANE), lambda i: (0, 0)),
            pl.BlockSpec((1, LANE), lambda i: (0, 0)),
            pl.BlockSpec((LANE, LANE), lambda i: (0, 0)),
            pl.BlockSpec((1, LANE), lambda i: (0, 0)),
            pl.BlockSpec((LANE, LANE), lambda i: (0, 0)),
            pl.BlockSpec((1, LANE), lambda i: (0, 0)),
        ],
        out_specs=pl.BlockSpec((TM, LANE), lambda i: (i, 0)),
        compiler_params=pltpu.CompilerParams(
            dimension_semantics=("parallel",)),
        cost_estimate=pl.CostEstimate(
            flops=2 * Np * (F * LANE + LANE * LANE + LANE * LANE),
            transcendentals=0,
            bytes_accessed=4 * (Np * F + F * LANE + 2 * LANE * LANE
                                + 3 * LANE + Np * LANE),
        ),
    )(xp, w1, b1, w2, b2, w3, b3)

    return out[:N, :OD]


# ---------------------------------------------------------------------------
# LeNet5
# ---------------------------------------------------------------------------
def init_lenet5_params(key, input_dim=400, hidden_dims=(120, 84), out_dim=10):
    """Deterministic PyTorch-style uniform(-1/sqrt(fan_in), 1/sqrt(fan_in)) init."""
    def uniform(k, shape, fan_in):
        bound = 1.0 / float(fan_in) ** 0.5
        return jax.random.uniform(k, shape, jnp.float32, -bound, bound)

    ks = jax.random.split(key, 10)
    return {
        "conv1_w": uniform(ks[0], (6, 3, 5, 5), 3 * 25),
        "conv1_b": uniform(ks[1], (6,), 3 * 25),
        "conv2_w": uniform(ks[2], (16, 6, 5, 5), 6 * 25),
        "conv2_b": uniform(ks[3], (16,), 6 * 25),
        "fc1_w": uniform(ks[4], (hidden_dims[0], input_dim), input_dim),
        "fc1_b": uniform(ks[5], (hidden_dims[0],), input_dim),
        "fc2_w": uniform(ks[6], (hidden_dims[1], hidden_dims[0]), hidden_dims[0]),
        "fc2_b": uniform(ks[7], (hidden_dims[1],), hidden_dims[0]),
        "fc3_w": uniform(ks[8], (out_dim, hidden_dims[1]), hidden_dims[1]),
        "fc3_b": uniform(ks[9], (out_dim,), hidden_dims[1]),
    }


def lenet5_forward(params, x):
    # One-time NCHW -> NHWC; activations stay NHWC between stages.
    x = jnp.transpose(x, (0, 2, 3, 1))                                     # (N,32,32,3)
    h, o1 = conv_relu_pool_nhwc(x, params["conv1_w"], params["conv1_b"])   # (N,14,14,128)
    h = h[..., :o1]                                                        # (N,14,14,6)
    h, o2 = conv_relu_pool_nhwc(h, params["conv2_w"], params["conv2_b"])   # (N,5,5,128)
    h = h[..., :o2]                                                        # (N,5,5,16)
    N, PH2, PW2, C2 = h.shape
    x_flat = h.reshape(N, PH2 * PW2 * C2)                                  # NHWC flatten
    # Dropout(p=0.5) -> identity (eval mode).
    return fused_mlp(x_flat, params, (C2, PH2, PW2))                       # (N, 10)


# ---------------------------------------------------------------------------
# Pure-JAX reference (for correctness check)
# ---------------------------------------------------------------------------
def lenet5_reference(params, x):
    def conv(x, w, b):
        y = jax.lax.conv_general_dilated(
            x, w, window_strides=(1, 1), padding="VALID",
            dimension_numbers=("NCHW", "OIHW", "NCHW"))
        return y + b.reshape(1, -1, 1, 1)

    def pool(x):
        return jax.lax.reduce_window(
            x, -jnp.inf, jax.lax.max,
            window_dimensions=(1, 1, 2, 2), window_strides=(1, 1, 2, 2),
            padding="VALID")

    x = pool(jax.nn.relu(conv(x, params["conv1_w"], params["conv1_b"])))
    x = pool(jax.nn.relu(conv(x, params["conv2_w"], params["conv2_b"])))
    x = x.reshape(x.shape[0], -1)
    x = jax.nn.relu(x @ params["fc1_w"].T + params["fc1_b"])
    x = jax.nn.relu(x @ params["fc2_w"].T + params["fc2_b"])
    x = x @ params["fc3_w"].T + params["fc3_b"]
    return x


if __name__ == "__main__":
    key = jax.random.PRNGKey(0)
    pkey, xkey = jax.random.split(key)

    # 32x32 RGB input so the flattened conv feature map is 16*5*5 = 400 = input_dim.
    x = jax.random.normal(xkey, (2, 3, 32, 32), dtype=jnp.float32)
    params = init_lenet5_params(pkey)

    fwd = jax.jit(lenet5_forward)
    out = jax.block_until_ready(fwd(params, x))
    ref = jax.block_until_ready(lenet5_reference(params, x))

    assert out.shape == (2, 10), out.shape
    assert jnp.allclose(out, ref, rtol=1e-2, atol=1e-2), (out, ref)
    print("KERNEL_OK")
</pallas_src>

<mosaic_0001>
module attributes {stable_mosaic.version = 11 : i64} {
  func.func @_conv_relu_pool_kernel(%arg0: i32, %arg1: memref<4x392x75xf32, #tpu.memory_space<vmem>>, %arg2: memref<75x128xf32, #tpu.memory_space<vmem>>, %arg3: memref<1x128xf32, #tpu.memory_space<vmem>>, %arg4: memref<392x128xf32, #tpu.memory_space<vmem>>) attributes {dimension_semantics = [#tpu.dimension_semantics<parallel>], iteration_bounds = array<i64: 1>, scalar_prefetch = 0 : i64, scratch_operands = 0 : i64, tpu.core_type = #tpu.core_type<tc>, window_params = [{transform_indices = @transform_0, window_bounds = array<i64: 4, 392, 75>}, {pipeline_mode = #tpu.pipeline_mode<synchronous>, transform_indices = @transform_1, window_bounds = array<i64: 75, 128>}, {pipeline_mode = #tpu.pipeline_mode<synchronous>, transform_indices = @transform_2, window_bounds = array<i64: 1, 128>}, {transform_indices = @transform_3, window_bounds = array<i64: 392, 128>}]} {
    %c0 = arith.constant 0 : index
    %c0_0 = arith.constant 0 : index
    %0 = vector.load %arg2[%c0, %c0_0] : memref<75x128xf32, #tpu.memory_space<vmem>>, vector<75x128xf32>
    %c0_1 = arith.constant 0 : index
    %c0_2 = arith.constant 0 : index
    %c0_3 = arith.constant 0 : index
    %1 = vector.load %arg1[%c0_1, %c0_2, %c0_3] : memref<4x392x75xf32, #tpu.memory_space<vmem>>, vector<1x392x75xf32>
    %2 = vector.shape_cast %1 : vector<1x392x75xf32> to vector<392x75xf32>
    %cst = arith.constant dense<0.000000e+00> : vector<392x128xf32>
    %3 = tpu.matmul %2, %0, %cst {dimension_numbers = #tpu.dot_dimension_numbers<[1], [0], [0], [1], [0, 0, 1, 1], [], []>} : vector<392x75xf32>, vector<75x128xf32>, vector<392x128xf32> -> vector<392x128xf32>
    %c1 = arith.constant 1 : index
    %c0_4 = arith.constant 0 : index
    %c0_5 = arith.constant 0 : index
    %4 = vector.load %arg1[%c1, %c0_4, %c0_5] : memref<4x392x75xf32, #tpu.memory_space<vmem>>, vector<1x392x75xf32>
    %5 = vector.shape_cast %4 : vector<1x392x75xf32> to vector<392x75xf32>
    %cst_6 = arith.constant dense<0.000000e+00> : vector<392x128xf32>
    %6 = tpu.matmul %5, %0, %cst_6 {dimension_numbers = #tpu.dot_dimension_numbers<[1], [0], [0], [1], [0, 0, 1, 1], [], []>} : vector<392x75xf32>, vector<75x128xf32>, vector<392x128xf32> -> vector<392x128xf32>
    %7 = arith.maximumf %3, %6 : vector<392x128xf32>
    %c2 = arith.constant 2 : index
    %c0_7 = arith.constant 0 : index
    %c0_8 = arith.constant 0 : index
    %8 = vector.load %arg1[%c2, %c0_7, %c0_8] : memref<4x392x75xf32, #tpu.memory_space<vmem>>, vector<1x392x75xf32>
    %9 = vector.shape_cast %8 : vector<1x392x75xf32> to vector<392x75xf32>
    %cst_9 = arith.constant dense<0.000000e+00> : vector<392x128xf32>
    %10 = tpu.matmul %9, %0, %cst_9 {dimension_numbers = #tpu.dot_dimension_numbers<[1], [0], [0], [1], [0, 0, 1, 1], [], []>} : vector<392x75xf32>, vector<75x128xf32>, vector<392x128xf32> -> vector<392x128xf32>
    %11 = arith.maximumf %7, %10 : vector<392x128xf32>
    %c3 = arith.constant 3 : index
    %c0_10 = arith.constant 0 : index
    %c0_11 = arith.constant 0 : index
    %12 = vector.load %arg1[%c3, %c0_10, %c0_11] : memref<4x392x75xf32, #tpu.memory_space<vmem>>, vector<1x392x75xf32>
    %13 = vector.shape_cast %12 : vector<1x392x75xf32> to vector<392x75xf32>
    %cst_12 = arith.constant dense<0.000000e+00> : vector<392x128xf32>
    %14 = tpu.matmul %13, %0, %cst_12 {dimension_numbers = #tpu.dot_dimension_numbers<[1], [0], [0], [1], [0, 0, 1, 1], [], []>} : vector<392x75xf32>, vector<75x128xf32>, vector<392x128xf32> -> vector<392x128xf32>
    %15 = arith.maximumf %11, %14 : vector<392x128xf32>
    %c0_13 = arith.constant 0 : index
    %c0_14 = arith.constant 0 : index
    %16 = vector.load %arg3[%c0_13, %c0_14] : memref<1x128xf32, #tpu.memory_space<vmem>>, vector<1x128xf32>
    %17 = vector.broadcast %16 : vector<1x128xf32> to vector<392x128xf32>
    %18 = arith.addf %15, %17 : vector<392x128xf32>
    %cst_15 = arith.constant 0.000000e+00 : f32
    %19 = vector.broadcast %cst_15 : f32 to vector<392x128xf32>
    %20 = arith.maximumf %18, %19 : vector<392x128xf32>
    %c0_16 = arith.constant 0 : index
    %c0_17 = arith.constant 0 : index
    %21 = vector.load %arg4[%c0_16, %c0_17] : memref<392x128xf32, #tpu.memory_space<vmem>>, vector<392x128xf32>
    tpu.vector_store %arg4[%c0_16, %c0_17], %20 {strides = array<i32>} : memref<392x128xf32, #tpu.memory_space<vmem>>, vector<392x128xf32>,
    return
  }
  func.func @transform_0(%arg0: i32) -> (i32, i32, i32) {
    %c0_i32 = arith.constant 0 : i32
    %c0_i32_0 = arith.constant 0 : i32
    %c0_i32_1 = arith.constant 0 : i32
    return %c0_i32, %arg0, %c0_i32_0 : i32, i32, i32
  }
  func.func @transform_1(%arg0: i32) -> (i32, i32) {
    %c0_i32 = arith.constant 0 : i32
    %c0_i32_0 = arith.constant 0 : i32
    %c0_i32_1 = arith.constant 0 : i32
    return %c0_i32, %c0_i32_0 : i32, i32
  }
  func.func @transform_2(%arg0: i32) -> (i32, i32) {
    %c0_i32 = arith.constant 0 : i32
    %c0_i32_0 = arith.constant 0 : i32
    %c0_i32_1 = arith.constant 0 : i32
    return %c0_i32, %c0_i32_0 : i32, i32
  }
  func.func @transform_3(%arg0: i32) -> (i32, i32) {
    %c0_i32 = arith.constant 0 : i32
    %c0_i32_0 = arith.constant 0 : i32
    return %arg0, %c0_i32 : i32, i32
  }
}

module attributes {stable_mosaic.version = 11 : i64} {
  func.func @_conv_relu_pool_kernel(%arg0: i32, %arg1: memref<4x56x150xf32, #tpu.memory_space<vmem>>, %arg2: memref<150x128xf32, #tpu.memory_space<vmem>>, %arg3: memref<1x128xf32, #tpu.memory_space<vmem>>, %arg4: memref<56x128xf32, #tpu.memory_space<vmem>>) attributes {dimension_semantics = [#tpu.dimension_semantics<parallel>], iteration_bounds = array<i64: 1>, scalar_prefetch = 0 : i64, scratch_operands = 0 : i64, tpu.core_type = #tpu.core_type<tc>, window_params = [{transform_indices = @transform_0, window_bounds = array<i64: 4, 56, 150>}, {pipeline_mode = #tpu.pipeline_mode<synchronous>, transform_indices = @transform_1, window_bounds = array<i64: 150, 128>}, {pipeline_mode = #tpu.pipeline_mode<synchronous>, transform_indices = @transform_2, window_bounds = array<i64: 1, 128>}, {transform_indices = @transform_3, window_bounds = array<i64: 56, 128>}]} {
    %c0 = arith.constant 0 : index
    %c0_0 = arith.constant 0 : index
    %0 = vector.load %arg2[%c0, %c0_0] : memref<150x128xf32, #tpu.memory_space<vmem>>, vector<150x128xf32>
    %c0_1 = arith.constant 0 : index
    %c0_2 = arith.constant 0 : index
    %c0_3 = arith.constant 0 : index
    %1 = vector.load %arg1[%c0_1, %c0_2, %c0_3] : memref<4x56x150xf32, #tpu.memory_space<vmem>>, vector<1x56x150xf32>
    %2 = vector.shape_cast %1 : vector<1x56x150xf32> to vector<56x150xf32>
    %cst = arith.constant dense<0.000000e+00> : vector<56x128xf32>
    %3 = tpu.matmul %2, %0, %cst {dimension_numbers = #tpu.dot_dimension_numbers<[1], [0], [0], [1], [0, 0, 1, 1], [], []>} : vector<56x150xf32>, vector<150x128xf32>, vector<56x128xf32> -> vector<56x128xf32>
    %c1 = arith.constant 1 : index
    %c0_4 = arith.constant 0 : index
    %c0_5 = arith.constant 0 : index
    %4 = vector.load %arg1[%c1, %c0_4, %c0_5] : memref<4x56x150xf32, #tpu.memory_space<vmem>>, vector<1x56x150xf32>
    %5 = vector.shape_cast %4 : vector<1x56x150xf32> to vector<56x150xf32>
    %cst_6 = arith.constant dense<0.000000e+00> : vector<56x128xf32>
    %6 = tpu.matmul %5, %0, %cst_6 {dimension_numbers = #tpu.dot_dimension_numbers<[1], [0], [0], [1], [0, 0, 1, 1], [], []>} : vector<56x150xf32>, vector<150x128xf32>, vector<56x128xf32> -> vector<56x128xf32>
    %7 = arith.maximumf %3, %6 : vector<56x128xf32>
    %c2 = arith.constant 2 : index
    %c0_7 = arith.constant 0 : index
    %c0_8 = arith.constant 0 : index
    %8 = vector.load %arg1[%c2, %c0_7, %c0_8] : memref<4x56x150xf32, #tpu.memory_space<vmem>>, vector<1x56x150xf32>
    %9 = vector.shape_cast %8 : vector<1x56x150xf32> to vector<56x150xf32>
    %cst_9 = arith.constant dense<0.000000e+00> : vector<56x128xf32>
    %10 = tpu.matmul %9, %0, %cst_9 {dimension_numbers = #tpu.dot_dimension_numbers<[1], [0], [0], [1], [0, 0, 1, 1], [], []>} : vector<56x150xf32>, vector<150x128xf32>, vector<56x128xf32> -> vector<56x128xf32>
    %11 = arith.maximumf %7, %10 : vector<56x128xf32>
    %c3 = arith.constant 3 : index
    %c0_10 = arith.constant 0 : index
    %c0_11 = arith.constant 0 : index
    %12 = vector.load %arg1[%c3, %c0_10, %c0_11] : memref<4x56x150xf32, #tpu.memory_space<vmem>>, vector<1x56x150xf32>
    %13 = vector.shape_cast %12 : vector<1x56x150xf32> to vector<56x150xf32>
    %cst_12 = arith.constant dense<0.000000e+00> : vector<56x128xf32>
    %14 = tpu.matmul %13, %0, %cst_12 {dimension_numbers = #tpu.dot_dimension_numbers<[1], [0], [0], [1], [0, 0, 1, 1], [], []>} : vector<56x150xf32>, vector<150x128xf32>, vector<56x128xf32> -> vector<56x128xf32>
    %15 = arith.maximumf %11, %14 : vector<56x128xf32>
    %c0_13 = arith.constant 0 : index
    %c0_14 = arith.constant 0 : index
    %16 = vector.load %arg3[%c0_13, %c0_14] : memref<1x128xf32, #tpu.memory_space<vmem>>, vector<1x128xf32>
    %17 = vector.broadcast %16 : vector<1x128xf32> to vector<56x128xf32>
    %18 = arith.addf %15, %17 : vector<56x128xf32>
    %cst_15 = arith.constant 0.000000e+00 : f32
    %19 = vector.broadcast %cst_15 : f32 to vector<56x128xf32>
    %20 = arith.maximumf %18, %19 : vector<56x128xf32>
    %c0_16 = arith.constant 0 : index
    %c0_17 = arith.constant 0 : index
    %21 = vector.load %arg4[%c0_16, %c0_17] : memref<56x128xf32, #tpu.memory_space<vmem>>, vector<56x128xf32>
    tpu.vector_store %arg4[%c0_16, %c0_17], %20 {strides = array<i32>} : memref<56x128xf32, #tpu.memory_space<vmem>>, vector<56x128xf32>,
    return
  }
  func.func @transform_0(%arg0: i32) -> (i32, i32, i32) {
    %c0_i32 = arith.constant 0 : i32
    %c0_i32_0 = arith.constant 0 : i32
    %c0_i32_1 = arith.constant 0 : i32
    return %c0_i32, %arg0, %c0_i32_0 : i32, i32, i32
  }
  func.func @transform_1(%arg0: i32) -> (i32, i32) {
    %c0_i32 = arith.constant 0 : i32
    %c0_i32_0 = arith.constant 0 : i32
    %c0_i32_1 = arith.constant 0 : i32
    return %c0_i32, %c0_i32_0 : i32, i32
  }
  func.func @transform_2(%arg0: i32) -> (i32, i32) {
    %c0_i32 = arith.constant 0 : i32
    %c0_i32_0 = arith.constant 0 : i32
    %c0_i32_1 = arith.constant 0 : i32
    return %c0_i32, %c0_i32_0 : i32, i32
  }
  func.func @transform_3(%arg0: i32) -> (i32, i32) {
    %c0_i32 = arith.constant 0 : i32
    %c0_i32_0 = arith.constant 0 : i32
    return %arg0, %c0_i32 : i32, i32
  }
}

module attributes {stable_mosaic.version = 11 : i64} {
  func.func @_fused_mlp_kernel(%arg0: i32, %arg1: memref<8x400xf32, #tpu.memory_space<vmem>>, %arg2: memref<400x128xf32, #tpu.memory_space<vmem>>, %arg3: memref<1x128xf32, #tpu.memory_space<vmem>>, %arg4: memref<128x128xf32, #tpu.memory_space<vmem>>, %arg5: memref<1x128xf32, #tpu.memory_space<vmem>>, %arg6: memref<128x128xf32, #tpu.memory_space<vmem>>, %arg7: memref<1x128xf32, #tpu.memory_space<vmem>>, %arg8: memref<8x128xf32, #tpu.memory_space<vmem>>) attributes {dimension_semantics = [#tpu.dimension_semantics<parallel>], iteration_bounds = array<i64: 1>, scalar_prefetch = 0 : i64, scratch_operands = 0 : i64, tpu.core_type = #tpu.core_type<tc>, window_params = [{transform_indices = @transform_0, window_bounds = array<i64: 8, 400>}, {pipeline_mode = #tpu.pipeline_mode<synchronous>, transform_indices = @transform_1, window_bounds = array<i64: 400, 128>}, {pipeline_mode = #tpu.pipeline_mode<synchronous>, transform_indices = @transform_2, window_bounds = array<i64: 1, 128>}, {pipeline_mode = #tpu.pipeline_mode<synchronous>, transform_indices = @transform_3, window_bounds = array<i64: 128, 128>}, {pipeline_mode = #tpu.pipeline_mode<synchronous>, transform_indices = @transform_4, window_bounds = array<i64: 1, 128>}, {pipeline_mode = #tpu.pipeline_mode<synchronous>, transform_indices = @transform_5, window_bounds = array<i64: 128, 128>}, {pipeline_mode = #tpu.pipeline_mode<synchronous>, transform_indices = @transform_6, window_bounds = array<i64: 1, 128>}, {transform_indices = @transform_7, window_bounds = array<i64: 8, 128>}]} {
    %c0 = arith.constant 0 : index
    %c0_0 = arith.constant 0 : index
    %0 = vector.load %arg1[%c0, %c0_0] : memref<8x400xf32, #tpu.memory_space<vmem>>, vector<8x400xf32>
    %c0_1 = arith.constant 0 : index
    %c0_2 = arith.constant 0 : index
    %1 = vector.load %arg2[%c0_1, %c0_2] : memref<400x128xf32, #tpu.memory_space<vmem>>, vector<400x128xf32>
    %cst = arith.constant dense<0.000000e+00> : vector<8x128xf32>
    %2 = tpu.matmul %0, %1, %cst {dimension_numbers = #tpu.dot_dimension_numbers<[1], [0], [0], [1], [0, 0, 1, 1], [], []>} : vector<8x400xf32>, vector<400x128xf32>, vector<8x128xf32> -> vector<8x128xf32>
    %c0_3 = arith.constant 0 : index
    %c0_4 = arith.constant 0 : index
    %3 = vector.load %arg3[%c0_3, %c0_4] : memref<1x128xf32, #tpu.memory_space<vmem>>, vector<1x128xf32>
    %4 = vector.broadcast %3 : vector<1x128xf32> to vector<8x128xf32>
    %5 = arith.addf %2, %4 : vector<8x128xf32>
    %cst_5 = arith.constant 0.000000e+00 : f32
    %6 = vector.broadcast %cst_5 : f32 to vector<8x128xf32>
    %7 = arith.maximumf %5, %6 : vector<8x128xf32>
    %c0_6 = arith.constant 0 : index
    %c0_7 = arith.constant 0 : index
    %8 = vector.load %arg4[%c0_6, %c0_7] : memref<128x128xf32, #tpu.memory_space<vmem>>, vector<128x128xf32>
    %cst_8 = arith.constant dense<0.000000e+00> : vector<8x128xf32>
    %9 = tpu.matmul %7, %8, %cst_8 {dimension_numbers = #tpu.dot_dimension_numbers<[1], [0], [0], [1], [0, 0, 1, 1], [], []>} : vector<8x128xf32>, vector<128x128xf32>, vector<8x128xf32> -> vector<8x128xf32>
    %c0_9 = arith.constant 0 : index
    %c0_10 = arith.constant 0 : index
    %10 = vector.load %arg5[%c0_9, %c0_10] : memref<1x128xf32, #tpu.memory_space<vmem>>, vector<1x128xf32>
    %11 = vector.broadcast %10 : vector<1x128xf32> to vector<8x128xf32>
    %12 = arith.addf %9, %11 : vector<8x128xf32>
    %cst_11 = arith.constant 0.000000e+00 : f32
    %13 = vector.broadcast %cst_11 : f32 to vector<8x128xf32>
    %14 = arith.maximumf %12, %13 : vector<8x128xf32>
    %c0_12 = arith.constant 0 : index
    %c0_13 = arith.constant 0 : index
    %15 = vector.load %arg6[%c0_12, %c0_13] : memref<128x128xf32, #tpu.memory_space<vmem>>, vector<128x128xf32>
    %cst_14 = arith.constant dense<0.000000e+00> : vector<8x128xf32>
    %16 = tpu.matmul %14, %15, %cst_14 {dimension_numbers = #tpu.dot_dimension_numbers<[1], [0], [0], [1], [0, 0, 1, 1], [], []>} : vector<8x128xf32>, vector<128x128xf32>, vector<8x128xf32> -> vector<8x128xf32>
    %c0_15 = arith.constant 0 : index
    %c0_16 = arith.constant 0 : index
    %17 = vector.load %arg7[%c0_15, %c0_16] : memref<1x128xf32, #tpu.memory_space<vmem>>, vector<1x128xf32>
    %18 = vector.broadcast %17 : vector<1x128xf32> to vector<8x128xf32>
    %19 = arith.addf %16, %18 : vector<8x128xf32>
    %c0_17 = arith.constant 0 : index
    %c0_18 = arith.constant 0 : index
    %20 = vector.load %arg8[%c0_17, %c0_18] : memref<8x128xf32, #tpu.memory_space<vmem>>, vector<8x128xf32>
    tpu.vector_store %arg8[%c0_17, %c0_18], %19 {strides = array<i32>} : memref<8x128xf32, #tpu.memory_space<vmem>>, vector<8x128xf32>,
    return
  }
  func.func @transform_0(%arg0: i32) -> (i32, i32) {
    %c0_i32 = arith.constant 0 : i32
    %c0_i32_0 = arith.constant 0 : i32
    return %arg0, %c0_i32 : i32, i32
  }
  func.func @transform_1(%arg0: i32) -> (i32, i32) {
    %c0_i32 = arith.constant 0 : i32
    %c0_i32_0 = arith.constant 0 : i32
    %c0_i32_1 = arith.constant 0 : i32
    return %c0_i32, %c0_i32_0 : i32, i32
  }
  func.func @transform_2(%arg0: i32) -> (i32, i32) {
    %c0_i32 = arith.constant 0 : i32
    %c0_i32_0 = arith.constant 0 : i32
    %c0_i32_1 = arith.constant 0 : i32
    return %c0_i32, %c0_i32_0 : i32, i32
  }
  func.func @transform_3(%arg0: i32) -> (i32, i32) {
    %c0_i32 = arith.constant 0 : i32
    %c0_i32_0 = arith.constant 0 : i32
    %c0_i32_1 = arith.constant 0 : i32
    return %c0_i32, %c0_i32_0 : i32, i32
  }
  func.func @transform_4(%arg0: i32) -> (i32, i32) {
    %c0_i32 = arith.constant 0 : i32
    %c0_i32_0 = arith.constant 0 : i32
    %c0_i32_1 = arith.constant 0 : i32
    return %c0_i32, %c0_i32_0 : i32, i32
  }
  func.func @transform_5(%arg0: i32) -> (i32, i32) {
    %c0_i32 = arith.constant 0 : i32
    %c0_i32_0 = arith.constant 0 : i32
    %c0_i32_1 = arith.constant 0 : i32
    return %c0_i32, %c0_i32_0 : i32, i32
  }
  func.func @transform_6(%arg0: i32) -> (i32, i32) {
    %c0_i32 = arith.constant 0 : i32
    %c0_i32_0 = arith.constant 0 : i32
    %c0_i32_1 = arith.constant 0 : i32
    return %c0_i32, %c0_i32_0 : i32, i32
  }
  func.func @transform_7(%arg0: i32) -> (i32, i32) {
    %c0_i32 = arith.constant 0 : i32
    %c0_i32_0 = arith.constant 0 : i32
    return %arg0, %c0_i32 : i32, i32
  }
}

</mosaic_0001>

<bundles_post_ra>
// kernel: lenet5_forward.3
= control target key start
LH: loop header
LB: loop body
LE: loop exit
PB: predicated region body
PF: predicated region fallthrough
CT: control target
= control target key end

     0   :  { %vm221_vm0 = vcmask 1042432   ;;  %v3615_v0 = vmov 0.0   ;;  %vm73_vm1 = vcmask 613376   ;;  %vm3616_vm2 = vmmov 0   ;;  %s5589_s1 = inlined_call_operand.vmem [shape: f32[75,128], index: 1, kind: input, shape index: {}]   ;;  %s5590_s0 = inlined_call_operand.vmem [shape: f32[4,392,75], index: 0, kind: input, shape index: {}]   ;;  %s5591_s2 = inlined_call_operand.vmem [shape: f32[1,128], index: 2, kind: input, shape index: {}]   ;;  %s5592_s3 = inlined_call_operand.vmem [shape: f32[392,128], index: 3, kind: output, shape index: {}]  }
   0x1   :  { %2945 = vmatprep.subr.mxu0 %v3615_v0  ;;  %v3641_v1 = vld [vmem:[%s5589_s1 + $0x48] sm:$0x7]  ;;  %3112 = vmatprep.subr.mxu1 %v3615_v0  ;;  %v3647_v2 = vld [vmem:[%s5589_s1 + $0x40] sm:$0xff]  ;;  %v3658_v3 = vld [vmem:[%s5589_s1 + $0x38] sm:$0xff] }
   0x2   :  { %2946 = vmatpush3.msk.msra.mxu0 %vm221_vm0, %v3641_v1  ;;  %3113 = vmatpush3.msk.msra.mxu1 %vm221_vm0, %v3641_v1  ;;  %v3667_v4 = vld [vmem:[%s5589_s1 + $0x30] sm:$0xff]  ;;  %v3676_v5 = vld [vmem:[%s5589_s1 + $0x28] sm:$0xff]  ;;  %v3685_v6 = vld [vmem:[%s5589_s1 + $0x20] sm:$0xff] }
   0x3   :  { %2947 = vmatprep.subr.mxu0 %v3615_v0  ;;  %3114 = vmatprep.subr.mxu1 %v3615_v0  ;;  %v3694_v7 = vld [vmem:[%s5589_s1 + $0x18] sm:$0xff]  ;;  %v3703_v8 = vld [vmem:[%s5589_s1 + $0x10] sm:$0xff]  ;;  %v3712_v9 = vld [vmem:[%s5589_s1 + $0x8] sm:$0xff] }
   0x4   :  { %2948 = vmatpush3.msra.mxu0 %v3647_v2  ;;  %3115 = vmatpush3.msra.mxu1 %v3647_v2  ;;  %v3721_v10 = vld [vmem:[%s5589_s1] sm:$0xff]  ;;  %v2411_v12 = vld [vmem:[%s5590_s0 + $0x188] sm:$0xff]  ;;  %v2412_v14 = vld [vmem:[%s5590_s0 + $0x190] sm:$0xff] }
   0x5   :  { %2949 = vmatprep.subr.mxu0 %v3615_v0  ;;  %3116 = vmatprep.subr.mxu1 %v3615_v0  ;;  %v24_v11 = vld [vmem:[%s5590_s0] sm:$0xff]  ;;  %v25_v13 = vld [vmem:[%s5590_s0 + $0x8] sm:$0xff]  ;;  %v26_v15 = vld [vmem:[%s5590_s0 + $0x10] sm:$0xff] }
   0x6   :  { %2950 = vmatpush3.msra.mxu0 %v3658_v3  ;;  %3117 = vmatpush3.msra.mxu1 %v3658_v3  ;;  %v2413_v16 = vld [vmem:[%s5590_s0 + $0x198] sm:$0xff]  ;;  %v2414_v18 = vld [vmem:[%s5590_s0 + $0x1a0] sm:$0xff]  ;;  %v2415_v20 = vld [vmem:[%s5590_s0 + $0x1a8] sm:$0xff] }
   0x7   :  { %2951 = vmatprep.subr.mxu0 %v3615_v0  ;;  %3118 = vmatprep.subr.mxu1 %v3615_v0  ;;  %v27_v17 = vld [vmem:[%s5590_s0 + $0x18] sm:$0xff]  ;;  %v28_v19 = vld [vmem:[%s5590_s0 + $0x20] sm:$0xff]  ;;  %v29_v21 = vld [vmem:[%s5590_s0 + $0x28] sm:$0xff] }
   0x8   :  { %2952 = vmatpush3.msra.mxu0 %v3667_v4  ;;  %3119 = vmatpush3.msra.mxu1 %v3667_v4  ;;  %v2416_v22 = vld [vmem:[%s5590_s0 + $0x1b0] sm:$0xff]  ;;  %v2417_v24 = vld [vmem:[%s5590_s0 + $0x1b8] sm:$0xff]  ;;  %v2418_v26 = vld [vmem:[%s5590_s0 + $0x1c0] sm:$0xff] }
   0x9   :  { %2953 = vmatprep.subr.mxu0 %v3615_v0  ;;  %3120 = vmatprep.subr.mxu1 %v3615_v0  ;;  %v30_v23 = vld [vmem:[%s5590_s0 + $0x30] sm:$0xff]  ;;  %v31_v25 = vld [vmem:[%s5590_s0 + $0x38] sm:$0xff]  ;;  %v32_v27 = vld [vmem:[%s5590_s0 + $0x40] sm:$0xff] }
   0xa   :  { %2954 = vmatpush3.msra.mxu0 %v3676_v5  ;;  %3121 = vmatpush3.msra.mxu1 %v3676_v5  ;;  %v2419_v28 = vld [vmem:[%s5590_s0 + $0x1c8] sm:$0xff]  ;;  %v2420_v30 = vld [vmem:[%s5590_s0 + $0x1d0] sm:$0xff]  ;;  %v2421_v32 = vld [vmem:[%s5590_s0 + $0x1d8] sm:$0xff] }
   0xb   :  { %2955 = vmatprep.subr.mxu0 %v3615_v0  ;;  %3122 = vmatprep.subr.mxu1 %v3615_v0  ;;  %v33_v29 = vld [vmem:[%s5590_s0 + $0x48] sm:$0xff]  ;;  %v34_v31 = vld [vmem:[%s5590_s0 + $0x50] sm:$0xff]  ;;  %v35_v33 = vld [vmem:[%s5590_s0 + $0x58] sm:$0xff] }
   0xc   :  { %2956 = vmatpush3.msra.mxu0 %v3685_v6  ;;  %3123 = vmatpush3.msra.mxu1 %v3685_v6  ;;  %v2422_v34 = vld [vmem:[%s5590_s0 + $0x1e0] sm:$0xff]  ;;  %v2423_v36 = vld [vmem:[%s5590_s0 + $0x1e8] sm:$0xff]  ;;  %v2424_v38 = vld [vmem:[%s5590_s0 + $0x1f0] sm:$0xff] }
   0xd   :  { %2957 = vmatprep.subr.mxu0 %v3615_v0  ;;  %3124 = vmatprep.subr.mxu1 %v3615_v0  ;;  %v36_v35 = vld [vmem:[%s5590_s0 + $0x60] sm:$0xff]  ;;  %v37_v37 = vld [vmem:[%s5590_s0 + $0x68] sm:$0xff]  ;;  %v38_v39 = vld [vmem:[%s5590_s0 + $0x70] sm:$0xff] }
   0xe   :  { %2958 = vmatpush3.msra.mxu0 %v3694_v7  ;;  %3125 = vmatpush3.msra.mxu1 %v3694_v7  ;;  %v2425_v40 = vld [vmem:[%s5590_s0 + $0x1f8] sm:$0xff]  ;;  %v2426_v42 = vld [vmem:[%s5590_s0 + $0x200] sm:$0xff]  ;;  %v2427_v44 = vld [vmem:[%s5590_s0 + $0x208] sm:$0xff] }
   0xf   :  { %2959 = vmatprep.subr.mxu0 %v3615_v0  ;;  %3126 = vmatprep.subr.mxu1 %v3615_v0  ;;  %v39_v41 = vld [vmem:[%s5590_s0 + $0x78] sm:$0xff]  ;;  %v40_v43 = vld [vmem:[%s5590_s0 + $0x80] sm:$0xff]  ;;  %v41_v45 = vld [vmem:[%s5590_s0 + $0x88] sm:$0xff] }
  0x10   :  { %2960 = vmatpush3.msra.mxu0 %v3703_v8  ;;  %3127 = vmatpush3.msra.mxu1 %v3703_v8  ;;  %v2428_v46 = vld [vmem:[%s5590_s0 + $0x210] sm:$0xff]  ;;  %v2429_v48 = vld [vmem:[%s5590_s0 + $0x218] sm:$0xff]  ;;  %v2430_v50 = vld [vmem:[%s5590_s0 + $0x220] sm:$0xff] }
  0x11   :  { %2961 = vmatprep.subr.mxu0 %v3615_v0  ;;  %3128 = vmatprep.subr.mxu1 %v3615_v0  ;;  %v42_v47 = vld [vmem:[%s5590_s0 + $0x90] sm:$0xff]  ;;  %v43_v49 = vld [vmem:[%s5590_s0 + $0x98] sm:$0xff]  ;;  %v44_v51 = vld [vmem:[%s5590_s0 + $0xa0] sm:$0xff] }
  0x12   :  { %2962 = vmatpush3.msra.mxu0 %v3712_v9  ;;  %3129 = vmatpush3.msra.mxu1 %v3712_v9  ;;  %v2431_v52 = vld [vmem:[%s5590_s0 + $0x228] sm:$0xff]  ;;  %v2432_v54 = vld [vmem:[%s5590_s0 + $0x230] sm:$0xff]  ;;  %v2433_v56 = vld [vmem:[%s5590_s0 + $0x238] sm:$0xff] }
  0x13   :  { %2963 = vmatprep.subr.mxu0 %v3615_v0  ;;  %2965 = vmatprep.mubr.msk.f32.mxu0 %vm3616_vm2, %v3615_v0  ;;  %v45_v53 = vld [vmem:[%s5590_s0 + $0xa8] sm:$0xff]  ;;  %v46_v55 = vld [vmem:[%s5590_s0 + $0xb0] sm:$0xff]  ;;  %v47_v57 = vld [vmem:[%s5590_s0 + $0xb8] sm:$0xff] }
  0x14   :  { %2964 = vmatpush3.msra.mxu0 %v3721_v10  ;;  %3130 = vmatprep.subr.mxu1 %v3615_v0  ;;  %v2434_v58 = vld [vmem:[%s5590_s0 + $0x240] sm:$0xff]  ;;  %v2435_v60 = vld [vmem:[%s5590_s0 + $0x248] sm:$0xff]  ;;  %v2436_v62 = vld [vmem:[%s5590_s0 + $0x250] sm:$0xff] }
  0x15   :  { %2966 = vmatmul.mubr.msk.f32.vlgmr.msra.gmra.mxu0 %vm73_vm1, %v24_v11  ;;  %3131 = vmatpush3.msra.mxu1 %v3721_v10  ;;  %v48_v59 = vld [vmem:[%s5590_s0 + $0xc0] sm:$0xff]  ;;  %v49_v61 = vld [vmem:[%s5590_s0 + $0xc8] sm:$0xff]  ;;  %v50_v63 = vld [vmem:[%s5590_s0 + $0xd0] sm:$0xff] }
  0x16   :  { %3132 = vmatprep.mubr.msk.f32.mxu1 %vm3616_vm2, %v3615_v0  ;;  %3279 = vmatprep.subr.mxu0 %v3615_v0  ;;  %v2442_v11 = vld [vmem:[%s5590_s0 + $0x280] sm:$0xff] }
  0x17   :  { %3133 = vmatmul.mubr.msk.f32.vlgmr.msra.gmra.mxu1 %vm73_vm1, %v2411_v12  ;;  %3280 = vmatpush3.msk.msra.mxu0 %vm221_vm0, %v3641_v1  ;;  %v56_v12 = vld [vmem:[%s5590_s0 + $0x100] sm:$0xff] }
  0x18   :  { %3446 = vmatprep.subr.mxu1 %v3615_v0  ;;  %2968 = vmatprep.mubr.msk.f32.mxu0 %vm3616_vm2, %v3615_v0 }
  0x19   :  { %3447 = vmatpush3.msk.msra.mxu1 %vm221_vm0, %v3641_v1  ;;  %2969 = vmatmul.mubr.msk.f32.gmra.mxu0 %vm73_vm1, %v25_v13  ;;  %v2437_v1 = vld [vmem:[%s5590_s0 + $0x258] sm:$0xff]  ;;  %v2443_v13 = vld [vmem:[%s5590_s0 + $0x288] sm:$0xff] }
  0x1a   :  { %3135 = vmatprep.mubr.msk.f32.mxu1 %vm3616_vm2, %v3615_v0  ;;  %2971 = vmatprep.mubr.msk.f32.mxu0 %vm3616_vm2, %v3615_v0 }
  0x1b   :  { %3136 = vmatmul.mubr.msk.f32.gmra.mxu1 %vm73_vm1, %v2412_v14  ;;  %3281 = vmatprep.subr.mxu0 %v3615_v0  ;;  %v57_v14 = vld [vmem:[%s5590_s0 + $0x108] sm:$0xff] }
  0x1c   :  { %3138 = vmatprep.mubr.msk.f32.mxu1 %vm3616_vm2, %v3615_v0  ;;  %3282 = vmatpush3.msra.mxu0 %v3647_v2 }
  0x1d   :  { %2972 = vmatmul.mubr.msk.f32.gmra.mxu0 %vm73_vm1, %v26_v15  ;;  %3448 = vmatprep.subr.mxu1 %v3615_v0  ;;  %v2444_v15 = vld [vmem:[%s5590_s0 + $0x290] sm:$0xff] }
  0x1e   :  { %2974 = vmatprep.mubr.msk.f32.mxu0 %vm3616_vm2, %v3615_v0  ;;  %3449 = vmatpush3.msra.mxu1 %v3647_v2  ;;  %v51_v2 = vld [vmem:[%s5590_s0 + $0xd8] sm:$0xff] }
  0x1f   :  { %3139 = vmatmul.mubr.msk.f32.gmra.mxu1 %vm73_vm1, %v2413_v16  ;;  %3283 = vmatprep.subr.mxu0 %v3615_v0  ;;  %v58_v16 = vld [vmem:[%s5590_s0 + $0x110] sm:$0xff] }
  0x20   :  { %3141 = vmatprep.mubr.msk.f32.mxu1 %vm3616_vm2, %v3615_v0  ;;  %3284 = vmatpush3.msra.mxu0 %v3658_v3 }
  0x21   :  { %2975 = vmatmul.mubr.msk.f32.gmra.mxu0 %vm73_vm1, %v27_v17  ;;  %3450 = vmatprep.subr.mxu1 %v3615_v0  ;;  %v2445_v17 = vld [vmem:[%s5590_s0 + $0x298] sm:$0xff] }
  0x22   :  { %2977 = vmatprep.mubr.msk.f32.mxu0 %vm3616_vm2, %v3615_v0  ;;  %3451 = vmatpush3.msra.mxu1 %v3658_v3  ;;  %v2438_v3 = vld [vmem:[%s5590_s0 + $0x260] sm:$0xff] }
  0x23   :  { %3142 = vmatmul.mubr.msk.f32.gmra.mxu1 %vm73_vm1, %v2414_v18  ;;  %3285 = vmatprep.subr.mxu0 %v3615_v0  ;;  %v59_v18 = vld [vmem:[%s5590_s0 + $0x118] sm:$0xff] }
  0x24   :  { %3144 = vmatprep.mubr.msk.f32.mxu1 %vm3616_vm2, %v3615_v0  ;;  %3286 = vmatpush3.msra.mxu0 %v3667_v4 }
  0x25   :  { %2978 = vmatmul.mubr.msk.f32.gmra.mxu0 %vm73_vm1, %v28_v19  ;;  %3452 = vmatprep.subr.mxu1 %v3615_v0  ;;  %v2446_v19 = vld [vmem:[%s5590_s0 + $0x2a0] sm:$0xff] }
  0x26   :  { %2980 = vmatprep.mubr.msk.f32.mxu0 %vm3616_vm2, %v3615_v0  ;;  %3453 = vmatpush3.msra.mxu1 %v3667_v4  ;;  %v52_v4 = vld [vmem:[%s5590_s0 + $0xe0] sm:$0xff] }
  0x27   :  { %3145 = vmatmul.mubr.msk.f32.gmra.mxu1 %vm73_vm1, %v2415_v20  ;;  %3287 = vmatprep.subr.mxu0 %v3615_v0  ;;  %v60_v20 = vld [vmem:[%s5590_s0 + $0x120] sm:$0xff] }
  0x28   :  { %3147 = vmatprep.mubr.msk.f32.mxu1 %vm3616_vm2, %v3615_v0  ;;  %3288 = vmatpush3.msra.mxu0 %v3676_v5 }
  0x29   :  { %2981 = vmatmul.mubr.msk.f32.gmra.mxu0 %vm73_vm1, %v29_v21  ;;  %3454 = vmatprep.subr.mxu1 %v3615_v0  ;;  %v2447_v21 = vld [vmem:[%s5590_s0 + $0x2a8] sm:$0xff] }
  0x2a   :  { %2983 = vmatprep.mubr.msk.f32.mxu0 %vm3616_vm2, %v3615_v0  ;;  %3455 = vmatpush3.msra.mxu1 %v3676_v5  ;;  %v2439_v5 = vld [vmem:[%s5590_s0 + $0x268] sm:$0xff] }
  0x2b   :  { %3148 = vmatmul.mubr.msk.f32.gmra.mxu1 %vm73_vm1, %v2416_v22  ;;  %3289 = vmatprep.subr.mxu0 %v3615_v0  ;;  %v61_v22 = vld [vmem:[%s5590_s0 + $0x128] sm:$0xff] }
  0x2c   :  { %3150 = vmatprep.mubr.msk.f32.mxu1 %vm3616_vm2, %v3615_v0  ;;  %3290 = vmatpush3.msra.mxu0 %v3685_v6 }
  0x2d   :  { %2984 = vmatmul.mubr.msk.f32.gmra.mxu0 %vm73_vm1, %v30_v23  ;;  %3456 = vmatprep.subr.mxu1 %v3615_v0  ;;  %v2448_v23 = vld [vmem:[%s5590_s0 + $0x2b0] sm:$0xff] }
  0x2e   :  { %2986 = vmatprep.mubr.msk.f32.mxu0 %vm3616_vm2, %v3615_v0  ;;  %3457 = vmatpush3.msra.mxu1 %v3685_v6  ;;  %v53_v6 = vld [vmem:[%s5590_s0 + $0xe8] sm:$0xff] }
  0x2f   :  { %3151 = vmatmul.mubr.msk.f32.gmra.mxu1 %vm73_vm1, %v2417_v24  ;;  %3291 = vmatprep.subr.mxu0 %v3615_v0  ;;  %v62_v24 = vld [vmem:[%s5590_s0 + $0x130] sm:$0xff] }
  0x30   :  { %3153 = vmatprep.mubr.msk.f32.mxu1 %vm3616_vm2, %v3615_v0  ;;  %3292 = vmatpush3.msra.mxu0 %v3694_v7 }
  0x31   :  { %2987 = vmatmul.mubr.msk.f32.gmra.mxu0 %vm73_vm1, %v31_v25  ;;  %3458 = vmatprep.subr.mxu1 %v3615_v0  ;;  %v2449_v25 = vld [vmem:[%s5590_s0 + $0x2b8] sm:$0xff] }
  0x32   :  { %2989 = vmatprep.mubr.msk.f32.mxu0 %vm3616_vm2, %v3615_v0  ;;  %3459 = vmatpush3.msra.mxu1 %v3694_v7  ;;  %v2440_v7 = vld [vmem:[%s5590_s0 + $0x270] sm:$0xff] }
  0x33   :  { %3154 = vmatmul.mubr.msk.f32.gmra.mxu1 %vm73_vm1, %v2418_v26  ;;  %3293 = vmatprep.subr.mxu0 %v3615_v0  ;;  %v63_v26 = vld [vmem:[%s5590_s0 + $0x138] sm:$0xff] }
  0x34   :  { %3156 = vmatprep.mubr.msk.f32.mxu1 %vm3616_vm2, %v3615_v0  ;;  %3294 = vmatpush3.msra.mxu0 %v3703_v8 }
  0x35   :  { %2990 = vmatmul.mubr.msk.f32.gmra.mxu0 %vm73_vm1, %v32_v27  ;;  %3460 = vmatprep.subr.mxu1 %v3615_v0  ;;  %v2450_v27 = vld [vmem:[%s5590_s0 + $0x2c0] sm:$0xff] }
  0x36   :  { %2992 = vmatprep.mubr.msk.f32.mxu0 %vm3616_vm2, %v3615_v0  ;;  %3461 = vmatpush3.msra.mxu1 %v3703_v8  ;;  %v54_v8 = vld [vmem:[%s5590_s0 + $0xf0] sm:$0xff] }
  0x37   :  { %3157 = vmatmul.mubr.msk.f32.gmra.mxu1 %vm73_vm1, %v2419_v28  ;;  %3295 = vmatprep.subr.mxu0 %v3615_v0  ;;  %v64_v28 = vld [vmem:[%s5590_s0 + $0x140] sm:$0xff] }
  0x38   :  { %3159 = vmatprep.mubr.msk.f32.mxu1 %vm3616_vm2, %v3615_v0  ;;  %3296 = vmatpush3.msra.mxu0 %v3712_v9 }
  0x39   :  { %2993 = vmatmul.mubr.msk.f32.gmra.mxu0 %vm73_vm1, %v33_v29  ;;  %3462 = vmatprep.subr.mxu1 %v3615_v0  ;;  %v2451_v29 = vld [vmem:[%s5590_s0 + $0x2c8] sm:$0xff] }
  0x3a   :  { %2995 = vmatprep.mubr.msk.f32.mxu0 %vm3616_vm2, %v3615_v0  ;;  %3463 = vmatpush3.msra.mxu1 %v3712_v9  ;;  %v2441_v9 = vld [vmem:[%s5590_s0 + $0x278] sm:$0xff] }
  0x3b   :  { %3160 = vmatmul.mubr.msk.f32.gmra.mxu1 %vm73_vm1, %v2420_v30  ;;  %3297 = vmatprep.subr.mxu0 %v3615_v0  ;;  %v65_v30 = vld [vmem:[%s5590_s0 + $0x148] sm:$0xff] }
  0x3c   :  { %3162 = vmatprep.mubr.msk.f32.mxu1 %vm3616_vm2, %v3615_v0  ;;  %3298 = vmatpush3.msra.mxu0 %v3721_v10 }
  0x3d   :  { %2996 = vmatmul.mubr.msk.f32.gmra.mxu0 %vm73_vm1, %v34_v31  ;;  %3464 = vmatprep.subr.mxu1 %v3615_v0  ;;  %v2452_v31 = vld [vmem:[%s5590_s0 + $0x2d0] sm:$0xff] }
  0x3e   :  { %2998 = vmatprep.mubr.msk.f32.mxu0 %vm3616_vm2, %v3615_v0  ;;  %3465 = vmatpush3.msra.mxu1 %v3721_v10  ;;  %v55_v10 = vld [vmem:[%s5590_s0 + $0xf8] sm:$0xff] }
  0x3f   :  { %3163 = vmatmul.mubr.msk.f32.gmra.mxu1 %vm73_vm1, %v2421_v32  ;;  %v66_v32 = vld [vmem:[%s5590_s0 + $0x150] sm:$0xff] }
  0x40   :  { %3165 = vmatprep.mubr.msk.f32.mxu1 %vm3616_vm2, %v3615_v0 }
  0x41   :  { %2999 = vmatmul.mubr.msk.f32.gmra.mxu0 %vm73_vm1, %v35_v33  ;;  %v2453_v33 = vld [vmem:[%s5590_s0 + $0x2d8] sm:$0xff] }
  0x42   :  { %3001 = vmatprep.mubr.msk.f32.mxu0 %vm3616_vm2, %v3615_v0 }
  0x43   :  { %3166 = vmatmul.mubr.msk.f32.gmra.mxu1 %vm73_vm1, %v2422_v34  ;;  %v67_v34 = vld [vmem:[%s5590_s0 + $0x158] sm:$0xff] }
  0x44   :  { %3168 = vmatprep.mubr.msk.f32.mxu1 %vm3616_vm2, %v3615_v0 }
  0x45   :  { %3002 = vmatmul.mubr.msk.f32.gmra.mxu0 %vm73_vm1, %v36_v35  ;;  %v2454_v35 = vld [vmem:[%s5590_s0 + $0x2e0] sm:$0xff] }
  0x46   :  { %3004 = vmatprep.mubr.msk.f32.mxu0 %vm3616_vm2, %v3615_v0 }
  0x47   :  { %3169 = vmatmul.mubr.msk.f32.gmra.mxu1 %vm73_vm1, %v2423_v36  ;;  %v68_v36 = vld [vmem:[%s5590_s0 + $0x160] sm:$0xff] }
  0x48   :  { %3171 = vmatprep.mubr.msk.f32.mxu1 %vm3616_vm2, %v3615_v0 }
  0x49   :  { %3005 = vmatmul.mubr.msk.f32.gmra.mxu0 %vm73_vm1, %v37_v37  ;;  %v2455_v37 = vld [vmem:[%s5590_s0 + $0x2e8] sm:$0xff] }
  0x4a   :  { %3007 = vmatprep.mubr.msk.f32.mxu0 %vm3616_vm2, %v3615_v0 }
  0x4b   :  { %3172 = vmatmul.mubr.msk.f32.gmra.mxu1 %vm73_vm1, %v2424_v38  ;;  %v69_v38 = vld [vmem:[%s5590_s0 + $0x168] sm:$0xff] }
  0x4c   :  { %3174 = vmatprep.mubr.msk.f32.mxu1 %vm3616_vm2, %v3615_v0 }
  0x4d   :  { %3008 = vmatmul.mubr.msk.f32.gmra.mxu0 %vm73_vm1, %v38_v39  ;;  %v2456_v39 = vld [vmem:[%s5590_s0 + $0x2f0] sm:$0xff] }
  0x4e   :  { %3010 = vmatprep.mubr.msk.f32.mxu0 %vm3616_vm2, %v3615_v0 }
  0x4f   :  { %3175 = vmatmul.mubr.msk.f32.gmra.mxu1 %vm73_vm1, %v2425_v40  ;;  %v70_v40 = vld [vmem:[%s5590_s0 + $0x170] sm:$0xff] }
  0x50   :  { %3177 = vmatprep.mubr.msk.f32.mxu1 %vm3616_vm2, %v3615_v0 }
  0x51   :  { %3011 = vmatmul.mubr.msk.f32.gmra.mxu0 %vm73_vm1, %v39_v41  ;;  %v2457_v41 = vld [vmem:[%s5590_s0 + $0x2f8] sm:$0xff] }
  0x52   :  { %3013 = vmatprep.mubr.msk.f32.mxu0 %vm3616_vm2, %v3615_v0 }
  0x53   :  { %3178 = vmatmul.mubr.msk.f32.gmra.mxu1 %vm73_vm1, %v2426_v42  ;;  %v71_v42 = vld [vmem:[%s5590_s0 + $0x178] sm:$0xff] }
  0x54   :  { %3180 = vmatprep.mubr.msk.f32.mxu1 %vm3616_vm2, %v3615_v0 }
  0x55   :  { %3014 = vmatmul.mubr.msk.f32.gmra.mxu0 %vm73_vm1, %v40_v43  ;;  %v2458_v43 = vld [vmem:[%s5590_s0 + $0x300] sm:$0xff] }
  0x56   :  { %3016 = vmatprep.mubr.msk.f32.mxu0 %vm3616_vm2, %v3615_v0 }
  0x57   :  { %3181 = vmatmul.mubr.msk.f32.gmra.mxu1 %vm73_vm1, %v2427_v44  ;;  %v72_v44 = vld [vmem:[%s5590_s0 + $0x180] sm:$0xff] }
  0x58   :  { %3183 = vmatprep.mubr.msk.f32.mxu1 %vm3616_vm2, %v3615_v0 }
  0x59   :  { %3017 = vmatmul.mubr.msk.f32.gmra.mxu0 %vm73_vm1, %v41_v45  ;;  %v2459_v45 = vld [vmem:[%s5590_s0 + $0x308] sm:$0xff] }
  0x5a   :  { %3019 = vmatprep.mubr.msk.f32.mxu0 %vm3616_vm2, %v3615_v0 }
  0x5b   :  { %3184 = vmatmul.mubr.msk.f32.gmra.mxu1 %vm73_vm1, %v2428_v46 }
  0x5c   :  { %3186 = vmatprep.mubr.msk.f32.mxu1 %vm3616_vm2, %v3615_v0 }
  0x5d   :  { %3020 = vmatmul.mubr.msk.f32.gmra.mxu0 %vm73_vm1, %v42_v47  ;;  %v2510_v47 = vld [vmem:[%s5590_s0 + $0x310] sm:$0xff] }
  0x5e   :  { %3022 = vmatprep.mubr.msk.f32.mxu0 %vm3616_vm2, %v3615_v0 }
  0x5f   :  { %3187 = vmatmul.mubr.msk.f32.gmra.mxu1 %vm73_vm1, %v2429_v48 }
  0x60   :  { %3189 = vmatprep.mubr.msk.f32.mxu1 %vm3616_vm2, %v3615_v0 }
  0x61   :  { %3023 = vmatmul.mubr.msk.f32.gmra.mxu0 %vm73_vm1, %v43_v49 }
  0x62   :  { %3025 = vmatprep.mubr.msk.f32.mxu0 %vm3616_vm2, %v3615_v0 }
  0x63   :  { %3190 = vmatmul.mubr.msk.f32.gmra.mxu1 %vm73_vm1, %v2430_v50 }
  0x64   :  { %3192 = vmatprep.mubr.msk.f32.mxu1 %vm3616_vm2, %v3615_v0 }
  0x65   :  { %3026 = vmatmul.mubr.msk.f32.gmra.mxu0 %vm73_vm1, %v44_v51  ;;  %v2609_v51 = vld [vmem:[%s5590_s0 + $0x498] sm:$0xff] }
  0x66   :  { %3028 = vmatprep.mubr.msk.f32.mxu0 %vm3616_vm2, %v3615_v0 }
  0x67   :  { %3193 = vmatmul.mubr.msk.f32.gmra.mxu1 %vm73_vm1, %v2431_v52 }
  0x68   :  { %3195 = vmatprep.mubr.msk.f32.mxu1 %vm3616_vm2, %v3615_v0 }
  0x69   :  { %3029 = vmatmul.mubr.msk.f32.gmra.mxu0 %vm73_vm1, %v45_v53 }
  0x6a   :  { %3031 = vmatprep.mubr.msk.f32.mxu0 %vm3616_vm2, %v3615_v0 }
  0x6b   :  { %3196 = vmatmul.mubr.msk.f32.gmra.mxu1 %vm73_vm1, %v2432_v54  ;;  %v2511_v54 = vld [vmem:[%s5590_s0 + $0x318] sm:$0xff] }
  0x6c   :  { %3198 = vmatprep.mubr.msk.f32.mxu1 %vm3616_vm2, %v3615_v0 }
  0x6d   :  { %3032 = vmatmul.mubr.msk.f32.gmra.mxu0 %vm73_vm1, %v46_v55 }
  0x6e   :  { %3034 = vmatprep.mubr.msk.f32.mxu0 %vm3616_vm2, %v3615_v0 }
  0x6f   :  { %3199 = vmatmul.mubr.msk.f32.gmra.mxu1 %vm73_vm1, %v2433_v56 }
  0x70   :  { %3201 = vmatprep.mubr.msk.f32.mxu1 %vm3616_vm2, %v3615_v0 }
  0x71   :  { %3035 = vmatmul.mubr.msk.f32.gmra.mxu0 %vm73_vm1, %v47_v57 }
  0x72   :  { %3037 = vmatprep.mubr.msk.f32.mxu0 %vm3616_vm2, %v3615_v0 }
  0x73   :  { %3202 = vmatmul.mubr.msk.f32.gmra.mxu1 %vm73_vm1, %v2434_v58  ;;  %v2610_v58 = vld [vmem:[%s5590_s0 + $0x4a0] sm:$0xff] }
  0x74   :  { %3204 = vmatprep.mubr.msk.f32.mxu1 %vm3616_vm2, %v3615_v0 }
  0x75   :  { %3038 = vmatmul.mubr.msk.f32.gmra.mxu0 %vm73_vm1, %v48_v59 }
  0x76   :  { %3040 = vmatprep.mubr.msk.f32.mxu0 %vm3616_vm2, %v3615_v0 }
  0x77   :  { %3205 = vmatmul.mubr.msk.f32.gmra.mxu1 %vm73_vm1, %v2435_v60 }
  0x78   :  { %3207 = vmatprep.mubr.msk.f32.mxu1 %vm3616_vm2, %v3615_v0 }
  0x79   :  { %3041 = vmatmul.mubr.msk.f32.gmra.mxu0 %vm73_vm1, %v49_v61  ;;  %v2512_v61 = vld [vmem:[%s5590_s0 + $0x320] sm:$0xff] }
  0x7a   :  { %3043 = vmatprep.mubr.msk.f32.mxu0 %vm3616_vm2, %v3615_v0 }
  0x7b   :  { %3208 = vmatmul.mubr.msk.f32.gmra.mxu1 %vm73_vm1, %v2436_v62 }
  0x7c   :  { %3210 = vmatprep.mubr.msk.f32.mxu1 %vm3616_vm2, %v3615_v0 }
  0x7d   :  { %3044 = vmatmul.mubr.msk.f32.gmra.mxu0 %vm73_vm1, %v50_v63 }
  0x7e   :  { %3046 = vmatprep.mubr.msk.f32.mxu0 %vm3616_vm2, %v3615_v0 }
  0x7f   :  { %3211 = vmatmul.mubr.msk.f32.gmra.mxu1 %vm73_vm1, %v2437_v1 }
  0x80   :  { %3213 = vmatprep.mubr.msk.f32.mxu1 %vm3616_vm2, %v3615_v0 }
  0x81   :  { %3047 = vmatmul.mubr.msk.f32.gmra.mxu0 %vm73_vm1, %v51_v2  ;;  %v2611_v2 = vld [vmem:[%s5590_s0 + $0x4a8] sm:$0xff] }
  0x82   :  { %3049 = vmatprep.mubr.msk.f32.mxu0 %vm3616_vm2, %v3615_v0 }
  0x83   :  { %3214 = vmatmul.mubr.msk.f32.gmra.mxu1 %vm73_vm1, %v2438_v3 }
  0x84   :  { %3216 = vmatprep.mubr.msk.f32.mxu1 %vm3616_vm2, %v3615_v0 }
  0x85   :  { %3050 = vmatmul.mubr.msk.f32.gmra.mxu0 %vm73_vm1, %v52_v4 }
  0x86   :  { %3052 = vmatprep.mubr.msk.f32.mxu0 %vm3616_vm2, %v3615_v0 }
  0x87   :  { %3217 = vmatmul.mubr.msk.f32.gmra.mxu1 %vm73_vm1, %v2439_v5  ;;  %v2513_v5 = vld [vmem:[%s5590_s0 + $0x328] sm:$0xff] }
  0x88   :  { %3219 = vmatprep.mubr.msk.f32.mxu1 %vm3616_vm2, %v3615_v0 }
  0x89   :  { %3053 = vmatmul.mubr.msk.f32.gmra.mxu0 %vm73_vm1, %v53_v6 }
  0x8a   :  { %3055 = vmatprep.mubr.msk.f32.mxu0 %vm3616_vm2, %v3615_v0 }
  0x8b   :  { %3220 = vmatmul.mubr.msk.f32.gmra.mxu1 %vm73_vm1, %v2440_v7 }
  0x8c   :  { %3222 = vmatprep.mubr.msk.f32.mxu1 %vm3616_vm2, %v3615_v0 }
  0x8d   :  { %3056 = vmatmul.mubr.msk.f32.gmra.mxu0 %vm73_vm1, %v54_v8 }
  0x8e   :  { %3058 = vmatprep.mubr.msk.f32.mxu0 %vm3616_vm2, %v3615_v0 }
  0x8f   :  { %3223 = vmatmul.mubr.msk.f32.gmra.mxu1 %vm73_vm1, %v2441_v9  ;;  %v2612_v9 = vld [vmem:[%s5590_s0 + $0x4b0] sm:$0xff] }
  0x90   :  { %3225 = vmatprep.mubr.msk.f32.mxu1 %vm3616_vm2, %v3615_v0 }
  0x91   :  { %3059 = vmatmul.mubr.msk.f32.gmra.mxu0 %vm73_vm1, %v55_v10 }
  0x92   :  { %3061 = vmatprep.mubr.msk.f32.mxu0 %vm3616_vm2, %v3615_v0 }
  0x93   :  { %3226 = vmatmul.mubr.msk.f32.gmra.mxu1 %vm73_vm1, %v2442_v11 }
  0x94   :  { %3228 = vmatprep.mubr.msk.f32.mxu1 %vm3616_vm2, %v3615_v0 }
  0x95   :  { %3062 = vmatmul.mubr.msk.f32.gmra.mxu0 %vm73_vm1, %v56_v12  ;;  %v2514_v12 = vld [vmem:[%s5590_s0 + $0x330] sm:$0xff] }
  0x96   :  { %3064 = vmatprep.mubr.msk.f32.mxu0 %vm3616_vm2, %v3615_v0 }
  0x97   :  { %3229 = vmatmul.mubr.msk.f32.gmra.mxu1 %vm73_vm1, %v2443_v13 }
  0x98   :  { %3231 = vmatprep.mubr.msk.f32.mxu1 %vm3616_vm2, %v3615_v0 }
  0x99   :  { %3065 = vmatmul.mubr.msk.f32.gmra.mxu0 %vm73_vm1, %v57_v14 }
  0x9a   :  { %3067 = vmatprep.mubr.msk.f32.mxu0 %vm3616_vm2, %v3615_v0 }
  0x9b   :  { %3232 = vmatmul.mubr.msk.f32.gmra.mxu1 %vm73_vm1, %v2444_v15 }
  0x9c   :  { %3234 = vmatprep.mubr.msk.f32.mxu1 %vm3616_vm2, %v3615_v0 }
  0x9d   :  { %3068 = vmatmul.mubr.msk.f32.gmra.mxu0 %vm73_vm1, %v58_v16  ;;  %v2613_v16 = vld [vmem:[%s5590_s0 + $0x4b8] sm:$0xff] }
  0x9e   :  { %3070 = vmatprep.mubr.msk.f32.mxu0 %vm3616_vm2, %v3615_v0 }
  0x9f   :  { %3235 = vmatmul.mubr.msk.f32.gmra.mxu1 %vm73_vm1, %v2445_v17 }
  0xa0   :  { %3237 = vmatprep.mubr.msk.f32.mxu1 %vm3616_vm2, %v3615_v0 }
  0xa1   :  { %3071 = vmatmul.mubr.msk.f32.gmra.mxu0 %vm73_vm1, %v59_v18 }
  0xa2   :  { %3073 = vmatprep.mubr.msk.f32.mxu0 %vm3616_vm2, %v3615_v0 }
  0xa3   :  { %3238 = vmatmul.mubr.msk.f32.gmra.mxu1 %vm73_vm1, %v2446_v19  ;;  %v2515_v19 = vld [vmem:[%s5590_s0 + $0x338] sm:$0xff] }
  0xa4   :  { %3240 = vmatprep.mubr.msk.f32.mxu1 %vm3616_vm2, %v3615_v0 }
  0xa5   :  { %3074 = vmatmul.mubr.msk.f32.gmra.mxu0 %vm73_vm1, %v60_v20 }
  0xa6   :  { %3076 = vmatprep.mubr.msk.f32.mxu0 %vm3616_vm2, %v3615_v0 }
  0xa7   :  { %3241 = vmatmul.mubr.msk.f32.gmra.mxu1 %vm73_vm1, %v2447_v21 }
  0xa8   :  { %3243 = vmatprep.mubr.msk.f32.mxu1 %vm3616_vm2, %v3615_v0 }
  0xa9   :  { %3077 = vmatmul.mubr.msk.f32.gmra.mxu0 %vm73_vm1, %v61_v22 }
  0xaa   :  { %3079 = vmatprep.mubr.msk.f32.mxu0 %vm3616_vm2, %v3615_v0 }
  0xab   :  { %3244 = vmatmul.mubr.msk.f32.gmra.mxu1 %vm73_vm1, %v2448_v23  ;;  %v2614_v23 = vld [vmem:[%s5590_s0 + $0x4c0] sm:$0xff] }
  0xac   :  { %3246 = vmatprep.mubr.msk.f32.mxu1 %vm3616_vm2, %v3615_v0 }
  0xad   :  { %3080 = vmatmul.mubr.msk.f32.gmra.mxu0 %vm73_vm1, %v62_v24 }
  0xae   :  { %3082 = vmatprep.mubr.msk.f32.mxu0 %vm3616_vm2, %v3615_v0 }
  0xaf   :  { %3247 = vmatmul.mubr.msk.f32.gmra.mxu1 %vm73_vm1, %v2449_v25 }
  0xb0   :  { %3249 = vmatprep.mubr.msk.f32.mxu1 %vm3616_vm2, %v3615_v0 }
  0xb1   :  { %3083 = vmatmul.mubr.msk.f32.gmra.mxu0 %vm73_vm1, %v63_v26  ;;  %v2516_v26 = vld [vmem:[%s5590_s0 + $0x340] sm:$0xff] }
  0xb2   :  { %3085 = vmatprep.mubr.msk.f32.mxu0 %vm3616_vm2, %v3615_v0 }
  0xb3   :  { %3250 = vmatmul.mubr.msk.f32.gmra.mxu1 %vm73_vm1, %v2450_v27 }
  0xb4   :  { %3252 = vmatprep.mubr.msk.f32.mxu1 %vm3616_vm2, %v3615_v0 }
  0xb5   :  { %3086 = vmatmul.mubr.msk.f32.gmra.mxu0 %vm73_vm1, %v64_v28 }
  0xb6   :  { %3088 = vmatprep.mubr.msk.f32.mxu0 %vm3616_vm2, %v3615_v0 }
  0xb7   :  { %3253 = vmatmul.mubr.msk.f32.gmra.mxu1 %vm73_vm1, %v2451_v29 }
  0xb8   :  { %3255 = vmatprep.mubr.msk.f32.mxu1 %vm3616_vm2, %v3615_v0 }
  0xb9   :  { %3089 = vmatmul.mubr.msk.f32.gmra.mxu0 %vm73_vm1, %v65_v30  ;;  %v2615_v30 = vld [vmem:[%s5590_s0 + $0x4c8] sm:$0xff] }
  0xba   :  { %3091 = vmatprep.mubr.msk.f32.mxu0 %vm3616_vm2, %v3615_v0 }
  0xbb   :  { %3256 = vmatmul.mubr.msk.f32.gmra.mxu1 %vm73_vm1, %v2452_v31 }
  0xbc   :  { %3258 = vmatprep.mubr.msk.f32.mxu1 %vm3616_vm2, %v3615_v0 }
  0xbd   :  { %3092 = vmatmul.mubr.msk.f32.gmra.mxu0 %vm73_vm1, %v66_v32 }
  0xbe   :  { %3094 = vmatprep.mubr.msk.f32.mxu0 %vm3616_vm2, %v3615_v0 }
  0xbf   :  { %3259 = vmatmul.mubr.msk.f32.gmra.mxu1 %vm73_vm1, %v2453_v33  ;;  %v2517_v33 = vld [vmem:[%s5590_s0 + $0x348] sm:$0xff] }
  0xc0   :  { %3261 = vmatprep.mubr.msk.f32.mxu1 %vm3616_vm2, %v3615_v0 }
  0xc1   :  { %3095 = vmatmul.mubr.msk.f32.gmra.mxu0 %vm73_vm1, %v67_v34 }
  0xc2   :  { %3097 = vmatprep.mubr.msk.f32.mxu0 %vm3616_vm2, %v3615_v0 }
  0xc3   :  { %3262 = vmatmul.mubr.msk.f32.gmra.mxu1 %vm73_vm1, %v2454_v35 }
  0xc4   :  { %3264 = vmatprep.mubr.msk.f32.mxu1 %vm3616_vm2, %v3615_v0 }
  0xc5   :  { %3098 = vmatmul.mubr.msk.f32.gmra.mxu0 %vm73_vm1, %v68_v36 }
  0xc6   :  { %3100 = vmatprep.mubr.msk.f32.mxu0 %vm3616_vm2, %v3615_v0 }
  0xc7   :  { %3265 = vmatmul.mubr.msk.f32.gmra.mxu1 %vm73_vm1, %v2455_v37  ;;  %v2616_v37 = vld [vmem:[%s5590_s0 + $0x4d0] sm:$0xff] }
  0xc8   :  { %3267 = vmatprep.mubr.msk.f32.mxu1 %vm3616_vm2, %v3615_v0 }
  0xc9   :  { %3101 = vmatmul.mubr.msk.f32.gmra.mxu0 %vm73_vm1, %v69_v38 }
  0xca   :  { %3103 = vmatprep.mubr.msk.f32.mxu0 %vm3616_vm2, %v3615_v0 }
  0xcb   :  { %3268 = vmatmul.mubr.msk.f32.gmra.mxu1 %vm73_vm1, %v2456_v39 }
  0xcc   :  { %3270 = vmatprep.mubr.msk.f32.mxu1 %vm3616_vm2, %v3615_v0 }
  0xcd   :  { %3104 = vmatmul.mubr.msk.f32.gmra.mxu0 %vm73_vm1, %v70_v40  ;;  %v2518_v40 = vld [vmem:[%s5590_s0 + $0x350] sm:$0xff] }
  0xce   :  { %3106 = vmatprep.mubr.msk.f32.mxu0 %vm3616_vm2, %v3615_v0 }
  0xcf   :  { %3271 = vmatmul.mubr.msk.f32.gmra.mxu1 %vm73_vm1, %v2457_v41 }
  0xd0   :  { %3273 = vmatprep.mubr.msk.f32.mxu1 %vm3616_vm2, %v3615_v0 }
  0xd1   :  { %3107 = vmatmul.mubr.msk.f32.gmra.mxu0 %vm73_vm1, %v71_v42 }
  0xd2   :  { %3109 = vmatprep.mubr.msk.f32.mxu0 %vm3616_vm2, %v3615_v0 }
  0xd3   :  { %3274 = vmatmul.mubr.msk.f32.gmra.mxu1 %vm73_vm1, %v2458_v43 }
  0xd4   :  { %3276 = vmatprep.mubr.msk.f32.mxu1 %vm3616_vm2, %v3615_v0 }
  0xd5   :  { %v4357_v46 = vpop.f32.mrf.mxu0  ;;  %3110 = vmatmul.mubr.msk.f32.gmra.mxu0 %vm73_vm1, %v72_v44  ;;  %v2617_v44 = vld [vmem:[%s5590_s0 + $0x4d8] sm:$0xff] }
  0xd6   :  { %3299 = vmatprep.mubr.msk.f32.mxu0 %vm3616_vm2, %v3615_v0 }
  0xd7   :  { %v4365_v48 = vpop.f32.mrf.mxu1  ;;  %3277 = vmatmul.mubr.msk.f32.gmra.mxu1 %vm73_vm1, %v2459_v45  ;;  %v2967_v49 = vpop.f32.mrf.mxu0 }
  0xd8   :  { %3466 = vmatprep.mubr.msk.f32.mxu1 %vm3616_vm2, %v3615_v0  ;;  %v2519_v49 = vld [vmem:[%s5590_s0 + $0x358] sm:$0xff] }
  0xd9   :  { %v3134_v52 = vpop.f32.mrf.mxu1  ;;  %v4375_v53 = vpop.f32.mrf.mxu0  ;;  %3300 = vmatmul.mubr.msk.f32.vlgmr.msra.gmra.mxu0 %vm73_vm1, %v2510_v47 }
  0xda   :  { %3302 = vmatprep.mubr.msk.f32.mxu0 %vm3616_vm2, %v3615_v0 }
  0xdb   :  { %v4383_v55 = vpop.f32.mrf.mxu1  ;;  %3467 = vmatmul.mubr.msk.f32.vlgmr.msra.gmra.mxu1 %vm73_vm1, %v2609_v51  ;;  %v2970_v56 = vpop.f32.mrf.mxu0 }
  0xdc   :  { %3469 = vmatprep.mubr.msk.f32.mxu1 %vm3616_vm2, %v3615_v0  ;;  %v2618_v56 = vld [vmem:[%s5590_s0 + $0x4e0] sm:$0xff] }
  0xdd   :  { %v3137_v59 = vpop.f32.mrf.mxu1  ;;  %v4393_v60 = vpop.f32.mrf.mxu0  ;;  %3303 = vmatmul.mubr.msk.f32.gmra.mxu0 %vm73_vm1, %v2511_v54 }
  0xde   :  { %3305 = vmatprep.mubr.msk.f32.mxu0 %vm3616_vm2, %v3615_v0 }
  0xdf   :  { %v4401_v62 = vpop.f32.mrf.mxu1  ;;  %3470 = vmatmul.mubr.msk.f32.gmra.mxu1 %vm73_vm1, %v2610_v58  ;;  %v2973_v63 = vpop.f32.mrf.mxu0 }
  0xe0   :  { %3472 = vmatprep.mubr.msk.f32.mxu1 %vm3616_vm2, %v3615_v0 }
  0xe1   :  { %v3140_v3 = vpop.f32.mrf.mxu1  ;;  %v4411_v4 = vpop.f32.mrf.mxu0  ;;  %3306 = vmatmul.mubr.msk.f32.gmra.mxu0 %vm73_vm1, %v2512_v61  ;;  %v2520_v61 = vld [vmem:[%s5590_s0 + $0x360] sm:$0xff] }
  0xe2   :  { %3308 = vmatprep.mubr.msk.f32.mxu0 %vm3616_vm2, %v3615_v0 }
  0xe3   :  { %v4419_v6 = vpop.f32.mrf.mxu1  ;;  %3473 = vmatmul.mubr.msk.f32.gmra.mxu1 %vm73_vm1, %v2611_v2  ;;  %v2976_v7 = vpop.f32.mrf.mxu0 }
  0xe4   :  { %3475 = vmatprep.mubr.msk.f32.mxu1 %vm3616_vm2, %v3615_v0 }
  0xe5   :  { %v3143_v10 = vpop.f32.mrf.mxu1  ;;  %v4429_v11 = vpop.f32.mrf.mxu0  ;;  %3309 = vmatmul.mubr.msk.f32.gmra.mxu0 %vm73_vm1, %v2513_v5  ;;  %v2619_v5 = vld [vmem:[%s5590_s0 + $0x4e8] sm:$0xff] }
  0xe6   :  { %3311 = vmatprep.mubr.msk.f32.mxu0 %vm3616_vm2, %v3615_v0  ;;  %v2521_v10 = vld [vmem:[%s5590_s0 + $0x368] sm:$0xff] }
  0xe7   :  { %v4437_v13 = vpop.f32.mrf.mxu1  ;;  %3476 = vmatmul.mubr.msk.f32.gmra.mxu1 %vm73_vm1, %v2612_v9  ;;  %v2979_v14 = vpop.f32.mrf.mxu0 }
  0xe8   :  { %3478 = vmatprep.mubr.msk.f32.mxu1 %vm3616_vm2, %v3615_v0 }
  0xe9   :  { %v3146_v17 = vpop.f32.mrf.mxu1  ;;  %v4447_v18 = vpop.f32.mrf.mxu0  ;;  %3312 = vmatmul.mubr.msk.f32.gmra.mxu0 %vm73_vm1, %v2514_v12 }
  0xea   :  { %3314 = vmatprep.mubr.msk.f32.mxu0 %vm3616_vm2, %v3615_v0  ;;  %v2620_v17 = vld [vmem:[%s5590_s0 + $0x4f0] sm:$0xff] }
  0xeb   :  { %v4455_v20 = vpop.f32.mrf.mxu1  ;;  %3479 = vmatmul.mubr.msk.f32.gmra.mxu1 %vm73_vm1, %v2613_v16  ;;  %v2982_v21 = vpop.f32.mrf.mxu0 }
  0xec   :  { %3481 = vmatprep.mubr.msk.f32.mxu1 %vm3616_vm2, %v3615_v0 }
  0xed   :  { %v3149_v24 = vpop.f32.mrf.mxu1  ;;  %v4465_v25 = vpop.f32.mrf.mxu0  ;;  %3315 = vmatmul.mubr.msk.f32.gmra.mxu0 %vm73_vm1, %v2515_v19 }
  0xee   :  { %3317 = vmatprep.mubr.msk.f32.mxu0 %vm3616_vm2, %v3615_v0 }
  0xef   :  { %v4473_v27 = vpop.f32.mrf.mxu1  ;;  %3482 = vmatmul.mubr.msk.f32.gmra.mxu1 %vm73_vm1, %v2614_v23  ;;  %v2985_v28 = vpop.f32.mrf.mxu0  ;;  %v2522_v23 = vld [vmem:[%s5590_s0 + $0x370] sm:$0xff] }
  0xf0   :  { %3484 = vmatprep.mubr.msk.f32.mxu1 %vm3616_vm2, %v3615_v0 }
  0xf1   :  { %v3152_v31 = vpop.f32.mrf.mxu1  ;;  %v4483_v32 = vpop.f32.mrf.mxu0  ;;  %3318 = vmatmul.mubr.msk.f32.gmra.mxu0 %vm73_vm1, %v2516_v26 }
  0xf2   :  { %3320 = vmatprep.mubr.msk.f32.mxu0 %vm3616_vm2, %v3615_v0 }
  0xf3   :  { %v4491_v34 = vpop.f32.mrf.mxu1  ;;  %3485 = vmatmul.mubr.msk.f32.gmra.mxu1 %vm73_vm1, %v2615_v30  ;;  %v2988_v35 = vpop.f32.mrf.mxu0  ;;  %v2621_v30 = vld [vmem:[%s5590_s0 + $0x4f8] sm:$0xff] }
  0xf4   :  { %3487 = vmatprep.mubr.msk.f32.mxu1 %vm3616_vm2, %v3615_v0  ;;  %v2523_v35 = vld [vmem:[%s5590_s0 + $0x378] sm:$0xff] }
  0xf5   :  { %v3155_v38 = vpop.f32.mrf.mxu1  ;;  %v4501_v39 = vpop.f32.mrf.mxu0  ;;  %3321 = vmatmul.mubr.msk.f32.gmra.mxu0 %vm73_vm1, %v2517_v33 }
  0xf6   :  { %3323 = vmatprep.mubr.msk.f32.mxu0 %vm3616_vm2, %v3615_v0 }
  0xf7   :  { %v4509_v41 = vpop.f32.mrf.mxu1  ;;  %3488 = vmatmul.mubr.msk.f32.gmra.mxu1 %vm73_vm1, %v2616_v37  ;;  %v2991_v42 = vpop.f32.mrf.mxu0 }
  0xf8   :  { %3490 = vmatprep.mubr.msk.f32.mxu1 %vm3616_vm2, %v3615_v0  ;;  %v2622_v42 = vld [vmem:[%s5590_s0 + $0x500] sm:$0xff] }
  0xf9   :  { %v3158_v45 = vpop.f32.mrf.mxu1  ;;  %v4519_v47 = vpop.f32.mrf.mxu0  ;;  %3324 = vmatmul.mubr.msk.f32.gmra.mxu0 %vm73_vm1, %v2518_v40 }
  0xfa   :  { %3326 = vmatprep.mubr.msk.f32.mxu0 %vm3616_vm2, %v3615_v0 }
  0xfb   :  { %v4527_v51 = vpop.f32.mrf.mxu1  ;;  %3491 = vmatmul.mubr.msk.f32.gmra.mxu1 %vm73_vm1, %v2617_v44  ;;  %v2994_v52 = vpop.f32.mrf.mxu0 }
  0xfc   :  { %3493 = vmatprep.mubr.msk.f32.mxu1 %vm3616_vm2, %v3615_v0 }
  0xfd   :  { %v3161_v58 = vpop.f32.mrf.mxu1  ;;  %v4537_v59 = vpop.f32.mrf.mxu0  ;;  %3327 = vmatmul.mubr.msk.f32.gmra.mxu0 %vm73_vm1, %v2519_v49  ;;  %v2524_v49 = vld [vmem:[%s5590_s0 + $0x380] sm:$0xff] }
  0xfe   :  { %3329 = vmatprep.mubr.msk.f32.mxu0 %vm3616_vm2, %v3615_v0 }
  0xff   :  { %v4545_v63 = vpop.f32.mrf.mxu1  ;;  %3494 = vmatmul.mubr.msk.f32.gmra.mxu1 %vm73_vm1, %v2618_v56  ;;  %v2997_v2 = vpop.f32.mrf.mxu0 }
 0x100   :  { %3496 = vmatprep.mubr.msk.f32.mxu1 %vm3616_vm2, %v3615_v0 }
 0x101   :  { %v3164_v7 = vpop.f32.mrf.mxu1  ;;  %v4555_v9 = vpop.f32.mrf.mxu0  ;;  %3330 = vmatmul.mubr.msk.f32.gmra.mxu0 %vm73_vm1, %v2520_v61  ;;  %v2623_v61 = vld [vmem:[%s5590_s0 + $0x508] sm:$0xff] }
 0x102   :  { %3332 = vmatprep.mubr.msk.f32.mxu0 %vm3616_vm2, %v3615_v0  ;;  %v2525_v7 = vld [vmem:[%s5590_s0 + $0x388] sm:$0xff] }
 0x103   :  { %v4563_v12 = vpop.f32.mrf.mxu1  ;;  %3497 = vmatmul.mubr.msk.f32.gmra.mxu1 %vm73_vm1, %v2619_v5  ;;  %v3000_v14 = vpop.f32.mrf.mxu0 }
 0x104   :  { %3499 = vmatprep.mubr.msk.f32.mxu1 %vm3616_vm2, %v3615_v0 }
 0x105   :  { %v3167_v19 = vpop.f32.mrf.mxu1  ;;  %v4573_v21 = vpop.f32.mrf.mxu0  ;;  %3333 = vmatmul.mubr.msk.f32.gmra.mxu0 %vm73_vm1, %v2521_v10 }
 0x106   :  { %3335 = vmatprep.mubr.msk.f32.mxu0 %vm3616_vm2, %v3615_v0  ;;  %v2624_v19 = vld [vmem:[%s5590_s0 + $0x510] sm:$0xff] }
 0x107   :  { %v4581_v24 = vpop.f32.mrf.mxu1  ;;  %3500 = vmatmul.mubr.msk.f32.gmra.mxu1 %vm73_vm1, %v2620_v17  ;;  %v3003_v26 = vpop.f32.mrf.mxu0 }
 0x108   :  { %3502 = vmatprep.mubr.msk.f32.mxu1 %vm3616_vm2, %v3615_v0 }
 0x109   :  { %v3170_v31 = vpop.f32.mrf.mxu1  ;;  %v4591_v33 = vpop.f32.mrf.mxu0  ;;  %3336 = vmatmul.mubr.msk.f32.gmra.mxu0 %vm73_vm1, %v2522_v23 }
 0x10a   :  { %3338 = vmatprep.mubr.msk.f32.mxu0 %vm3616_vm2, %v3615_v0 }
 0x10b   :  { %v4599_v37 = vpop.f32.mrf.mxu1  ;;  %3503 = vmatmul.mubr.msk.f32.gmra.mxu1 %vm73_vm1, %v2621_v30  ;;  %v3006_v38 = vpop.f32.mrf.mxu0  ;;  %v2526_v30 = vld [vmem:[%s5590_s0 + $0x390] sm:$0xff] }
 0x10c   :  { %3505 = vmatprep.mubr.msk.f32.mxu1 %vm3616_vm2, %v3615_v0 }
 0x10d   :  { %v3173_v44 = vpop.f32.mrf.mxu1  ;;  %v4609_v45 = vpop.f32.mrf.mxu0  ;;  %3339 = vmatmul.mubr.msk.f32.gmra.mxu0 %vm73_vm1, %v2523_v35 }
 0x10e   :  { %3341 = vmatprep.mubr.msk.f32.mxu0 %vm3616_vm2, %v3615_v0 }
 0x10f   :  { %v4617_v52 = vpop.f32.mrf.mxu1  ;;  %3506 = vmatmul.mubr.msk.f32.gmra.mxu1 %vm73_vm1, %v2622_v42  ;;  %v3009_v56 = vpop.f32.mrf.mxu0  ;;  %v2625_v42 = vld [vmem:[%s5590_s0 + $0x518] sm:$0xff] }
 0x110   :  { %3508 = vmatprep.mubr.msk.f32.mxu1 %vm3616_vm2, %v3615_v0  ;;  %v2527_v56 = vld [vmem:[%s5590_s0 + $0x398] sm:$0xff] }
 0x111   :  { %v3176_v2 = vpop.f32.mrf.mxu1  ;;  %v4627_v5 = vpop.f32.mrf.mxu0  ;;  %3342 = vmatmul.mubr.msk.f32.gmra.mxu0 %vm73_vm1, %v2524_v49 }
 0x112   :  { %3344 = vmatprep.mubr.msk.f32.mxu0 %vm3616_vm2, %v3615_v0 }
 0x113   :  { %v4635_v10 = vpop.f32.mrf.mxu1  ;;  %3509 = vmatmul.mubr.msk.f32.gmra.mxu1 %vm73_vm1, %v2623_v61  ;;  %v3012_v14 = vpop.f32.mrf.mxu0 }
 0x114   :  { %3511 = vmatprep.mubr.msk.f32.mxu1 %vm3616_vm2, %v3615_v0  ;;  %v2626_v14 = vld [vmem:[%s5590_s0 + $0x520] sm:$0xff] }
 0x115   :  { %v3179_v23 = vpop.f32.mrf.mxu1  ;;  %v4645_v26 = vpop.f32.mrf.mxu0  ;;  %3345 = vmatmul.mubr.msk.f32.gmra.mxu0 %vm73_vm1, %v2525_v7 }
 0x116   :  { %3347 = vmatprep.mubr.msk.f32.mxu0 %vm3616_vm2, %v3615_v0 }
 0x117   :  { %v4653_v31 = vpop.f32.mrf.mxu1  ;;  %3512 = vmatmul.mubr.msk.f32.gmra.mxu1 %vm73_vm1, %v2624_v19  ;;  %v3015_v35 = vpop.f32.mrf.mxu0 }
 0x118   :  { %3514 = vmatprep.mubr.msk.f32.mxu1 %vm3616_vm2, %v3615_v0 }
 0x119   :  { %v3182_v44 = vpop.f32.mrf.mxu1  ;;  %v4663_v49 = vpop.f32.mrf.mxu0  ;;  %3348 = vmatmul.mubr.msk.f32.gmra.mxu0 %vm73_vm1, %v2526_v30  ;;  %v2528_v30 = vld [vmem:[%s5590_s0 + $0x3a0] sm:$0xff] }
 0x11a   :  { %3350 = vmatprep.mubr.msk.f32.mxu0 %vm3616_vm2, %v3615_v0 }
 0x11b   :  { %v4671_v61 = vpop.f32.mrf.mxu1  ;;  %3515 = vmatmul.mubr.msk.f32.gmra.mxu1 %vm73_vm1, %v2625_v42  ;;  %v3018_v2 = vpop.f32.mrf.mxu0 }
 0x11c   :  { %3517 = vmatprep.mubr.msk.f32.mxu1 %vm3616_vm2, %v3615_v0 }
 0x11d   :  { %v3185_v19 = vpop.f32.mrf.mxu1  ;;  %v4681_v23 = vpop.f32.mrf.mxu0  ;;  %3351 = vmatmul.mubr.msk.f32.gmra.mxu0 %vm73_vm1, %v2527_v56  ;;  %v2627_v56 = vld [vmem:[%s5590_s0 + $0x528] sm:$0xff] }
 0x11e   :  { %3353 = vmatprep.mubr.msk.f32.mxu0 %vm3616_vm2, %v3615_v0 }
 0x11f   :  { %v4689_v35 = vpop.f32.mrf.mxu1  ;;  %3518 = vmatmul.mubr.msk.f32.gmra.mxu1 %vm73_vm1, %v2626_v14  ;;  %v3021_v42 = vpop.f32.mrf.mxu0  ;;  %v2529_v14 = vld [vmem:[%s5590_s0 + $0x3a8] sm:$0xff] }
 0x120   :  { %3520 = vmatprep.mubr.msk.f32.mxu1 %vm3616_vm2, %v3615_v0 }
 0x121   :  { %v3188_v2 = vpop.f32.mrf.mxu1  ;;  %v4699_v19 = vpop.f32.mrf.mxu0  ;;  %3354 = vmatmul.mubr.msk.f32.gmra.mxu0 %vm73_vm1, %v2528_v30  ;;  %v2628_v30 = vld [vmem:[%s5590_s0 + $0x530] sm:$0xff] }
 0x122   :  { %3356 = vmatprep.mubr.msk.f32.mxu0 %vm3616_vm2, %v3615_v0 }
 0x123   :  { %v4707_v42 = vpop.f32.mrf.mxu1  ;;  %3521 = vmatmul.mubr.msk.f32.gmra.mxu1 %vm73_vm1, %v2627_v56  ;;  %v3024_v44 = vpop.f32.mrf.mxu0 }
 0x124   :  { %3523 = vmatprep.mubr.msk.f32.mxu1 %vm3616_vm2, %v3615_v0  ;;  %v2530_v44 = vld [vmem:[%s5590_s0 + $0x3b0] sm:$0xff] }
 0x125   :  { %v3191_v2 = vpop.f32.mrf.mxu1  ;;  %v4717_v38 = vpop.f32.mrf.mxu0  ;;  %3357 = vmatmul.mubr.msk.f32.gmra.mxu0 %vm73_vm1, %v2529_v14  ;;  %v2629_v14 = vld [vmem:[%s5590_s0 + $0x538] sm:$0xff] }
 0x126   :  { %3359 = vmatprep.mubr.msk.f32.mxu0 %vm3616_vm2, %v3615_v0 }
 0x127   :  { %v4725_v56 = vpop.f32.mrf.mxu1  ;;  %3524 = vmatmul.mubr.msk.f32.gmra.mxu1 %vm73_vm1, %v2628_v30  ;;  %v3027_v7 = vpop.f32.mrf.mxu0 }
 0x128   :  { %3526 = vmatprep.mubr.msk.f32.mxu1 %vm3616_vm2, %v3615_v0  ;;  %v2531_v7 = vld [vmem:[%s5590_s0 + $0x3b8] sm:$0xff] }
 0x129   :  { %v3194_v2 = vpop.f32.mrf.mxu1  ;;  %v4735_v58 = vpop.f32.mrf.mxu0  ;;  %3360 = vmatmul.mubr.msk.f32.gmra.mxu0 %vm73_vm1, %v2530_v44  ;;  %v2630_v44 = vld [vmem:[%s5590_s0 + $0x540] sm:$0xff] }
 0x12a   :  { %3362 = vmatprep.mubr.msk.f32.mxu0 %vm3616_vm2, %v3615_v0 }
 0x12b   :  { %v4743_v30 = vpop.f32.mrf.mxu1  ;;  %3527 = vmatmul.mubr.msk.f32.gmra.mxu1 %vm73_vm1, %v2629_v14  ;;  %v3030_v17 = vpop.f32.mrf.mxu0 }
 0x12c   :  { %3529 = vmatprep.mubr.msk.f32.mxu1 %vm3616_vm2, %v3615_v0  ;;  %v2532_v17 = vld [vmem:[%s5590_s0 + $0x3c0] sm:$0xff] }
 0x12d   :  { %v3197_v2 = vpop.f32.mrf.mxu1  ;;  %v4753_v28 = vpop.f32.mrf.mxu0  ;;  %3363 = vmatmul.mubr.msk.f32.gmra.mxu0 %vm73_vm1, %v2531_v7  ;;  %v2631_v7 = vld [vmem:[%s5590_s0 + $0x548] sm:$0xff] }
 0x12e   :  { %3365 = vmatprep.mubr.msk.f32.mxu0 %vm3616_vm2, %v3615_v0 }
 0x12f   :  { %v4761_v14 = vpop.f32.mrf.mxu1  ;;  %3530 = vmatmul.mubr.msk.f32.gmra.mxu1 %vm73_vm1, %v2630_v44  ;;  %v3033_v40 = vpop.f32.mrf.mxu0 }
 0x130   :  { %3532 = vmatprep.mubr.msk.f32.mxu1 %vm3616_vm2, %v3615_v0  ;;  %v2533_v40 = vld [vmem:[%s5590_s0 + $0x3c8] sm:$0xff] }
 0x131   :  { %v3200_v2 = vpop.f32.mrf.mxu1  ;;  %v4771_v3 = vpop.f32.mrf.mxu0  ;;  %3366 = vmatmul.mubr.msk.f32.gmra.mxu0 %vm73_vm1, %v2532_v17  ;;  %v2632_v17 = vld [vmem:[%s5590_s0 + $0x550] sm:$0xff] }
 0x132   :  { %3368 = vmatprep.mubr.msk.f32.mxu0 %vm3616_vm2, %v3615_v0 }
 0x133   :  { %v4779_v44 = vpop.f32.mrf.mxu1  ;;  %3533 = vmatmul.mubr.msk.f32.gmra.mxu1 %vm73_vm1, %v2631_v7  ;;  %v3036_v16 = vpop.f32.mrf.mxu0 }
 0x134   :  { %3535 = vmatprep.mubr.msk.f32.mxu1 %vm3616_vm2, %v3615_v0  ;;  %v2534_v16 = vld [vmem:[%s5590_s0 + $0x3d0] sm:$0xff] }
 0x135   :  { %v3203_v2 = vpop.f32.mrf.mxu1  ;;  %v4789_v43 = vpop.f32.mrf.mxu0  ;;  %3369 = vmatmul.mubr.msk.f32.gmra.mxu0 %vm73_vm1, %v2533_v40  ;;  %v2633_v40 = vld [vmem:[%s5590_s0 + $0x558] sm:$0xff] }
 0x136   :  { %3371 = vmatprep.mubr.msk.f32.mxu0 %vm3616_vm2, %v3615_v0 }
 0x137   :  { %v4797_v7 = vpop.f32.mrf.mxu1  ;;  %3536 = vmatmul.mubr.msk.f32.gmra.mxu1 %vm73_vm1, %v2632_v17  ;;  %v3039_v54 = vpop.f32.mrf.mxu0 }
 0x138   :  { %5642 = vst [vmem:[#allocation2_spill] sm:$0xff] %v4797_v7  ;;  %3538 = vmatprep.mubr.msk.f32.mxu1 %vm3616_vm2, %v3615_v0  ;;  %v2535_v54 = vld [vmem:[%s5590_s0 + $0x3d8] sm:$0xff] }
 0x139   :  { %v3206_v2 = vpop.f32.mrf.mxu1  ;;  %v4807_v29 = vpop.f32.mrf.mxu0  ;;  %3372 = vmatmul.mubr.msk.f32.gmra.mxu0 %vm73_vm1, %v2534_v16  ;;  %v2634_v16 = vld [vmem:[%s5590_s0 + $0x560] sm:$0xff] }
 0x13a   :  { %5643 = vst [vmem:[#allocation3_spill] sm:$0xff] %v4807_v29  ;;  %3374 = vmatprep.mubr.msk.f32.mxu0 %vm3616_vm2, %v3615_v0 }
 0x13b   :  { %v4815_v17 = vpop.f32.mrf.mxu1  ;;  %3539 = vmatmul.mubr.msk.f32.gmra.mxu1 %vm73_vm1, %v2633_v40  ;;  %v3042_v36 = vpop.f32.mrf.mxu0 }
 0x13c   :  { %5644 = vst [vmem:[#allocation4_spill] sm:$0xff] %v4815_v17  ;;  %3541 = vmatprep.mubr.msk.f32.mxu1 %vm3616_vm2, %v3615_v0  ;;  %v2536_v36 = vld [vmem:[%s5590_s0 + $0x3e0] sm:$0xff] }
 0x13d   :  { %v3209_v2 = vpop.f32.mrf.mxu1  ;;  %v4825_v15 = vpop.f32.mrf.mxu0  ;;  %3375 = vmatmul.mubr.msk.f32.gmra.mxu0 %vm73_vm1, %v2535_v54  ;;  %v2635_v54 = vld [vmem:[%s5590_s0 + $0x568] sm:$0xff] }
 0x13e   :  { %5645 = vst [vmem:[#allocation5_spill] sm:$0xff] %v4825_v15  ;;  %3377 = vmatprep.mubr.msk.f32.mxu0 %vm3616_vm2, %v3615_v0 }
 0x13f   :  { %v4833_v40 = vpop.f32.mrf.mxu1  ;;  %3542 = vmatmul.mubr.msk.f32.gmra.mxu1 %vm73_vm1, %v2634_v16  ;;  %v3045_v22 = vpop.f32.mrf.mxu0 }
 0x140   :  { %5646 = vst [vmem:[#allocation6_spill] sm:$0xff] %v4833_v40  ;;  %3544 = vmatprep.mubr.msk.f32.mxu1 %vm3616_vm2, %v3615_v0  ;;  %v2537_v22 = vld [vmem:[%s5590_s0 + $0x3e8] sm:$0xff]  ;;  %v5691_v40 = vmax.f32 %v4357_v46, %v4365_v48 }
 0x141   :  { %v3212_v2 = vpop.f32.mrf.mxu1  ;;  %v4843_v1 = vpop.f32.mrf.mxu0  ;;  %3378 = vmatmul.mubr.msk.f32.gmra.mxu0 %vm73_vm1, %v2536_v36  ;;  %v2636_v36 = vld [vmem:[%s5590_s0 + $0x570] sm:$0xff] }
 0x142   :  { %5647 = vst [vmem:[#allocation7_spill] sm:$0xff] %v4843_v1  ;;  %3380 = vmatprep.mubr.msk.f32.mxu0 %vm3616_vm2, %v3615_v0 }
 0x143   :  { %v4851_v16 = vpop.f32.mrf.mxu1  ;;  %3545 = vmatmul.mubr.msk.f32.gmra.mxu1 %vm73_vm1, %v2635_v54  ;;  %v3048_v8 = vpop.f32.mrf.mxu0 }
 0x144   :  { %5648 = vst [vmem:[#allocation8_spill] sm:$0xff] %v4851_v16  ;;  %3547 = vmatprep.mubr.msk.f32.mxu1 %vm3616_vm2, %v3615_v0  ;;  %v2538_v8 = vld [vmem:[%s5590_s0 + $0x3f0] sm:$0xff] }
 0x145   :  { %v3215_v2 = vpop.f32.mrf.mxu1  ;;  %v4861_v50 = vpop.f32.mrf.mxu0  ;;  %3381 = vmatmul.mubr.msk.f32.gmra.mxu0 %vm73_vm1, %v2537_v22  ;;  %v2637_v22 = vld [vmem:[%s5590_s0 + $0x578] sm:$0xff] }
 0x146   :  { %5649 = vst [vmem:[#allocation9_spill] sm:$0xff] %v4861_v50  ;;  %3383 = vmatprep.mubr.msk.f32.mxu0 %vm3616_vm2, %v3615_v0 }
 0x147   :  { %v4869_v54 = vpop.f32.mrf.mxu1  ;;  %3548 = vmatmul.mubr.msk.f32.gmra.mxu1 %vm73_vm1, %v2636_v36  ;;  %v3051_v57 = vpop.f32.mrf.mxu0 }
 0x148   :  { %5650 = vst [vmem:[#allocation10_spill] sm:$0xff] %v4869_v54  ;;  %3550 = vmatprep.mubr.msk.f32.mxu1 %vm3616_vm2, %v3615_v0  ;;  %v2539_v57 = vld [vmem:[%s5590_s0 + $0x3f8] sm:$0xff] }
 0x149   :  { %v3218_v2 = vpop.f32.mrf.mxu1  ;;  %v4879_v1 = vpop.f32.mrf.mxu0  ;;  %3384 = vmatmul.mubr.msk.f32.gmra.mxu0 %vm73_vm1, %v2538_v8  ;;  %v2638_v8 = vld [vmem:[%s5590_s0 + $0x580] sm:$0xff] }
 0x14a   :  { %5651 = vst [vmem:[#allocation11_spill] sm:$0xff] %v4879_v1  ;;  %3386 = vmatprep.mubr.msk.f32.mxu0 %vm3616_vm2, %v3615_v0 }
 0x14b   :  { %v4887_v36 = vpop.f32.mrf.mxu1  ;;  %3551 = vmatmul.mubr.msk.f32.gmra.mxu1 %vm73_vm1, %v2637_v22  ;;  %v3054_v16 = vpop.f32.mrf.mxu0 }
 0x14c   :  { %5652 = vst [vmem:[#allocation12_spill] sm:$0xff] %v4887_v36  ;;  %3553 = vmatprep.mubr.msk.f32.mxu1 %vm3616_vm2, %v3615_v0  ;;  %v2540_v16 = vld [vmem:[%s5590_s0 + $0x400] sm:$0xff] }
 0x14d   :  { %v3221_v2 = vpop.f32.mrf.mxu1  ;;  %v4897_v50 = vpop.f32.mrf.mxu0  ;;  %3387 = vmatmul.mubr.msk.f32.gmra.mxu0 %vm73_vm1, %v2539_v57  ;;  %v2639_v57 = vld [vmem:[%s5590_s0 + $0x588] sm:$0xff] }
 0x14e   :  { %5653 = vst [vmem:[#allocation13_spill] sm:$0xff] %v4897_v50  ;;  %3389 = vmatprep.mubr.msk.f32.mxu0 %vm3616_vm2, %v3615_v0 }
 0x14f   :  { %v4905_v22 = vpop.f32.mrf.mxu1  ;;  %3554 = vmatmul.mubr.msk.f32.gmra.mxu1 %vm73_vm1, %v2638_v8  ;;  %v3057_v54 = vpop.f32.mrf.mxu0 }
 0x150   :  { %5654 = vst [vmem:[#allocation14_spill] sm:$0xff] %v4905_v22  ;;  %3556 = vmatprep.mubr.msk.f32.mxu1 %vm3616_vm2, %v3615_v0  ;;  %v2541_v54 = vld [vmem:[%s5590_s0 + $0x408] sm:$0xff] }
 0x151   :  { %v3224_v2 = vpop.f32.mrf.mxu1  ;;  %v4915_v1 = vpop.f32.mrf.mxu0  ;;  %3390 = vmatmul.mubr.msk.f32.gmra.mxu0 %vm73_vm1, %v2540_v16  ;;  %v2640_v16 = vld [vmem:[%s5590_s0 + $0x590] sm:$0xff] }
 0x152   :  { %5655 = vst [vmem:[#allocation15_spill] sm:$0xff] %v4915_v1  ;;  %3392 = vmatprep.mubr.msk.f32.mxu0 %vm3616_vm2, %v3615_v0 }
 0x153   :  { %v4923_v8 = vpop.f32.mrf.mxu1  ;;  %3557 = vmatmul.mubr.msk.f32.gmra.mxu1 %vm73_vm1, %v2639_v57  ;;  %v3060_v36 = vpop.f32.mrf.mxu0 }
 0x154   :  { %5656 = vst [vmem:[#allocation16_spill] sm:$0xff] %v4923_v8  ;;  %3559 = vmatprep.mubr.msk.f32.mxu1 %vm3616_vm2, %v3615_v0  ;;  %v2542_v36 = vld [vmem:[%s5590_s0 + $0x410] sm:$0xff] }
 0x155   :  { %v3227_v2 = vpop.f32.mrf.mxu1  ;;  %v4933_v50 = vpop.f32.mrf.mxu0  ;;  %3393 = vmatmul.mubr.msk.f32.gmra.mxu0 %vm73_vm1, %v2541_v54  ;;  %v2641_v54 = vld [vmem:[%s5590_s0 + $0x598] sm:$0xff] }
 0x156   :  { %5657 = vst [vmem:[#allocation17_spill] sm:$0xff] %v4933_v50  ;;  %3395 = vmatprep.mubr.msk.f32.mxu0 %vm3616_vm2, %v3615_v0 }
 0x157   :  { %v4941_v57 = vpop.f32.mrf.mxu1  ;;  %3560 = vmatmul.mubr.msk.f32.gmra.mxu1 %vm73_vm1, %v2640_v16  ;;  %v3063_v22 = vpop.f32.mrf.mxu0 }
 0x158   :  { %5658 = vst [vmem:[#allocation18_spill] sm:$0xff] %v4941_v57  ;;  %3562 = vmatprep.mubr.msk.f32.mxu1 %vm3616_vm2, %v3615_v0  ;;  %v2543_v22 = vld [vmem:[%s5590_s0 + $0x418] sm:$0xff] }
 0x159   :  { %v3230_v2 = vpop.f32.mrf.mxu1  ;;  %v4951_v1 = vpop.f32.mrf.mxu0  ;;  %3396 = vmatmul.mubr.msk.f32.gmra.mxu0 %vm73_vm1, %v2542_v36  ;;  %v2642_v36 = vld [vmem:[%s5590_s0 + $0x5a0] sm:$0xff] }
 0x15a   :  { %5659 = vst [vmem:[#allocation19_spill] sm:$0xff] %v4951_v1  ;;  %3398 = vmatprep.mubr.msk.f32.mxu0 %vm3616_vm2, %v3615_v0 }
 0x15b   :  { %v4959_v16 = vpop.f32.mrf.mxu1  ;;  %3563 = vmatmul.mubr.msk.f32.gmra.mxu1 %vm73_vm1, %v2641_v54  ;;  %v3066_v8 = vpop.f32.mrf.mxu0 }
 0x15c   :  { %5660 = vst [vmem:[#allocation20_spill] sm:$0xff] %v4959_v16  ;;  %3565 = vmatprep.mubr.msk.f32.mxu1 %vm3616_vm2, %v3615_v0  ;;  %v2544_v8 = vld [vmem:[%s5590_s0 + $0x420] sm:$0xff] }
 0x15d   :  { %v3233_v2 = vpop.f32.mrf.mxu1  ;;  %v4969_v50 = vpop.f32.mrf.mxu0  ;;  %3399 = vmatmul.mubr.msk.f32.gmra.mxu0 %vm73_vm1, %v2543_v22  ;;  %v2643_v22 = vld [vmem:[%s5590_s0 + $0x5a8] sm:$0xff] }
 0x15e   :  { %5661 = vst [vmem:[#allocation21_spill] sm:$0xff] %v4969_v50  ;;  %3401 = vmatprep.mubr.msk.f32.mxu0 %vm3616_vm2, %v3615_v0 }
 0x15f   :  { %v4977_v54 = vpop.f32.mrf.mxu1  ;;  %3566 = vmatmul.mubr.msk.f32.gmra.mxu1 %vm73_vm1, %v2642_v36  ;;  %v3069_v57 = vpop.f32.mrf.mxu0 }
 0x160   :  { %5662 = vst [vmem:[#allocation22_spill] sm:$0xff] %v4977_v54  ;;  %3568 = vmatprep.mubr.msk.f32.mxu1 %vm3616_vm2, %v3615_v0  ;;  %v2545_v57 = vld [vmem:[%s5590_s0 + $0x428] sm:$0xff] }
 0x161   :  { %v3236_v2 = vpop.f32.mrf.mxu1  ;;  %v4987_v1 = vpop.f32.mrf.mxu0  ;;  %3402 = vmatmul.mubr.msk.f32.gmra.mxu0 %vm73_vm1, %v2544_v8  ;;  %v2644_v8 = vld [vmem:[%s5590_s0 + $0x5b0] sm:$0xff] }
 0x162   :  { %5663 = vst [vmem:[#allocation23_spill] sm:$0xff] %v4987_v1  ;;  %3404 = vmatprep.mubr.msk.f32.mxu0 %vm3616_vm2, %v3615_v0 }
 0x163   :  { %v4995_v36 = vpop.f32.mrf.mxu1  ;;  %3569 = vmatmul.mubr.msk.f32.gmra.mxu1 %vm73_vm1, %v2643_v22  ;;  %v3072_v16 = vpop.f32.mrf.mxu0 }
 0x164   :  { %5664 = vst [vmem:[#allocation24_spill] sm:$0xff] %v4995_v36  ;;  %3571 = vmatprep.mubr.msk.f32.mxu1 %vm3616_vm2, %v3615_v0  ;;  %v2546_v16 = vld [vmem:[%s5590_s0 + $0x430] sm:$0xff] }
 0x165   :  { %v3239_v2 = vpop.f32.mrf.mxu1  ;;  %v5005_v50 = vpop.f32.mrf.mxu0  ;;  %3405 = vmatmul.mubr.msk.f32.gmra.mxu0 %vm73_vm1, %v2545_v57  ;;  %v2645_v57 = vld [vmem:[%s5590_s0 + $0x5b8] sm:$0xff] }
 0x166   :  { %5665 = vst [vmem:[#allocation25_spill] sm:$0xff] %v5005_v50  ;;  %3407 = vmatprep.mubr.msk.f32.mxu0 %vm3616_vm2, %v3615_v0 }
 0x167   :  { %v5013_v22 = vpop.f32.mrf.mxu1  ;;  %3572 = vmatmul.mubr.msk.f32.gmra.mxu1 %vm73_vm1, %v2644_v8  ;;  %v3075_v54 = vpop.f32.mrf.mxu0 }
 0x168   :  { %5666 = vst [vmem:[#allocation26_spill] sm:$0xff] %v5013_v22  ;;  %3574 = vmatprep.mubr.msk.f32.mxu1 %vm3616_vm2, %v3615_v0  ;;  %v2547_v54 = vld [vmem:[%s5590_s0 + $0x438] sm:$0xff] }
 0x169   :  { %v3242_v2 = vpop.f32.mrf.mxu1  ;;  %v5023_v1 = vpop.f32.mrf.mxu0  ;;  %3408 = vmatmul.mubr.msk.f32.gmra.mxu0 %vm73_vm1, %v2546_v16  ;;  %v2646_v16 = vld [vmem:[%s5590_s0 + $0x5c0] sm:$0xff] }
 0x16a   :  { %5667 = vst [vmem:[#allocation27_spill] sm:$0xff] %v5023_v1  ;;  %3410 = vmatprep.mubr.msk.f32.mxu0 %vm3616_vm2, %v3615_v0 }
 0x16b   :  { %v5031_v8 = vpop.f32.mrf.mxu1  ;;  %3575 = vmatmul.mubr.msk.f32.gmra.mxu1 %vm73_vm1, %v2645_v57  ;;  %v3078_v36 = vpop.f32.mrf.mxu0 }
 0x16c   :  { %5668 = vst [vmem:[#allocation28_spill] sm:$0xff] %v5031_v8  ;;  %3577 = vmatprep.mubr.msk.f32.mxu1 %vm3616_vm2, %v3615_v0  ;;  %v2548_v36 = vld [vmem:[%s5590_s0 + $0x440] sm:$0xff] }
 0x16d   :  { %v3245_v2 = vpop.f32.mrf.mxu1  ;;  %v5041_v50 = vpop.f32.mrf.mxu0  ;;  %3411 = vmatmul.mubr.msk.f32.gmra.mxu0 %vm73_vm1, %v2547_v54  ;;  %v2647_v54 = vld [vmem:[%s5590_s0 + $0x5c8] sm:$0xff] }
 0x16e   :  { %5669 = vst [vmem:[#allocation29_spill] sm:$0xff] %v5041_v50  ;;  %3413 = vmatprep.mubr.msk.f32.mxu0 %vm3616_vm2, %v3615_v0 }
 0x16f   :  { %v5049_v57 = vpop.f32.mrf.mxu1  ;;  %3578 = vmatmul.mubr.msk.f32.gmra.mxu1 %vm73_vm1, %v2646_v16  ;;  %v3081_v22 = vpop.f32.mrf.mxu0 }
 0x170   :  { %5670 = vst [vmem:[#allocation30_spill] sm:$0xff] %v5049_v57  ;;  %3580 = vmatprep.mubr.msk.f32.mxu1 %vm3616_vm2, %v3615_v0  ;;  %v2549_v22 = vld [vmem:[%s5590_s0 + $0x448] sm:$0xff] }
 0x171   :  { %v3248_v2 = vpop.f32.mrf.mxu1  ;;  %v5059_v1 = vpop.f32.mrf.mxu0  ;;  %3414 = vmatmul.mubr.msk.f32.gmra.mxu0 %vm73_vm1, %v2548_v36  ;;  %v2648_v36 = vld [vmem:[%s5590_s0 + $0x5d0] sm:$0xff] }
 0x172   :  { %5671 = vst [vmem:[#allocation31_spill] sm:$0xff] %v5059_v1  ;;  %3416 = vmatprep.mubr.msk.f32.mxu0 %vm3616_vm2, %v3615_v0 }
 0x173   :  { %v5067_v16 = vpop.f32.mrf.mxu1  ;;  %3581 = vmatmul.mubr.msk.f32.gmra.mxu1 %vm73_vm1, %v2647_v54  ;;  %v3084_v8 = vpop.f32.mrf.mxu0 }
 0x174   :  { %5672 = vst [vmem:[#allocation32_spill] sm:$0xff] %v5067_v16  ;;  %3583 = vmatprep.mubr.msk.f32.mxu1 %vm3616_vm2, %v3615_v0  ;;  %v2550_v8 = vld [vmem:[%s5590_s0 + $0x450] sm:$0xff] }
 0x175   :  { %v3251_v2 = vpop.f32.mrf.mxu1  ;;  %v5077_v50 = vpop.f32.mrf.mxu0  ;;  %3417 = vmatmul.mubr.msk.f32.gmra.mxu0 %vm73_vm1, %v2549_v22  ;;  %v2649_v22 = vld [vmem:[%s5590_s0 + $0x5d8] sm:$0xff] }
 0x176   :  { %5673 = vst [vmem:[#allocation33_spill] sm:$0xff] %v5077_v50  ;;  %3419 = vmatprep.mubr.msk.f32.mxu0 %vm3616_vm2, %v3615_v0 }
 0x177   :  { %v5085_v54 = vpop.f32.mrf.mxu1  ;;  %3584 = vmatmul.mubr.msk.f32.gmra.mxu1 %vm73_vm1, %v2648_v36  ;;  %v3087_v57 = vpop.f32.mrf.mxu0 }
 0x178   :  { %5674 = vst [vmem:[#allocation34_spill] sm:$0xff] %v5085_v54  ;;  %3586 = vmatprep.mubr.msk.f32.mxu1 %vm3616_vm2, %v3615_v0  ;;  %v2551_v57 = vld [vmem:[%s5590_s0 + $0x458] sm:$0xff] }
 0x179   :  { %v3254_v2 = vpop.f32.mrf.mxu1  ;;  %v5095_v1 = vpop.f32.mrf.mxu0  ;;  %3420 = vmatmul.mubr.msk.f32.gmra.mxu0 %vm73_vm1, %v2550_v8  ;;  %v2650_v8 = vld [vmem:[%s5590_s0 + $0x5e0] sm:$0xff] }
 0x17a   :  { %5675 = vst [vmem:[#allocation35_spill] sm:$0xff] %v5095_v1  ;;  %3422 = vmatprep.mubr.msk.f32.mxu0 %vm3616_vm2, %v3615_v0 }
 0x17b   :  { %v5103_v36 = vpop.f32.mrf.mxu1  ;;  %3587 = vmatmul.mubr.msk.f32.gmra.mxu1 %vm73_vm1, %v2649_v22  ;;  %v3090_v16 = vpop.f32.mrf.mxu0 }
 0x17c   :  { %5676 = vst [vmem:[#allocation36_spill] sm:$0xff] %v5103_v36  ;;  %3589 = vmatprep.mubr.msk.f32.mxu1 %vm3616_vm2, %v3615_v0  ;;  %v2552_v16 = vld [vmem:[%s5590_s0 + $0x460] sm:$0xff] }
 0x17d   :  { %v3257_v2 = vpop.f32.mrf.mxu1  ;;  %v5113_v50 = vpop.f32.mrf.mxu0  ;;  %3423 = vmatmul.mubr.msk.f32.gmra.mxu0 %vm73_vm1, %v2551_v57  ;;  %v2651_v57 = vld [vmem:[%s5590_s0 + $0x5e8] sm:$0xff] }
 0x17e   :  { %5677 = vst [vmem:[#allocation37_spill] sm:$0xff] %v5113_v50  ;;  %3425 = vmatprep.mubr.msk.f32.mxu0 %vm3616_vm2, %v3615_v0 }
 0x17f   :  { %v5121_v22 = vpop.f32.mrf.mxu1  ;;  %3590 = vmatmul.mubr.msk.f32.gmra.mxu1 %vm73_vm1, %v2650_v8  ;;  %v3093_v54 = vpop.f32.mrf.mxu0 }
 0x180   :  { %5678 = vst [vmem:[#allocation38_spill] sm:$0xff] %v5121_v22  ;;  %3592 = vmatprep.mubr.msk.f32.mxu1 %vm3616_vm2, %v3615_v0  ;;  %v2553_v54 = vld [vmem:[%s5590_s0 + $0x468] sm:$0xff] }
 0x181   :  { %v3260_v2 = vpop.f32.mrf.mxu1  ;;  %v5131_v1 = vpop.f32.mrf.mxu0  ;;  %3426 = vmatmul.mubr.msk.f32.gmra.mxu0 %vm73_vm1, %v2552_v16  ;;  %v2652_v16 = vld [vmem:[%s5590_s0 + $0x5f0] sm:$0xff] }
 0x182   :  { %5679 = vst [vmem:[#allocation39_spill] sm:$0xff] %v5131_v1  ;;  %3428 = vmatprep.mubr.msk.f32.mxu0 %vm3616_vm2, %v3615_v0 }
 0x183   :  { %v5139_v8 = vpop.f32.mrf.mxu1  ;;  %3593 = vmatmul.mubr.msk.f32.gmra.mxu1 %vm73_vm1, %v2651_v57  ;;  %v3096_v36 = vpop.f32.mrf.mxu0 }
 0x184   :  { %5680 = vst [vmem:[#allocation40_spill] sm:$0xff] %v5139_v8  ;;  %3595 = vmatprep.mubr.msk.f32.mxu1 %vm3616_vm2, %v3615_v0  ;;  %v2554_v36 = vld [vmem:[%s5590_s0 + $0x470] sm:$0xff] }
 0x185   :  { %v3263_v2 = vpop.f32.mrf.mxu1  ;;  %v5149_v50 = vpop.f32.mrf.mxu0  ;;  %3429 = vmatmul.mubr.msk.f32.gmra.mxu0 %vm73_vm1, %v2553_v54  ;;  %v2653_v54 = vld [vmem:[%s5590_s0 + $0x5f8] sm:$0xff] }
 0x186   :  { %5681 = vst [vmem:[#allocation41_spill] sm:$0xff] %v5149_v50  ;;  %3431 = vmatprep.mubr.msk.f32.mxu0 %vm3616_vm2, %v3615_v0 }
 0x187   :  { %v5157_v57 = vpop.f32.mrf.mxu1  ;;  %3596 = vmatmul.mubr.msk.f32.gmra.mxu1 %vm73_vm1, %v2652_v16  ;;  %v3099_v22 = vpop.f32.mrf.mxu0 }
 0x188   :  { %5682 = vst [vmem:[#allocation42_spill] sm:$0xff] %v5157_v57  ;;  %3598 = vmatprep.mubr.msk.f32.mxu1 %vm3616_vm2, %v3615_v0  ;;  %v2555_v22 = vld [vmem:[%s5590_s0 + $0x478] sm:$0xff] }
 0x189   :  { %v3266_v2 = vpop.f32.mrf.mxu1  ;;  %v5167_v1 = vpop.f32.mrf.mxu0  ;;  %3432 = vmatmul.mubr.msk.f32.gmra.mxu0 %vm73_vm1, %v2554_v36  ;;  %v2654_v36 = vld [vmem:[%s5590_s0 + $0x600] sm:$0xff] }
 0x18a   :  { %5683 = vst [vmem:[#allocation43_spill] sm:$0xff] %v5167_v1  ;;  %3434 = vmatprep.mubr.msk.f32.mxu0 %vm3616_vm2, %v3615_v0 }
 0x18b   :  { %v5175_v16 = vpop.f32.mrf.mxu1  ;;  %3599 = vmatmul.mubr.msk.f32.gmra.mxu1 %vm73_vm1, %v2653_v54  ;;  %v3102_v8 = vpop.f32.mrf.mxu0 }
 0x18c   :  { %5684 = vst [vmem:[#allocation44_spill] sm:$0xff] %v5175_v16  ;;  %3601 = vmatprep.mubr.msk.f32.mxu1 %vm3616_vm2, %v3615_v0  ;;  %v2556_v8 = vld [vmem:[%s5590_s0 + $0x480] sm:$0xff] }
 0x18d   :  { %v3269_v2 = vpop.f32.mrf.mxu1  ;;  %v5185_v50 = vpop.f32.mrf.mxu0  ;;  %3435 = vmatmul.mubr.msk.f32.gmra.mxu0 %vm73_vm1, %v2555_v22  ;;  %v2655_v22 = vld [vmem:[%s5590_s0 + $0x608] sm:$0xff] }
 0x18e   :  { %5685 = vst [vmem:[#allocation45_spill] sm:$0xff] %v5185_v50  ;;  %3437 = vmatprep.mubr.msk.f32.mxu0 %vm3616_vm2, %v3615_v0 }
 0x18f   :  { %v5193_v54 = vpop.f32.mrf.mxu1  ;;  %3602 = vmatmul.mubr.msk.f32.gmra.mxu1 %vm73_vm1, %v2654_v36  ;;  %v3105_v57 = vpop.f32.mrf.mxu0 }
 0x190   :  { %5686 = vst [vmem:[#allocation46_spill] sm:$0xff] %v5193_v54  ;;  %3604 = vmatprep.mubr.msk.f32.mxu1 %vm3616_vm2, %v3615_v0  ;;  %v2557_v57 = vld [vmem:[%s5590_s0 + $0x488] sm:$0xff] }
 0x191   :  { %v3272_v2 = vpop.f32.mrf.mxu1  ;;  %v5203_v1 = vpop.f32.mrf.mxu0  ;;  %3438 = vmatmul.mubr.msk.f32.gmra.mxu0 %vm73_vm1, %v2556_v8  ;;  %v2656_v8 = vld [vmem:[%s5590_s0 + $0x610] sm:$0xff] }
 0x192   :  { %5687 = vst [vmem:[#allocation47_spill] sm:$0xff] %v5203_v1  ;;  %3440 = vmatprep.mubr.msk.f32.mxu0 %vm3616_vm2, %v3615_v0 }
 0x193   :  { %v5211_v36 = vpop.f32.mrf.mxu1  ;;  %3605 = vmatmul.mubr.msk.f32.gmra.mxu1 %vm73_vm1, %v2655_v22  ;;  %v3108_v16 = vpop.f32.mrf.mxu0 }
 0x194   :  { %5688 = vst [vmem:[#allocation48_spill] sm:$0xff] %v5211_v36  ;;  %3607 = vmatprep.mubr.msk.f32.mxu1 %vm3616_vm2, %v3615_v0  ;;  %v2558_v16 = vld [vmem:[%s5590_s0 + $0x490] sm:$0xff] }
 0x195   :  { %v3275_v2 = vpop.f32.mrf.mxu1  ;;  %v5221_v50 = vpop.f32.mrf.mxu0  ;;  %3441 = vmatmul.mubr.msk.f32.gmra.mxu0 %vm73_vm1, %v2557_v57  ;;  %v2657_v57 = vld [vmem:[%s5590_s0 + $0x618] sm:$0xff] }
 0x196   :  { %5689 = vst [vmem:[#allocation49_spill] sm:$0xff] %v5221_v50  ;;  %3443 = vmatprep.mubr.msk.f32.mxu0 %vm3616_vm2, %v3615_v0 }
 0x197   :  { %v5229_v22 = vpop.f32.mrf.mxu1  ;;  %3608 = vmatmul.mubr.msk.f32.gmra.mxu1 %vm73_vm1, %v2656_v8  ;;  %v3111_v54 = vpop.f32.mrf.mxu0 }
 0x198   :  { %5690 = vst [vmem:[#allocation50_spill] sm:$0xff] %v5229_v22  ;;  %3610 = vmatprep.mubr.msk.f32.mxu1 %vm3616_vm2, %v3615_v0  ;;  %v5246_v54 = vld [vmem:[%s5591_s2] ss:$0 sm:$0xff] }
 0x199   :  { %v3278_v2 = vpop.f32.mrf.mxu1  ;;  %v1354_v1 = vpop.f32.mrf.mxu0  ;;  %3444 = vmatmul.mubr.msk.f32.gmra.mxu0 %vm73_vm1, %v2558_v16  ;;  %v5692_v16 = vmax.f32 %v4375_v53, %v4383_v55 }
 0x19a   :  { %v1598_v15 = vmax.f32 %v5691_v40, %v1354_v1 }
 0x19b   :  { %v1910_v8 = vpop.f32.mrf.mxu1  ;;  %3611 = vmatmul.mubr.msk.f32.gmra.mxu1 %vm73_vm1, %v2657_v57  ;;  %v3301_v0 = vpop.f32.mrf.mxu0 }
 0x19c   :  { %v2154_v36 = vmax.f32 %v1598_v15, %v1910_v8 }
 0x19d   :  { %v3468_v22 = vpop.f32.mrf.mxu1  ;;  %v1359_v50 = vpop.f32.mrf.mxu0 }
 0x19e   :  { %v2210_v2 = vadd.f32 %v5246_v54, %v2154_v36  ;;  %v1599_v17 = vmax.f32 %v5692_v16, %v1359_v50  ;;  %v5693_v22 = vmax.f32 %v4393_v60, %v4401_v62 }
 0x19f   :  { %v1915_v46 = vpop.f32.mrf.mxu1  ;;  %v3304_v48 = vpop.f32.mrf.mxu0 }
 0x1a0   :  { %v2259_v1 = vmax.f32 %v2210_v2, 0.0  ;;  %v2155_v40 = vmax.f32 %v1599_v17, %v1915_v46  ;;  %v5694_v17 = vmax.f32 %v4411_v4, %v4419_v6 }
 0x1a1   :  { %v3471_v29 = vpop.f32.mrf.mxu1  ;;  %v1364_v7 = vpop.f32.mrf.mxu0 }
 0x1a2   :  { %2308 = vst [vmem:[%s5592_s3] sm:$0xff] %v2259_v1  ;;  %v2211_v15 = vadd.f32 %v5246_v54, %v2155_v40  ;;  %v1600_v36 = vmax.f32 %v5693_v22, %v1364_v7  ;;  %v5695_v40 = vmax.f32 %v4429_v11, %v4437_v13 }
 0x1a3   :  { %v1920_v57 = vpop.f32.mrf.mxu1  ;;  %v3307_v8 = vpop.f32.mrf.mxu0 }
 0x1a4   :  { %v2260_v53 = vmax.f32 %v2211_v15, 0.0  ;;  %v2156_v50 = vmax.f32 %v1600_v36, %v1920_v57 }
 0x1a5   :  { %v3474_v55 = vpop.f32.mrf.mxu1  ;;  %v1369_v0 = vpop.f32.mrf.mxu0 }
 0x1a6   :  { %2309 = vst [vmem:[%s5592_s3 + $0x8] sm:$0xff] %v2260_v53  ;;  %v2212_v29 = vadd.f32 %v5246_v54, %v2156_v50  ;;  %v1601_v2 = vmax.f32 %v5694_v17, %v1369_v0  ;;  %v5696_v50 = vmax.f32 %v4447_v18, %v4455_v20 }
 0x1a7   :  { %v1925_v16 = vpop.f32.mrf.mxu1  ;;  %v3310_v46 = vpop.f32.mrf.mxu0 }
 0x1a8   :  { %v2261_v60 = vmax.f32 %v2212_v29, 0.0  ;;  %v2157_v62 = vmax.f32 %v1601_v2, %v1925_v16  ;;  %v5697_v46 = vmax.f32 %v4465_v25, %v4473_v27 }
 0x1a9   :  { %v3477_v7 = vpop.f32.mrf.mxu1  ;;  %v1374_v48 = vpop.f32.mrf.mxu0 }
 0x1aa   :  { %2310 = vst [vmem:[%s5592_s3 + $0x10] sm:$0xff] %v2261_v60  ;;  %v2213_v1 = vadd.f32 %v5246_v54, %v2157_v62  ;;  %v1602_v15 = vmax.f32 %v5695_v40, %v1374_v48 }
 0x1ab   :  { %v1930_v22 = vpop.f32.mrf.mxu1  ;;  %v3313_v36 = vpop.f32.mrf.mxu0 }
 0x1ac   :  { %v2262_v4 = vmax.f32 %v2213_v1, 0.0  ;;  %v2158_v6 = vmax.f32 %v1602_v15, %v1930_v22  ;;  %v5698_v15 = vmax.f32 %v4483_v32, %v4491_v34 }
 0x1ad   :  { %v3480_v57 = vpop.f32.mrf.mxu1  ;;  %v1379_v8 = vpop.f32.mrf.mxu0 }
 0x1ae   :  { %2311 = vst [vmem:[%s5592_s3 + $0x18] sm:$0xff] %v2262_v4  ;;  %v2214_v53 = vadd.f32 %v5246_v54, %v2158_v6  ;;  %v1603_v55 = vmax.f32 %v5696_v50, %v1379_v8 }
 0x1af   :  { %v1935_v0 = vpop.f32.mrf.mxu1  ;;  %v3316_v29 = vpop.f32.mrf.mxu0 }
 0x1b0   :  { %v2263_v11 = vmax.f32 %v2214_v53, 0.0  ;;  %v2159_v13 = vmax.f32 %v1603_v55, %v1935_v0  ;;  %v5699_v53 = vmax.f32 %v4501_v39, %v4509_v41 }
 0x1b1   :  { %v3483_v17 = vpop.f32.mrf.mxu1  ;;  %v1384_v2 = vpop.f32.mrf.mxu0 }
 0x1b2   :  { %2312 = vst [vmem:[%s5592_s3 + $0x20] sm:$0xff] %v2263_v11  ;;  %v2215_v16 = vadd.f32 %v5246_v54, %v2159_v13  ;;  %v1604_v60 = vmax.f32 %v5697_v46, %v1384_v2  ;;  %v5700_v17 = vmax.f32 %v4519_v47, %v4527_v51 }
 0x1b3   :  { %v1940_v62 = vpop.f32.mrf.mxu1  ;;  %v3319_v7 = vpop.f32.mrf.mxu0 }
 0x1b4   :  { %v2264_v18 = vmax.f32 %v2215_v16, 0.0  ;;  %v2160_v20 = vmax.f32 %v1604_v60, %v1940_v62 }
 0x1b5   :  { %v3486_v48 = vpop.f32.mrf.mxu1  ;;  %v1389_v1 = vpop.f32.mrf.mxu0 }
 0x1b6   :  { %2313 = vst [vmem:[%s5592_s3 + $0x28] sm:$0xff] %v2264_v18  ;;  %v2216_v40 = vadd.f32 %v5246_v54, %v2160_v20  ;;  %v1605_v22 = vmax.f32 %v5698_v15, %v1389_v1  ;;  %v5701_v18 = vmax.f32 %v4537_v59, %v4545_v63 }
 0x1b7   :  { %v1945_v36 = vpop.f32.mrf.mxu1  ;;  %v3322_v4 = vpop.f32.mrf.mxu0 }
 0x1b8   :  { %v2265_v25 = vmax.f32 %v2216_v40, 0.0  ;;  %v2161_v27 = vmax.f32 %v1605_v22, %v1945_v36  ;;  %v5702_v36 = vmax.f32 %v4555_v9, %v4563_v12 }
 0x1b9   :  { %v3489_v6 = vpop.f32.mrf.mxu1  ;;  %v1394_v57 = vpop.f32.mrf.mxu0 }
 0x1ba   :  { %2314 = vst [vmem:[%s5592_s3 + $0x30] sm:$0xff] %v2265_v25  ;;  %v2217_v8 = vadd.f32 %v5246_v54, %v2161_v27  ;;  %v1606_v50 = vmax.f32 %v5699_v53, %v1394_v57  ;;  %v5703_v53 = vmax.f32 %v4573_v21, %v4581_v24 }
 0x1bb   :  { %v1950_v55 = vpop.f32.mrf.mxu1  ;;  %v3325_v0 = vpop.f32.mrf.mxu0 }
 0x1bc   :  { %v2266_v32 = vmax.f32 %v2217_v8, 0.0  ;;  %v2162_v34 = vmax.f32 %v1606_v50, %v1950_v55 }
 0x1bd   :  { %v3492_v29 = vpop.f32.mrf.mxu1  ;;  %v1399_v11 = vpop.f32.mrf.mxu0 }
 0x1be   :  { %2315 = vst [vmem:[%s5592_s3 + $0x38] sm:$0xff] %v2266_v32  ;;  %v2218_v13 = vadd.f32 %v5246_v54, %v2162_v34  ;;  %v1607_v2 = vmax.f32 %v5700_v17, %v1399_v11  ;;  %v5704_v11 = vmax.f32 %v4591_v33, %v4599_v37 }
 0x1bf   :  { %v1955_v16 = vpop.f32.mrf.mxu1  ;;  %v3328_v46 = vpop.f32.mrf.mxu0 }
 0x1c0   :  { %v2267_v39 = vmax.f32 %v2218_v13, 0.0  ;;  %v2163_v41 = vmax.f32 %v1607_v2, %v1955_v16 }
 0x1c1   :  { %v3495_v60 = vpop.f32.mrf.mxu1  ;;  %v1404_v62 = vpop.f32.mrf.mxu0 }
 0x1c2   :  { %2316 = vst [vmem:[%s5592_s3 + $0x40] sm:$0xff] %v2267_v39  ;;  %v2219_v7 = vadd.f32 %v5246_v54, %v2163_v41  ;;  %v1608_v20 = vmax.f32 %v5701_v18, %v1404_v62  ;;  %v5705_v41 = vmax.f32 %v4609_v45, %v4617_v52 }
 0x1c3   :  { %v1960_v48 = vpop.f32.mrf.mxu1  ;;  %v3331_v1 = vpop.f32.mrf.mxu0 }
 0x1c4   :  { %v2268_v47 = vmax.f32 %v2219_v7, 0.0  ;;  %v2164_v51 = vmax.f32 %v1608_v20, %v1960_v48  ;;  %v5706_v1 = vmax.f32 %v4627_v5, %v4635_v10 }
 0x1c5   :  { %v3498_v40 = vpop.f32.mrf.mxu1  ;;  %v1409_v15 = vpop.f32.mrf.mxu0 }
 0x1c6   :  { %2317 = vst [vmem:[%s5592_s3 + $0x48] sm:$0xff] %v2268_v47  ;;  %v2220_v22 = vadd.f32 %v5246_v54, %v2164_v51  ;;  %v1609_v4 = vmax.f32 %v5702_v36, %v1409_v15 }
 0x1c7   :  { %v1965_v25 = vpop.f32.mrf.mxu1  ;;  %v3334_v27 = vpop.f32.mrf.mxu0 }
 0x1c8   :  { %v2269_v59 = vmax.f32 %v2220_v22, 0.0  ;;  %v2165_v63 = vmax.f32 %v1609_v4, %v1965_v25  ;;  %v5707_v4 = vmax.f32 %v4645_v26, %v4653_v31 }
 0x1c9   :  { %v3501_v6 = vpop.f32.mrf.mxu1  ;;  %v1414_v57 = vpop.f32.mrf.mxu0 }
 0x1ca   :  { %2318 = vst [vmem:[%s5592_s3 + $0x50] sm:$0xff] %v2269_v59  ;;  %v2221_v8 = vadd.f32 %v5246_v54, %v2165_v63  ;;  %v1610_v50 = vmax.f32 %v5703_v53, %v1414_v57 }
 0x1cb   :  { %v1970_v55 = vpop.f32.mrf.mxu1  ;;  %v3337_v0 = vpop.f32.mrf.mxu0 }
 0x1cc   :  { %v2270_v9 = vmax.f32 %v2221_v8, 0.0  ;;  %v2166_v12 = vmax.f32 %v1610_v50, %v1970_v55  ;;  %v5708_v8 = vmax.f32 %v4663_v49, %v4671_v61 }
 0x1cd   :  { %v3504_v32 = vpop.f32.mrf.mxu1  ;;  %v1419_v34 = vpop.f32.mrf.mxu0 }
 0x1ce   :  { %2319 = vst [vmem:[%s5592_s3 + $0x58] sm:$0xff] %v2270_v9  ;;  %v2222_v29 = vadd.f32 %v5246_v54, %v2166_v12  ;;  %v1611_v13 = vmax.f32 %v5704_v11, %v1419_v34  ;;  %v5709_v32 = vmax.f32 %v4681_v23, %v4689_v35 }
 0x1cf   :  { %v1975_v17 = vpop.f32.mrf.mxu1  ;;  %v3340_v2 = vpop.f32.mrf.mxu0 }
 0x1d0   :  { %v2271_v21 = vmax.f32 %v2222_v29, 0.0  ;;  %v2167_v24 = vmax.f32 %v1611_v13, %v1975_v17 }
 0x1d1   :  { %v3507_v16 = vpop.f32.mrf.mxu1  ;;  %v1424_v46 = vpop.f32.mrf.mxu0 }
 0x1d2   :  { %2320 = vst [vmem:[%s5592_s3 + $0x60] sm:$0xff] %v2271_v21  ;;  %v2223_v39 = vadd.f32 %v5246_v54, %v2167_v24  ;;  %v1612_v60 = vmax.f32 %v5705_v41, %v1424_v46  ;;  %v5710_v21 = vmax.f32 %v4699_v19, %v4707_v42 }
 0x1d3   :  { %v1980_v62 = vpop.f32.mrf.mxu1  ;;  %v3343_v7 = vpop.f32.mrf.mxu0 }
 0x1d4   :  { %v2272_v33 = vmax.f32 %v2223_v39, 0.0  ;;  %v2168_v37 = vmax.f32 %v1612_v60, %v1980_v62  ;;  %v5711_v62 = vmax.f32 %v4717_v38, %v4725_v56 }
 0x1d5   :  { %v3510_v18 = vpop.f32.mrf.mxu1  ;;  %v1429_v20 = vpop.f32.mrf.mxu0 }
 0x1d6   :  { %2321 = vst [vmem:[%s5592_s3 + $0x68] sm:$0xff] %v2272_v33  ;;  %v2224_v48 = vadd.f32 %v5246_v54, %v2168_v37  ;;  %v1613_v47 = vmax.f32 %v5706_v1, %v1429_v20  ;;  %v5712_v1 = vmax.f32 %v4735_v58, %v4743_v30 }
 0x1d7   :  { %v1985_v51 = vpop.f32.mrf.mxu1  ;;  %v3346_v40 = vpop.f32.mrf.mxu0 }
 0x1d8   :  { %v2273_v45 = vmax.f32 %v2224_v48, 0.0  ;;  %v2169_v52 = vmax.f32 %v1613_v47, %v1985_v51 }
 0x1d9   :  { %v3513_v15 = vpop.f32.mrf.mxu1  ;;  %v1434_v22 = vpop.f32.mrf.mxu0 }
 0x1da   :  { %2322 = vst [vmem:[%s5592_s3 + $0x70] sm:$0xff] %v2273_v45  ;;  %v2225_v36 = vadd.f32 %v5246_v54, %v2169_v52  ;;  %v1614_v25 = vmax.f32 %v5707_v4, %v1434_v22  ;;  %v5713_v22 = vmax.f32 %v4753_v28, %v4761_v14 }
 0x1db   :  { %v1990_v27 = vpop.f32.mrf.mxu1  ;;  %v3349_v59 = vpop.f32.mrf.mxu0 }
 0x1dc   :  { %v2274_v5 = vmax.f32 %v2225_v36, 0.0  ;;  %v2170_v10 = vmax.f32 %v1614_v25, %v1990_v27 }
 0x1dd   :  { %v3516_v63 = vpop.f32.mrf.mxu1  ;;  %v1439_v6 = vpop.f32.mrf.mxu0 }
 0x1de   :  { %2323 = vst [vmem:[%s5592_s3 + $0x78] sm:$0xff] %v2274_v5  ;;  %v2226_v57 = vadd.f32 %v5246_v54, %v2170_v10  ;;  %v1615_v53 = vmax.f32 %v5708_v8, %v1439_v6  ;;  %v5714_v10 = vmax.f32 %v4771_v3, %v4779_v44 }
 0x1df   :  { %v1995_v50 = vpop.f32.mrf.mxu1  ;;  %v3352_v55 = vpop.f32.mrf.mxu0 }
 0x1e0   :  { %v2275_v26 = vmax.f32 %v2226_v57, 0.0  ;;  %v2171_v31 = vmax.f32 %v1615_v53, %v1995_v50  ;;  %v5715_v55 = vld [vmem:[#allocation2_spill] sm:$0xff] }
 0x1e1   :  { %v3519_v0 = vpop.f32.mrf.mxu1  ;;  %v1444_v9 = vpop.f32.mrf.mxu0 }
 0x1e2   :  { %2324 = vst [vmem:[%s5592_s3 + $0x80] sm:$0xff] %v2275_v26  ;;  %v2227_v12 = vadd.f32 %v5246_v54, %v2171_v31  ;;  %v1616_v34 = vmax.f32 %v5709_v32, %v1444_v9  ;;  %v5716_v26 = vmax.f32 %v4789_v43, %v5715_v55 }
 0x1e3   :  { %v2000_v29 = vpop.f32.mrf.mxu1  ;;  %v3355_v11 = vpop.f32.mrf.mxu0 }
 0x1e4   :  { %v2276_v49 = vmax.f32 %v2227_v12, 0.0  ;;  %v2172_v61 = vmax.f32 %v1616_v34, %v2000_v29  ;;  %v5717_v29 = vld [vmem:[#allocation3_spill] sm:$0xff]  ;;  %v5718_v11 = vld [vmem:[#allocation4_spill] sm:$0xff] }
 0x1e5   :  { %v3522_v13 = vpop.f32.mrf.mxu1  ;;  %v1449_v17 = vpop.f32.mrf.mxu0 }
 0x1e6   :  { %2325 = vst [vmem:[%s5592_s3 + $0x88] sm:$0xff] %v2276_v49  ;;  %v2228_v2 = vadd.f32 %v5246_v54, %v2172_v61  ;;  %v1617_v24 = vmax.f32 %v5710_v21, %v1449_v17  ;;  %v5719_v49 = vmax.f32 %v5717_v29, %v5718_v11 }
 0x1e7   :  { %v2005_v16 = vpop.f32.mrf.mxu1  ;;  %v3358_v46 = vpop.f32.mrf.mxu0 }
 0x1e8   :  { %v2277_v23 = vmax.f32 %v2228_v2, 0.0  ;;  %v2173_v35 = vmax.f32 %v1617_v24, %v2005_v16  ;;  %v5720_v46 = vld [vmem:[#allocation5_spill] sm:$0xff] }
 0x1e9   :  { %v3525_v39 = vpop.f32.mrf.mxu1  ;;  %v1454_v41 = vpop.f32.mrf.mxu0 }
 0x1ea   :  { %2326 = vst [vmem:[%s5592_s3 + $0x90] sm:$0xff] %v2277_v23  ;;  %v2229_v60 = vadd.f32 %v5246_v54, %v2173_v35  ;;  %v1618_v7 = vmax.f32 %v5711_v62, %v1454_v41  ;;  %v5721_v23 = vld [vmem:[#allocation6_spill] sm:$0xff] }
 0x1eb   :  { %v2010_v33 = vpop.f32.mrf.mxu1  ;;  %v3361_v37 = vpop.f32.mrf.mxu0  ;;  %v5722_v35 = vmax.f32 %v5720_v46, %v5721_v23 }
 0x1ec   :  { %v2278_v19 = vmax.f32 %v2229_v60, 0.0  ;;  %v2174_v42 = vmax.f32 %v1618_v7, %v2010_v33 }
 0x1ed   :  { %v3528_v18 = vpop.f32.mrf.mxu1  ;;  %v1459_v20 = vpop.f32.mrf.mxu0 }
 0x1ee   :  { %2327 = vst [vmem:[%s5592_s3 + $0x98] sm:$0xff] %v2278_v19  ;;  %v2230_v48 = vadd.f32 %v5246_v54, %v2174_v42  ;;  %v1619_v47 = vmax.f32 %v5712_v1, %v1459_v20  ;;  %v5723_v42 = vld [vmem:[#allocation7_spill] sm:$0xff]  ;;  %v5724_v18 = vld [vmem:[#allocation8_spill] sm:$0xff] }
 0x1ef   :  { %v2015_v51 = vpop.f32.mrf.mxu1  ;;  %v3364_v40 = vpop.f32.mrf.mxu0  ;;  %v5725_v20 = vmax.f32 %v5723_v42, %v5724_v18 }
 0x1f0   :  { %v2279_v38 = vmax.f32 %v2230_v48, 0.0  ;;  %v2175_v56 = vmax.f32 %v1619_v47, %v2015_v51 }
 0x1f1   :  { %v3531_v45 = vpop.f32.mrf.mxu1  ;;  %v1464_v52 = vpop.f32.mrf.mxu0 }
 0x1f2   :  { %2328 = vst [vmem:[%s5592_s3 + $0xa0] sm:$0xff] %v2279_v38  ;;  %v2231_v15 = vadd.f32 %v5246_v54, %v2175_v56  ;;  %v1620_v36 = vmax.f32 %v5713_v22, %v1464_v52  ;;  %v5726_v52 = vld [vmem:[#allocation9_spill] sm:$0xff] }
 0x1f3   :  { %v2020_v4 = vpop.f32.mrf.mxu1  ;;  %v3367_v25 = vpop.f32.mrf.mxu0 }
 0x1f4   :  { %v2280_v58 = vmax.f32 %v2231_v15, 0.0  ;;  %v2176_v30 = vmax.f32 %v1620_v36, %v2020_v4  ;;  %v5727_v15 = vld [vmem:[#allocation10_spill] sm:$0xff] }
 0x1f5   :  { %v3534_v27 = vpop.f32.mrf.mxu1  ;;  %v1469_v59 = vpop.f32.mrf.mxu0  ;;  %v5728_v22 = vmax.f32 %v5726_v52, %v5727_v15 }
 0x1f6   :  { %2329 = vst [vmem:[%s5592_s3 + $0xa8] sm:$0xff] %v2280_v58  ;;  %v2232_v5 = vadd.f32 %v5246_v54, %v2176_v30  ;;  %v1621_v63 = vmax.f32 %v5714_v10, %v1469_v59  ;;  %v5729_v10 = vld [vmem:[#allocation11_spill] sm:$0xff] }
 0x1f7   :  { %v2025_v6 = vpop.f32.mrf.mxu1  ;;  %v3370_v57 = vpop.f32.mrf.mxu0 }
 0x1f8   :  { %v2281_v28 = vmax.f32 %v2232_v5, 0.0  ;;  %v2177_v14 = vmax.f32 %v1621_v63, %v2025_v6  ;;  %v5730_v63 = vld [vmem:[#allocation12_spill] sm:$0xff] }
 0x1f9   :  { %v3537_v8 = vpop.f32.mrf.mxu1  ;;  %v1474_v53 = vpop.f32.mrf.mxu0  ;;  %v5731_v6 = vmax.f32 %v5729_v10, %v5730_v63 }
 0x1fa   :  { %2330 = vst [vmem:[%s5592_s3 + $0xb0] sm:$0xff] %v2281_v28  ;;  %v2233_v50 = vadd.f32 %v5246_v54, %v2177_v14  ;;  %v1622_v31 = vmax.f32 %v5716_v26, %v1474_v53 }
 0x1fb   :  { %v2030_v0 = vpop.f32.mrf.mxu1  ;;  %v3373_v9 = vpop.f32.mrf.mxu0 }
 0x1fc   :  { %v2282_v3 = vmax.f32 %v2233_v50, 0.0  ;;  %v2178_v44 = vmax.f32 %v1622_v31, %v2030_v0  ;;  %v5732_v31 = vld [vmem:[#allocation13_spill] sm:$0xff]  ;;  %v5733_v0 = vld [vmem:[#allocation14_spill] sm:$0xff] }
 0x1fd   :  { %v3540_v12 = vpop.f32.mrf.mxu1  ;;  %v1479_v32 = vpop.f32.mrf.mxu0  ;;  %v5734_v9 = vmax.f32 %v5732_v31, %v5733_v0 }
 0x1fe   :  { %2331 = vst [vmem:[%s5592_s3 + $0xb8] sm:$0xff] %v2282_v3  ;;  %v2234_v34 = vadd.f32 %v5246_v54, %v2178_v44  ;;  %v1623_v61 = vmax.f32 %v5719_v49, %v1479_v32 }
 0x1ff   :  { %v2035_v13 = vpop.f32.mrf.mxu1  ;;  %v3376_v17 = vpop.f32.mrf.mxu0 }
 0x200   :  { %v2283_v43 = vmax.f32 %v2234_v34, 0.0  ;;  %v2179_v2 = vmax.f32 %v1623_v61, %v2035_v13  ;;  %v5735_v61 = vld [vmem:[#allocation15_spill] sm:$0xff]  ;;  %v5736_v13 = vld [vmem:[#allocation16_spill] sm:$0xff] }
 0x201   :  { %v3543_v21 = vpop.f32.mrf.mxu1  ;;  %v1484_v24 = vpop.f32.mrf.mxu0  ;;  %v5737_v17 = vmax.f32 %v5735_v61, %v5736_v13 }
 0x202   :  { %2332 = vst [vmem:[%s5592_s3 + $0xc0] sm:$0xff] %v2283_v43  ;;  %v2235_v16 = vadd.f32 %v5246_v54, %v2179_v2  ;;  %v1624_v39 = vmax.f32 %v5722_v35, %v1484_v24 }
 0x203   :  { %v2040_v41 = vpop.f32.mrf.mxu1  ;;  %v3379_v60 = vpop.f32.mrf.mxu0 }
 0x204   :  { %v2284_v62 = vmax.f32 %v2235_v16, 0.0  ;;  %v2180_v7 = vmax.f32 %v1624_v39, %v2040_v41  ;;  %v5738_v39 = vld [vmem:[#allocation17_spill] sm:$0xff]  ;;  %v5739_v41 = vld [vmem:[#allocation18_spill] sm:$0xff] }
 0x205   :  { %v3546_v33 = vpop.f32.mrf.mxu1  ;;  %v1489_v37 = vpop.f32.mrf.mxu0  ;;  %v5740_v60 = vmax.f32 %v5738_v39, %v5739_v41 }
 0x206   :  { %2333 = vst [vmem:[%s5592_s3 + $0xc8] sm:$0xff] %v2284_v62  ;;  %v2236_v19 = vadd.f32 %v5246_v54, %v2180_v7  ;;  %v1625_v48 = vmax.f32 %v5725_v20, %v1489_v37 }
 0x207   :  { %v2045_v1 = vpop.f32.mrf.mxu1  ;;  %v3382_v47 = vpop.f32.mrf.mxu0 }
 0x208   :  { %v2285_v51 = vmax.f32 %v2236_v19, 0.0  ;;  %v2181_v40 = vmax.f32 %v1625_v48, %v2045_v1  ;;  %v5741_v48 = vld [vmem:[#allocation19_spill] sm:$0xff]  ;;  %v5742_v1 = vld [vmem:[#allocation20_spill] sm:$0xff] }
 0x209   :  { %v3549_v38 = vpop.f32.mrf.mxu1  ;;  %v1494_v56 = vpop.f32.mrf.mxu0  ;;  %v5743_v47 = vmax.f32 %v5741_v48, %v5742_v1 }
 0x20a   :  { %2334 = vst [vmem:[%s5592_s3 + $0xd0] sm:$0xff] %v2285_v51  ;;  %v2237_v45 = vadd.f32 %v5246_v54, %v2181_v40  ;;  %v1626_v36 = vmax.f32 %v5728_v22, %v1494_v56 }
 0x20b   :  { %v2050_v4 = vpop.f32.mrf.mxu1  ;;  %v3385_v25 = vpop.f32.mrf.mxu0 }
 0x20c   :  { %v2286_v58 = vmax.f32 %v2237_v45, 0.0  ;;  %v2182_v30 = vmax.f32 %v1626_v36, %v2050_v4  ;;  %v5744_v36 = vld [vmem:[#allocation21_spill] sm:$0xff]  ;;  %v5745_v4 = vld [vmem:[#allocation22_spill] sm:$0xff] }
 0x20d   :  { %v3552_v27 = vpop.f32.mrf.mxu1  ;;  %v1499_v59 = vpop.f32.mrf.mxu0  ;;  %v5746_v25 = vmax.f32 %v5744_v36, %v5745_v4 }
 0x20e   :  { %2335 = vst [vmem:[%s5592_s3 + $0xd8] sm:$0xff] %v2286_v58  ;;  %v2238_v5 = vadd.f32 %v5246_v54, %v2182_v30  ;;  %v1627_v57 = vmax.f32 %v5731_v6, %v1499_v59 }
 0x20f   :  { %v2055_v28 = vpop.f32.mrf.mxu1  ;;  %v3388_v14 = vpop.f32.mrf.mxu0 }
 0x210   :  { %v2287_v8 = vmax.f32 %v2238_v5, 0.0  ;;  %v2183_v53 = vmax.f32 %v1627_v57, %v2055_v28  ;;  %v5747_v57 = vld [vmem:[#allocation23_spill] sm:$0xff]  ;;  %v5748_v28 = vld [vmem:[#allocation24_spill] sm:$0xff] }
 0x211   :  { %v3555_v50 = vpop.f32.mrf.mxu1  ;;  %v1504_v55 = vpop.f32.mrf.mxu0  ;;  %v5749_v14 = vmax.f32 %v5747_v57, %v5748_v28 }
 0x212   :  { %2336 = vst [vmem:[%s5592_s3 + $0xe0] sm:$0xff] %v2287_v8  ;;  %v2239_v26 = vadd.f32 %v5246_v54, %v2183_v53  ;;  %v1628_v3 = vmax.f32 %v5734_v9, %v1504_v55 }
 0x213   :  { %v2060_v44 = vpop.f32.mrf.mxu1  ;;  %v3391_v12 = vpop.f32.mrf.mxu0 }
 0x214   :  { %v2288_v32 = vmax.f32 %v2239_v26, 0.0  ;;  %v2184_v34 = vmax.f32 %v1628_v3, %v2060_v44  ;;  %v5750_v3 = vld [vmem:[#allocation25_spill] sm:$0xff]  ;;  %v5751_v44 = vld [vmem:[#allocation26_spill] sm:$0xff] }
 0x215   :  { %v3558_v29 = vpop.f32.mrf.mxu1  ;;  %v1509_v11 = vpop.f32.mrf.mxu0  ;;  %v5752_v12 = vmax.f32 %v5750_v3, %v5751_v44 }
 0x216   :  { %2337 = vst [vmem:[%s5592_s3 + $0xe8] sm:$0xff] %v2288_v32  ;;  %v2240_v49 = vadd.f32 %v5246_v54, %v2184_v34  ;;  %v1629_v43 = vmax.f32 %v5737_v17, %v1509_v11 }
 0x217   :  { %v2065_v2 = vpop.f32.mrf.mxu1  ;;  %v3394_v21 = vpop.f32.mrf.mxu0 }
 0x218   :  { %v2289_v24 = vmax.f32 %v2240_v49, 0.0  ;;  %v2185_v16 = vmax.f32 %v1629_v43, %v2065_v2  ;;  %v5753_v43 = vld [vmem:[#allocation27_spill] sm:$0xff]  ;;  %v5754_v2 = vld [vmem:[#allocation28_spill] sm:$0xff] }
 0x219   :  { %v3561_v46 = vpop.f32.mrf.mxu1  ;;  %v1514_v23 = vpop.f32.mrf.mxu0  ;;  %v5755_v21 = vmax.f32 %v5753_v43, %v5754_v2 }
 0x21a   :  { %2338 = vst [vmem:[%s5592_s3 + $0xf0] sm:$0xff] %v2289_v24  ;;  %v2241_v35 = vadd.f32 %v5246_v54, %v2185_v16  ;;  %v1630_v62 = vmax.f32 %v5740_v60, %v1514_v23 }
 0x21b   :  { %v2070_v7 = vpop.f32.mrf.mxu1  ;;  %v3397_v33 = vpop.f32.mrf.mxu0 }
 0x21c   :  { %v2290_v37 = vmax.f32 %v2241_v35, 0.0  ;;  %v2186_v19 = vmax.f32 %v1630_v62, %v2070_v7  ;;  %v5756_v62 = vld [vmem:[#allocation29_spill] sm:$0xff]  ;;  %v5757_v7 = vld [vmem:[#allocation30_spill] sm:$0xff] }
 0x21d   :  { %v3564_v42 = vpop.f32.mrf.mxu1  ;;  %v1519_v18 = vpop.f32.mrf.mxu0  ;;  %v5758_v33 = vmax.f32 %v5756_v62, %v5757_v7 }
 0x21e   :  { %2339 = vst [vmem:[%s5592_s3 + $0xf8] sm:$0xff] %v2290_v37  ;;  %v2242_v20 = vadd.f32 %v5246_v54, %v2186_v19  ;;  %v1631_v51 = vmax.f32 %v5743_v47, %v1519_v18 }
 0x21f   :  { %v2075_v40 = vpop.f32.mrf.mxu1  ;;  %v3400_v38 = vpop.f32.mrf.mxu0 }
 0x220   :  { %v2291_v56 = vmax.f32 %v2242_v20, 0.0  ;;  %v2187_v45 = vmax.f32 %v1631_v51, %v2075_v40  ;;  %v5759_v51 = vld [vmem:[#allocation31_spill] sm:$0xff]  ;;  %v5760_v40 = vld [vmem:[#allocation32_spill] sm:$0xff] }
 0x221   :  { %v3567_v52 = vpop.f32.mrf.mxu1  ;;  %v1524_v15 = vpop.f32.mrf.mxu0  ;;  %v5761_v38 = vmax.f32 %v5759_v51, %v5760_v40 }
 0x222   :  { %2340 = vst [vmem:[%s5592_s3 + $0x100] sm:$0xff] %v2291_v56  ;;  %v2243_v22 = vadd.f32 %v5246_v54, %v2187_v45  ;;  %v1632_v58 = vmax.f32 %v5746_v25, %v1524_v15 }
 0x223   :  { %v2080_v30 = vpop.f32.mrf.mxu1  ;;  %v3403_v27 = vpop.f32.mrf.mxu0 }
 0x224   :  { %v2292_v59 = vmax.f32 %v2243_v22, 0.0  ;;  %v2188_v5 = vmax.f32 %v1632_v58, %v2080_v30  ;;  %v5762_v58 = vld [vmem:[#allocation33_spill] sm:$0xff]  ;;  %v5763_v30 = vld [vmem:[#allocation34_spill] sm:$0xff] }
 0x225   :  { %v3570_v10 = vpop.f32.mrf.mxu1  ;;  %v1529_v63 = vpop.f32.mrf.mxu0  ;;  %v5764_v27 = vmax.f32 %v5762_v58, %v5763_v30 }
 0x226   :  { %2341 = vst [vmem:[%s5592_s3 + $0x108] sm:$0xff] %v2292_v59  ;;  %v2244_v6 = vadd.f32 %v5246_v54, %v2188_v5  ;;  %v1633_v8 = vmax.f32 %v5749_v14, %v1529_v63 }
 0x227   :  { %v2085_v53 = vpop.f32.mrf.mxu1  ;;  %v3406_v50 = vpop.f32.mrf.mxu0 }
 0x228   :  { %v2293_v55 = vmax.f32 %v2244_v6, 0.0  ;;  %v2189_v26 = vmax.f32 %v1633_v8, %v2085_v53  ;;  %v5765_v8 = vld [vmem:[#allocation35_spill] sm:$0xff]  ;;  %v5766_v53 = vld [vmem:[#allocation36_spill] sm:$0xff] }
 0x229   :  { %v3573_v31 = vpop.f32.mrf.mxu1  ;;  %v1534_v0 = vpop.f32.mrf.mxu0  ;;  %v5767_v50 = vmax.f32 %v5765_v8, %v5766_v53 }
 0x22a   :  { %2342 = vst [vmem:[%s5592_s3 + $0x110] sm:$0xff] %v2293_v55  ;;  %v2245_v9 = vadd.f32 %v5246_v54, %v2189_v26  ;;  %v1634_v32 = vmax.f32 %v5752_v12, %v1534_v0 }
 0x22b   :  { %v2090_v34 = vpop.f32.mrf.mxu1  ;;  %v3409_v29 = vpop.f32.mrf.mxu0 }
 0x22c   :  { %v2294_v11 = vmax.f32 %v2245_v9, 0.0  ;;  %v2190_v49 = vmax.f32 %v1634_v32, %v2090_v34  ;;  %v5768_v32 = vld [vmem:[#allocation37_spill] sm:$0xff]  ;;  %v5769_v34 = vld [vmem:[#allocation38_spill] sm:$0xff] }
 0x22d   :  { %v3576_v61 = vpop.f32.mrf.mxu1  ;;  %v1539_v13 = vpop.f32.mrf.mxu0  ;;  %v5770_v29 = vmax.f32 %v5768_v32, %v5769_v34 }
 0x22e   :  { %2343 = vst [vmem:[%s5592_s3 + $0x118] sm:$0xff] %v2294_v11  ;;  %v2246_v17 = vadd.f32 %v5246_v54, %v2190_v49  ;;  %v1635_v24 = vmax.f32 %v5755_v21, %v1539_v13 }
 0x22f   :  { %v2095_v16 = vpop.f32.mrf.mxu1  ;;  %v3412_v46 = vpop.f32.mrf.mxu0 }
 0x230   :  { %v2295_v23 = vmax.f32 %v2246_v17, 0.0  ;;  %v2191_v35 = vmax.f32 %v1635_v24, %v2095_v16  ;;  %v5771_v24 = vld [vmem:[#allocation39_spill] sm:$0xff]  ;;  %v5772_v16 = vld [vmem:[#allocation40_spill] sm:$0xff] }
 0x231   :  { %v3579_v39 = vpop.f32.mrf.mxu1  ;;  %v1544_v41 = vpop.f32.mrf.mxu0  ;;  %v5773_v46 = vmax.f32 %v5771_v24, %v5772_v16 }
 0x232   :  { %2344 = vst [vmem:[%s5592_s3 + $0x120] sm:$0xff] %v2295_v23  ;;  %v2247_v60 = vadd.f32 %v5246_v54, %v2191_v35  ;;  %v1636_v37 = vmax.f32 %v5758_v33, %v1544_v41 }
 0x233   :  { %v2100_v19 = vpop.f32.mrf.mxu1  ;;  %v3415_v42 = vpop.f32.mrf.mxu0 }
 0x234   :  { %v2296_v18 = vmax.f32 %v2247_v60, 0.0  ;;  %v2192_v20 = vmax.f32 %v1636_v37, %v2100_v19  ;;  %v5774_v37 = vld [vmem:[#allocation41_spill] sm:$0xff]  ;;  %v5775_v19 = vld [vmem:[#allocation42_spill] sm:$0xff] }
 0x235   :  { %v3582_v48 = vpop.f32.mrf.mxu1  ;;  %v1549_v1 = vpop.f32.mrf.mxu0  ;;  %v5776_v42 = vmax.f32 %v5774_v37, %v5775_v19 }
 0x236   :  { %2345 = vst [vmem:[%s5592_s3 + $0x128] sm:$0xff] %v2296_v18  ;;  %v2248_v47 = vadd.f32 %v5246_v54, %v2192_v20  ;;  %v1637_v56 = vmax.f32 %v5761_v38, %v1549_v1 }
 0x237   :  { %v2105_v45 = vpop.f32.mrf.mxu1  ;;  %v3418_v52 = vpop.f32.mrf.mxu0 }
 0x238   :  { %v2297_v15 = vmax.f32 %v2248_v47, 0.0  ;;  %v2193_v22 = vmax.f32 %v1637_v56, %v2105_v45  ;;  %v5777_v56 = vld [vmem:[#allocation43_spill] sm:$0xff]  ;;  %v5778_v45 = vld [vmem:[#allocation44_spill] sm:$0xff] }
 0x239   :  { %v3585_v36 = vpop.f32.mrf.mxu1  ;;  %v1554_v4 = vpop.f32.mrf.mxu0  ;;  %v5779_v52 = vmax.f32 %v5777_v56, %v5778_v45 }
 0x23a   :  { %2346 = vst [vmem:[%s5592_s3 + $0x130] sm:$0xff] %v2297_v15  ;;  %v2249_v25 = vadd.f32 %v5246_v54, %v2193_v22  ;;  %v1638_v59 = vmax.f32 %v5764_v27, %v1554_v4 }
 0x23b   :  { %v2110_v5 = vpop.f32.mrf.mxu1  ;;  %v3421_v10 = vpop.f32.mrf.mxu0 }
 0x23c   :  { %v2298_v63 = vmax.f32 %v2249_v25, 0.0  ;;  %v2194_v6 = vmax.f32 %v1638_v59, %v2110_v5  ;;  %v5780_v59 = vld [vmem:[#allocation45_spill] sm:$0xff]  ;;  %v5781_v5 = vld [vmem:[#allocation46_spill] sm:$0xff] }
 0x23d   :  { %v3588_v57 = vpop.f32.mrf.mxu1  ;;  %v1559_v28 = vpop.f32.mrf.mxu0  ;;  %v5782_v10 = vmax.f32 %v5780_v59, %v5781_v5 }
 0x23e   :  { %2347 = vst [vmem:[%s5592_s3 + $0x138] sm:$0xff] %v2298_v63  ;;  %v2250_v14 = vadd.f32 %v5246_v54, %v2194_v6  ;;  %v1639_v55 = vmax.f32 %v5767_v50, %v1559_v28 }
 0x23f   :  { %v2115_v26 = vpop.f32.mrf.mxu1  ;;  %v3424_v31 = vpop.f32.mrf.mxu0 }
 0x240   :  { %v2299_v0 = vmax.f32 %v2250_v14, 0.0  ;;  %v2195_v9 = vmax.f32 %v1639_v55, %v2115_v26  ;;  %v5783_v55 = vld [vmem:[#allocation47_spill] sm:$0xff]  ;;  %v5784_v26 = vld [vmem:[#allocation48_spill] sm:$0xff] }
 0x241   :  { %v3591_v3 = vpop.f32.mrf.mxu1  ;;  %v1564_v44 = vpop.f32.mrf.mxu0  ;;  %v5785_v31 = vmax.f32 %v5783_v55, %v5784_v26 }
 0x242   :  { %2348 = vst [vmem:[%s5592_s3 + $0x140] sm:$0xff] %v2299_v0  ;;  %v2251_v12 = vadd.f32 %v5246_v54, %v2195_v9  ;;  %v1640_v11 = vmax.f32 %v5770_v29, %v1564_v44 }
 0x243   :  { %v2120_v49 = vpop.f32.mrf.mxu1  ;;  %v3427_v61 = vpop.f32.mrf.mxu0 }
 0x244   :  { %v2300_v13 = vmax.f32 %v2251_v12, 0.0  ;;  %v2196_v17 = vmax.f32 %v1640_v11, %v2120_v49  ;;  %v5786_v11 = vld [vmem:[#allocation49_spill] sm:$0xff]  ;;  %v5787_v49 = vld [vmem:[#allocation50_spill] sm:$0xff] }
 0x245   :  { %v3594_v43 = vpop.f32.mrf.mxu1  ;;  %v1569_v2 = vpop.f32.mrf.mxu0  ;;  %v5788_v61 = vmax.f32 %v5786_v11, %v5787_v49 }
 0x246   :  { %2349 = vst [vmem:[%s5592_s3 + $0x148] sm:$0xff] %v2300_v13  ;;  %v2252_v21 = vadd.f32 %v5246_v54, %v2196_v17  ;;  %v1641_v23 = vmax.f32 %v5773_v46, %v1569_v2 }
 0x247   :  { %v2125_v35 = vpop.f32.mrf.mxu1  ;;  %v3430_v39 = vpop.f32.mrf.mxu0 }
 0x248   :  { %v2301_v41 = vmax.f32 %v2252_v21, 0.0  ;;  %v2197_v60 = vmax.f32 %v1641_v23, %v2125_v35 }
 0x249   :  { %v3597_v62 = vpop.f32.mrf.mxu1  ;;  %v1574_v7 = vpop.f32.mrf.mxu0 }
 0x24a   :  { %2350 = vst [vmem:[%s5592_s3 + $0x150] sm:$0xff] %v2301_v41  ;;  %v2253_v33 = vadd.f32 %v5246_v54, %v2197_v60  ;;  %v1642_v18 = vmax.f32 %v5776_v42, %v1574_v7 }
 0x24b   :  { %v2130_v20 = vpop.f32.mrf.mxu1  ;;  %v3433_v48 = vpop.f32.mrf.mxu0 }
 0x24c   :  { %v2302_v1 = vmax.f32 %v2253_v33, 0.0  ;;  %v2198_v47 = vmax.f32 %v1642_v18, %v2130_v20 }
 0x24d   :  { %v3600_v51 = vpop.f32.mrf.mxu1  ;;  %v1579_v40 = vpop.f32.mrf.mxu0 }
 0x24e   :  { %2351 = vst [vmem:[%s5592_s3 + $0x158] sm:$0xff] %v2302_v1  ;;  %v2254_v38 = vadd.f32 %v5246_v54, %v2198_v47  ;;  %v1643_v15 = vmax.f32 %v5779_v52, %v1579_v40 }
 0x24f   :  { %v2135_v22 = vpop.f32.mrf.mxu1  ;;  %v3436_v36 = vpop.f32.mrf.mxu0 }
 0x250   :  { %v2303_v4 = vmax.f32 %v2254_v38, 0.0  ;;  %v2199_v25 = vmax.f32 %v1643_v15, %v2135_v22 }
 0x251   :  { %v3603_v58 = vpop.f32.mrf.mxu1  ;;  %v1584_v30 = vpop.f32.mrf.mxu0 }
 0x252   :  { %2352 = vst [vmem:[%s5592_s3 + $0x160] sm:$0xff] %v2303_v4  ;;  %v2255_v27 = vadd.f32 %v5246_v54, %v2199_v25  ;;  %v1644_v63 = vmax.f32 %v5782_v10, %v1584_v30 }
 0x253   :  { %v2140_v6 = vpop.f32.mrf.mxu1  ;;  %v3439_v57 = vpop.f32.mrf.mxu0 }
 0x254   :  { %v2304_v28 = vmax.f32 %v2255_v27, 0.0  ;;  %v2200_v14 = vmax.f32 %v1644_v63, %v2140_v6 }
 0x255   :  { %v3606_v8 = vpop.f32.mrf.mxu1  ;;  %v1589_v53 = vpop.f32.mrf.mxu0 }
 0x256   :  { %2353 = vst [vmem:[%s5592_s3 + $0x168] sm:$0xff] %v2304_v28  ;;  %v2256_v50 = vadd.f32 %v5246_v54, %v2200_v14  ;;  %v1645_v0 = vmax.f32 %v5785_v31, %v1589_v53 }
 0x257   :  { %v2145_v9 = vpop.f32.mrf.mxu1  ;;  %v3442_v3 = vpop.f32.mrf.mxu0 }
 0x258   :  { %v2305_v44 = vmax.f32 %v2256_v50, 0.0  ;;  %v2201_v12 = vmax.f32 %v1645_v0, %v2145_v9 }
 0x259   :  { %v3609_v32 = vpop.f32.mrf.mxu1  ;;  %v1594_v34 = vpop.f32.mrf.mxu0 }
 0x25a   :  { %2354 = vst [vmem:[%s5592_s3 + $0x170] sm:$0xff] %v2305_v44  ;;  %v2257_v29 = vadd.f32 %v5246_v54, %v2201_v12  ;;  %v1646_v13 = vmax.f32 %v5788_v61, %v1594_v34 }
 0x25b   :  { %v2150_v17 = vpop.f32.mrf.mxu1  ;;  %v3445_v43 = vpop.f32.mrf.mxu0 }
 0x25c   :  { %v2306_v2 = vmax.f32 %v2257_v29, 0.0  ;;  %v2202_v21 = vmax.f32 %v1646_v13, %v2150_v17 }
 0x25d   :  { %v3612_v24 = vpop.f32.mrf.mxu1 }
 0x25e   :  { %2355 = vst [vmem:[%s5592_s3 + $0x178] sm:$0xff] %v2306_v2  ;;  %v2258_v16 = vadd.f32 %v5246_v54, %v2202_v21 }
 0x260   :  { %v2307_v46 = vmax.f32 %v2258_v16, 0.0 }
 0x262   :  { %2356 = vst [vmem:[%s5592_s3 + $0x180] sm:$0xff] %v2307_v46 }

// kernel: lenet5_forward.4
= control target key start
LH: loop header
LB: loop body
LE: loop exit
PB: predicated region body
PF: predicated region fallthrough
CT: control target
= control target key end

     0   :  { %v710_v0 = vmov 0.0   ;;  %vm69_vm0 = vcmask 1045504   ;;  %vm47_vm1 = vcmask 179200   ;;  %s1220_s1 = inlined_call_operand.vmem [shape: f32[150,128], index: 1, kind: input, shape index: {}]   ;;  %s1221_s0 = inlined_call_operand.vmem [shape: f32[4,56,150], index: 0, kind: input, shape index: {}]   ;;  %s1222_s2 = inlined_call_operand.vmem [shape: f32[1,128], index: 2, kind: input, shape index: {}]   ;;  %s1223_s3 = inlined_call_operand.vmem [shape: f32[56,128], index: 3, kind: output, shape index: {}]  }
   0x1   :  { %73 = vmatprep.subr.mxu0 %v710_v0  ;;  %209 = vmatprep.subr.mxu1 %v710_v0  ;;  %v736_v1 = vld [vmem:[%s1220_s1 + $0x78] sm:$0xff]  ;;  %v741_v2 = vld [vmem:[%s1220_s1 + $0x70] sm:$0xff]  ;;  %v750_v3 = vld [vmem:[%s1220_s1 + $0x68] sm:$0xff] }
   0x2   :  { %74 = vmatpush1.msra.mxu0 %v736_v1  ;;  %210 = vmatpush1.msra.mxu1 %v736_v1  ;;  %v759_v4 = vld [vmem:[%s1220_s1 + $0x60] sm:$0xff]  ;;  %v768_v5 = vld [vmem:[%s1220_s1 + $0x58] sm:$0xff]  ;;  %v777_v6 = vld [vmem:[%s1220_s1 + $0x50] sm:$0xff] }
   0x3   :  { %75 = vmatprep.subr.mxu0 %v710_v0  ;;  %211 = vmatprep.subr.mxu1 %v710_v0  ;;  %v786_v7 = vld [vmem:[%s1220_s1 + $0x48] sm:$0xff]  ;;  %v795_v8 = vld [vmem:[%s1220_s1 + $0x40] sm:$0xff]  ;;  %v804_v9 = vld [vmem:[%s1220_s1 + $0x38] sm:$0xff] }
   0x4   :  { %76 = vmatpush1.msra.mxu0 %v741_v2  ;;  %212 = vmatpush1.msra.mxu1 %v741_v2  ;;  %v813_v10 = vld [vmem:[%s1220_s1 + $0x30] sm:$0xff]  ;;  %v822_v11 = vld [vmem:[%s1220_s1 + $0x28] sm:$0xff]  ;;  %v831_v12 = vld [vmem:[%s1220_s1 + $0x20] sm:$0xff] }
   0x5   :  { %77 = vmatprep.subr.mxu0 %v710_v0  ;;  %213 = vmatprep.subr.mxu1 %v710_v0  ;;  %v840_v13 = vld [vmem:[%s1220_s1 + $0x18] sm:$0xff]  ;;  %v849_v14 = vld [vmem:[%s1220_s1 + $0x10] sm:$0xff]  ;;  %v858_v15 = vld [vmem:[%s1220_s1 + $0x8] sm:$0xff] }
   0x6   :  { %78 = vmatpush1.msra.mxu0 %v750_v3  ;;  %214 = vmatpush1.msra.mxu1 %v750_v3  ;;  %v867_v16 = vld [vmem:[%s1220_s1] sm:$0xff]  ;;  %v876_v17 = vld [vmem:[%s1220_s1 + $0x90] sm:$0x3f]  ;;  %v885_v18 = vld [vmem:[%s1220_s1 + $0x88] sm:$0xff] }
   0x7   :  { %79 = vmatprep.subr.mxu0 %v710_v0  ;;  %215 = vmatprep.subr.mxu1 %v710_v0  ;;  %v896_v19 = vld [vmem:[%s1220_s1 + $0x80] sm:$0xff]  ;;  %v34_v20 = vld [vmem:[%s1221_s0 + $0x8] sm:$0xff]  ;;  %v643_v22 = vld [vmem:[%s1221_s0 + $0x78] sm:$0xff] }
   0x8   :  { %80 = vmatpush1.msra.mxu0 %v759_v4  ;;  %216 = vmatpush1.msra.mxu1 %v759_v4  ;;  %v33_v21 = vld [vmem:[%s1221_s0] sm:$0xff]  ;;  %v642_v23 = vld [vmem:[%s1221_s0 + $0x70] sm:$0xff]  ;;  %v36_v24 = vld [vmem:[%s1221_s0 + $0x18] sm:$0xff] }
   0x9   :  { %81 = vmatprep.subr.mxu0 %v710_v0  ;;  %217 = vmatprep.subr.mxu1 %v710_v0  ;;  %v35_v25 = vld [vmem:[%s1221_s0 + $0x10] sm:$0xff]  ;;  %v645_v26 = vld [vmem:[%s1221_s0 + $0x88] sm:$0xff]  ;;  %v644_v27 = vld [vmem:[%s1221_s0 + $0x80] sm:$0xff] }
   0xa   :  { %82 = vmatpush1.msra.mxu0 %v768_v5  ;;  %218 = vmatpush1.msra.mxu1 %v768_v5  ;;  %v38_v28 = vld [vmem:[%s1221_s0 + $0x28] sm:$0xff]  ;;  %v37_v29 = vld [vmem:[%s1221_s0 + $0x20] sm:$0xff]  ;;  %v647_v30 = vld [vmem:[%s1221_s0 + $0x98] sm:$0xff] }
   0xb   :  { %83 = vmatprep.subr.mxu0 %v710_v0  ;;  %219 = vmatprep.subr.mxu1 %v710_v0  ;;  %v646_v31 = vld [vmem:[%s1221_s0 + $0x90] sm:$0xff]  ;;  %v40_v32 = vld [vmem:[%s1221_s0 + $0x38] sm:$0xff]  ;;  %v649_v34 = vld [vmem:[%s1221_s0 + $0xa8] sm:$0xff] }
   0xc   :  { %84 = vmatpush1.msra.mxu0 %v777_v6  ;;  %220 = vmatpush1.msra.mxu1 %v777_v6  ;;  %v39_v33 = vld [vmem:[%s1221_s0 + $0x30] sm:$0xff]  ;;  %v648_v35 = vld [vmem:[%s1221_s0 + $0xa0] sm:$0xff]  ;;  %v42_v36 = vld [vmem:[%s1221_s0 + $0x48] sm:$0xff] }
   0xd   :  { %85 = vmatprep.subr.mxu0 %v710_v0  ;;  %221 = vmatprep.subr.mxu1 %v710_v0  ;;  %v41_v37 = vld [vmem:[%s1221_s0 + $0x40] sm:$0xff]  ;;  %v651_v38 = vld [vmem:[%s1221_s0 + $0xb8] sm:$0xff]  ;;  %v650_v39 = vld [vmem:[%s1221_s0 + $0xb0] sm:$0xff] }
   0xe   :  { %86 = vmatpush1.msra.mxu0 %v786_v7  ;;  %222 = vmatpush1.msra.mxu1 %v786_v7  ;;  %v44_v40 = vld [vmem:[%s1221_s0 + $0x58] sm:$0xff]  ;;  %v43_v41 = vld [vmem:[%s1221_s0 + $0x50] sm:$0xff]  ;;  %v653_v42 = vld [vmem:[%s1221_s0 + $0xc8] sm:$0xff] }
   0xf   :  { %87 = vmatprep.subr.mxu0 %v710_v0  ;;  %223 = vmatprep.subr.mxu1 %v710_v0  ;;  %v652_v43 = vld [vmem:[%s1221_s0 + $0xc0] sm:$0xff]  ;;  %v46_v44 = vld [vmem:[%s1221_s0 + $0x68] sm:$0xff]  ;;  %v655_v46 = vld [vmem:[%s1221_s0 + $0xd8] sm:$0xff] }
  0x10   :  { %88 = vmatpush1.msra.mxu0 %v795_v8  ;;  %224 = vmatpush1.msra.mxu1 %v795_v8  ;;  %v45_v45 = vld [vmem:[%s1221_s0 + $0x60] sm:$0xff]  ;;  %v654_v47 = vld [vmem:[%s1221_s0 + $0xd0] sm:$0xff]  ;;  %v665_v48 = vld [vmem:[%s1221_s0 + $0xe8] sm:$0xff] }
  0x11   :  { %89 = vmatprep.subr.mxu0 %v710_v0  ;;  %225 = vmatprep.subr.mxu1 %v710_v0  ;;  %v687_v49 = vld [vmem:[%s1221_s0 + $0x158] sm:$0xff]  ;;  %v664_v50 = vld [vmem:[%s1221_s0 + $0xe0] sm:$0xff]  ;;  %v686_v51 = vld [vmem:[%s1221_s0 + $0x150] sm:$0xff] }
  0x12   :  { %90 = vmatpush1.msra.mxu0 %v804_v9  ;;  %226 = vmatpush1.msra.mxu1 %v804_v9  ;;  %v667_v52 = vld [vmem:[%s1221_s0 + $0xf8] sm:$0xff]  ;;  %v689_v53 = vld [vmem:[%s1221_s0 + $0x168] sm:$0xff]  ;;  %v666_v54 = vld [vmem:[%s1221_s0 + $0xf0] sm:$0xff] }
  0x13   :  { %91 = vmatprep.subr.mxu0 %v710_v0  ;;  %227 = vmatprep.subr.mxu1 %v710_v0  ;;  %v688_v55 = vld [vmem:[%s1221_s0 + $0x160] sm:$0xff]  ;;  %v669_v56 = vld [vmem:[%s1221_s0 + $0x108] sm:$0xff]  ;;  %v691_v57 = vld [vmem:[%s1221_s0 + $0x178] sm:$0xff] }
  0x14   :  { %92 = vmatpush1.msra.mxu0 %v813_v10  ;;  %228 = vmatpush1.msra.mxu1 %v813_v10  ;;  %v668_v58 = vld [vmem:[%s1221_s0 + $0x100] sm:$0xff]  ;;  %v690_v59 = vld [vmem:[%s1221_s0 + $0x170] sm:$0xff]  ;;  %v671_v60 = vld [vmem:[%s1221_s0 + $0x118] sm:$0xff] }
  0x15   :  { %93 = vmatprep.subr.mxu0 %v710_v0  ;;  %229 = vmatprep.subr.mxu1 %v710_v0  ;;  %v693_v61 = vld [vmem:[%s1221_s0 + $0x188] sm:$0xff]  ;;  %v670_v62 = vld [vmem:[%s1221_s0 + $0x110] sm:$0xff]  ;;  %v692_v63 = vld [vmem:[%s1221_s0 + $0x180] sm:$0xff] }
  0x16   :  { %94 = vmatpush1.msra.mxu0 %v822_v11  ;;  %230 = vmatpush1.msra.mxu1 %v822_v11 }
  0x17   :  { %95 = vmatprep.subr.mxu0 %v710_v0  ;;  %231 = vmatprep.subr.mxu1 %v710_v0 }
  0x18   :  { %96 = vmatpush1.msra.mxu0 %v831_v12  ;;  %232 = vmatpush1.msra.mxu1 %v831_v12 }
  0x19   :  { %97 = vmatprep.subr.mxu0 %v710_v0  ;;  %233 = vmatprep.subr.mxu1 %v710_v0 }
  0x1a   :  { %98 = vmatpush1.msra.mxu0 %v840_v13  ;;  %234 = vmatpush1.msra.mxu1 %v840_v13 }
  0x1b   :  { %99 = vmatprep.subr.mxu0 %v710_v0  ;;  %235 = vmatprep.subr.mxu1 %v710_v0 }
  0x1c   :  { %100 = vmatpush1.msra.mxu0 %v849_v14  ;;  %236 = vmatpush1.msra.mxu1 %v849_v14 }
  0x1d   :  { %101 = vmatprep.subr.mxu0 %v710_v0  ;;  %237 = vmatprep.subr.mxu1 %v710_v0 }
  0x1e   :  { %102 = vmatpush1.msra.mxu0 %v858_v15  ;;  %238 = vmatpush1.msra.mxu1 %v858_v15 }
  0x1f   :  { %103 = vmatprep.subr.mxu0 %v710_v0  ;;  %239 = vmatprep.subr.mxu1 %v710_v0 }
  0x20   :  { %104 = vmatpush1.msra.mxu0 %v867_v16  ;;  %240 = vmatpush1.msra.mxu1 %v867_v16 }
  0x21   :  { %131 = vmatprep.subr.mxu0 %v710_v0  ;;  %267 = vmatprep.subr.mxu1 %v710_v0 }
  0x22   :  { %634 = vmatpush2.msk.msra.mxu0 %vm69_vm0, %v876_v17  ;;  %656 = vmatpush2.msk.msra.mxu1 %vm69_vm0, %v876_v17 }
  0x23   :  { %133 = vmatprep.subr.mxu0 %v710_v0  ;;  %269 = vmatprep.subr.mxu1 %v710_v0 }
  0x24   :  { %134 = vmatpush2.msra.mxu0 %v885_v18  ;;  %270 = vmatpush2.msra.mxu1 %v885_v18 }
  0x25   :  { %135 = vmatprep.subr.mxu0 %v710_v0  ;;  %271 = vmatprep.subr.mxu1 %v710_v0 }
  0x26   :  { %136 = vmatpush2.msra.mxu0 %v896_v19  ;;  %635 = vmatprep.mubr.msk.f32.mxu0 %vm47_vm1, %v34_v20 }
  0x27   :  { %272 = vmatpush2.msra.mxu1 %v896_v19  ;;  %138 = vmatmul.mubr.f32.vlgmr.msra.gmra.mxu0 %v33_v21 }
  0x28   :  { %657 = vmatprep.mubr.msk.f32.mxu1 %vm47_vm1, %v643_v22  ;;  %352 = vmatprep.subr.mxu0 %v710_v0 }
  0x29   :  { %495 = vmatprep.subr.mxu1 %v710_v0  ;;  %274 = vmatmul.mubr.f32.vlgmr.msra.gmra.mxu1 %v642_v23 }
  0x2a   :  { %353 = vmatpush1.msra.mxu0 %v736_v1  ;;  %496 = vmatpush1.msra.mxu1 %v736_v1  ;;  %v695_v1 = vld [vmem:[%s1221_s0 + $0x198] sm:$0xff] }
  0x2b   :  { %354 = vmatprep.subr.mxu0 %v710_v0  ;;  %497 = vmatprep.subr.mxu1 %v710_v0 }
  0x2c   :  { %355 = vmatpush1.msra.mxu0 %v741_v2  ;;  %498 = vmatpush1.msra.mxu1 %v741_v2  ;;  %v672_v2 = vld [vmem:[%s1221_s0 + $0x120] sm:$0xff] }
  0x2d   :  { %356 = vmatprep.subr.mxu0 %v710_v0  ;;  %499 = vmatprep.subr.mxu1 %v710_v0 }
  0x2e   :  { %357 = vmatpush1.msra.mxu0 %v750_v3  ;;  %500 = vmatpush1.msra.mxu1 %v750_v3  ;;  %v694_v3 = vld [vmem:[%s1221_s0 + $0x190] sm:$0xff] }
  0x2f   :  { %358 = vmatprep.subr.mxu0 %v710_v0  ;;  %501 = vmatprep.subr.mxu1 %v710_v0 }
  0x30   :  { %359 = vmatpush1.msra.mxu0 %v759_v4  ;;  %502 = vmatpush1.msra.mxu1 %v759_v4  ;;  %v675_v4 = vld [vmem:[%s1221_s0 + $0x138] sm:$0xff] }
  0x31   :  { %360 = vmatprep.subr.mxu0 %v710_v0  ;;  %503 = vmatprep.subr.mxu1 %v710_v0 }
  0x32   :  { %361 = vmatpush1.msra.mxu0 %v768_v5  ;;  %504 = vmatpush1.msra.mxu1 %v768_v5  ;;  %v697_v5 = vld [vmem:[%s1221_s0 + $0x1a8] sm:$0xff] }
  0x33   :  { %362 = vmatprep.subr.mxu0 %v710_v0  ;;  %505 = vmatprep.subr.mxu1 %v710_v0 }
  0x34   :  { %636 = vmatprep.mubr.msk.f32.mxu0 %vm47_vm1, %v36_v24  ;;  %363 = vmatpush1.msra.mxu0 %v777_v6 }
  0x35   :  { %506 = vmatpush1.msra.mxu1 %v777_v6  ;;  %143 = vmatmul.mubr.f32.gmra.mxu0 %v35_v25  ;;  %v674_v6 = vld [vmem:[%s1221_s0 + $0x130] sm:$0xff] }
  0x36   :  { %364 = vmatprep.subr.mxu0 %v710_v0  ;;  %507 = vmatprep.subr.mxu1 %v710_v0 }
  0x37   :  { %658 = vmatprep.mubr.msk.f32.mxu1 %vm47_vm1, %v645_v26  ;;  %365 = vmatpush1.msra.mxu0 %v786_v7 }
  0x38   :  { %508 = vmatpush1.msra.mxu1 %v786_v7  ;;  %366 = vmatprep.subr.mxu0 %v710_v0  ;;  %v696_v7 = vld [vmem:[%s1221_s0 + $0x1a0] sm:$0xff] }
  0x39   :  { %279 = vmatmul.mubr.f32.gmra.mxu1 %v644_v27  ;;  %509 = vmatprep.subr.mxu1 %v710_v0 }
  0x3a   :  { %637 = vmatprep.mubr.msk.f32.mxu0 %vm47_vm1, %v38_v28  ;;  %367 = vmatpush1.msra.mxu0 %v795_v8 }
  0x3b   :  { %510 = vmatpush1.msra.mxu1 %v795_v8  ;;  %148 = vmatmul.mubr.f32.gmra.mxu0 %v37_v29  ;;  %v677_v8 = vld [vmem:[%s1221_s0 + $0x148] sm:$0xff] }
  0x3c   :  { %368 = vmatprep.subr.mxu0 %v710_v0  ;;  %511 = vmatprep.subr.mxu1 %v710_v0 }
  0x3d   :  { %659 = vmatprep.mubr.msk.f32.mxu1 %vm47_vm1, %v647_v30  ;;  %369 = vmatpush1.msra.mxu0 %v804_v9 }
  0x3e   :  { %512 = vmatpush1.msra.mxu1 %v804_v9  ;;  %370 = vmatprep.subr.mxu0 %v710_v0  ;;  %v699_v9 = vld [vmem:[%s1221_s0 + $0x1b8] sm:$0xff] }
  0x3f   :  { %284 = vmatmul.mubr.f32.gmra.mxu1 %v646_v31  ;;  %513 = vmatprep.subr.mxu1 %v710_v0 }
  0x40   :  { %638 = vmatprep.mubr.msk.f32.mxu0 %vm47_vm1, %v40_v32  ;;  %371 = vmatpush1.msra.mxu0 %v813_v10 }
  0x41   :  { %514 = vmatpush1.msra.mxu1 %v813_v10  ;;  %153 = vmatmul.mubr.f32.gmra.mxu0 %v39_v33  ;;  %v676_v10 = vld [vmem:[%s1221_s0 + $0x140] sm:$0xff] }
  0x42   :  { %372 = vmatprep.subr.mxu0 %v710_v0  ;;  %515 = vmatprep.subr.mxu1 %v710_v0 }
  0x43   :  { %660 = vmatprep.mubr.msk.f32.mxu1 %vm47_vm1, %v649_v34  ;;  %373 = vmatpush1.msra.mxu0 %v822_v11 }
  0x44   :  { %516 = vmatpush1.msra.mxu1 %v822_v11  ;;  %374 = vmatprep.subr.mxu0 %v710_v0  ;;  %v698_v11 = vld [vmem:[%s1221_s0 + $0x1b0] sm:$0xff] }
  0x45   :  { %289 = vmatmul.mubr.f32.gmra.mxu1 %v648_v35  ;;  %517 = vmatprep.subr.mxu1 %v710_v0 }
  0x46   :  { %639 = vmatprep.mubr.msk.f32.mxu0 %vm47_vm1, %v42_v36  ;;  %375 = vmatpush1.msra.mxu0 %v831_v12 }
  0x47   :  { %518 = vmatpush1.msra.mxu1 %v831_v12  ;;  %158 = vmatmul.mubr.f32.gmra.mxu0 %v41_v37 }
  0x48   :  { %376 = vmatprep.subr.mxu0 %v710_v0  ;;  %519 = vmatprep.subr.mxu1 %v710_v0 }
  0x49   :  { %661 = vmatprep.mubr.msk.f32.mxu1 %vm47_vm1, %v651_v38  ;;  %377 = vmatpush1.msra.mxu0 %v840_v13 }
  0x4a   :  { %520 = vmatpush1.msra.mxu1 %v840_v13  ;;  %378 = vmatprep.subr.mxu0 %v710_v0 }
  0x4b   :  { %294 = vmatmul.mubr.f32.gmra.mxu1 %v650_v39  ;;  %521 = vmatprep.subr.mxu1 %v710_v0 }
  0x4c   :  { %640 = vmatprep.mubr.msk.f32.mxu0 %vm47_vm1, %v44_v40  ;;  %379 = vmatpush1.msra.mxu0 %v849_v14 }
  0x4d   :  { %522 = vmatpush1.msra.mxu1 %v849_v14  ;;  %163 = vmatmul.mubr.f32.gmra.mxu0 %v43_v41 }
  0x4e   :  { %380 = vmatprep.subr.mxu0 %v710_v0  ;;  %523 = vmatprep.subr.mxu1 %v710_v0 }
  0x4f   :  { %662 = vmatprep.mubr.msk.f32.mxu1 %vm47_vm1, %v653_v42  ;;  %381 = vmatpush1.msra.mxu0 %v858_v15 }
  0x50   :  { %524 = vmatpush1.msra.mxu1 %v858_v15  ;;  %382 = vmatprep.subr.mxu0 %v710_v0 }
  0x51   :  { %299 = vmatmul.mubr.f32.gmra.mxu1 %v652_v43  ;;  %525 = vmatprep.subr.mxu1 %v710_v0 }
  0x52   :  { %641 = vmatprep.mubr.msk.f32.mxu0 %vm47_vm1, %v46_v44  ;;  %383 = vmatpush1.msra.mxu0 %v867_v16  ;;  %v1187_v44 = vld [vmem:[%s1222_s2] ss:$0 sm:$0xff] }
  0x53   :  { %526 = vmatpush1.msra.mxu1 %v867_v16  ;;  %168 = vmatmul.mubr.f32.gmra.mxu0 %v45_v45 }
  0x54   :  { %410 = vmatprep.subr.mxu0 %v710_v0  ;;  %553 = vmatprep.subr.mxu1 %v710_v0 }
  0x55   :  { %663 = vmatprep.mubr.msk.f32.mxu1 %vm47_vm1, %v655_v46  ;;  %678 = vmatpush2.msk.msra.mxu0 %vm69_vm0, %v876_v17 }
  0x56   :  { %700 = vmatpush2.msk.msra.mxu1 %vm69_vm0, %v876_v17  ;;  %412 = vmatprep.subr.mxu0 %v710_v0 }
  0x57   :  { %304 = vmatmul.mubr.f32.gmra.mxu1 %v654_v47  ;;  %555 = vmatprep.subr.mxu1 %v710_v0 }
  0x58   :  { %413 = vmatpush2.msra.mxu0 %v885_v18  ;;  %556 = vmatpush2.msra.mxu1 %v885_v18 }
  0x59   :  { %414 = vmatprep.subr.mxu0 %v710_v0  ;;  %557 = vmatprep.subr.mxu1 %v710_v0  ;;  %v673_v0 = vld [vmem:[%s1221_s0 + $0x128] sm:$0xff] }
  0x5a   :  { %415 = vmatpush2.msra.mxu0 %v896_v19  ;;  %679 = vmatprep.mubr.msk.f32.mxu0 %vm47_vm1, %v665_v48 }
  0x5b   :  { %558 = vmatpush2.msra.mxu1 %v896_v19  ;;  %701 = vmatprep.mubr.msk.f32.mxu1 %vm47_vm1, %v687_v49 }
  0x5c   :  { %417 = vmatmul.mubr.f32.vlgmr.msra.gmra.mxu0 %v664_v50  ;;  %560 = vmatmul.mubr.f32.vlgmr.msra.gmra.mxu1 %v686_v51 }
  0x5d   :  { %680 = vmatprep.mubr.msk.f32.mxu0 %vm47_vm1, %v667_v52  ;;  %702 = vmatprep.mubr.msk.f32.mxu1 %vm47_vm1, %v689_v53 }
  0x60   :  { %422 = vmatmul.mubr.f32.gmra.mxu0 %v666_v54  ;;  %565 = vmatmul.mubr.f32.gmra.mxu1 %v688_v55 }
  0x61   :  { %681 = vmatprep.mubr.msk.f32.mxu0 %vm47_vm1, %v669_v56  ;;  %703 = vmatprep.mubr.msk.f32.mxu1 %vm47_vm1, %v691_v57 }
  0x64   :  { %427 = vmatmul.mubr.f32.gmra.mxu0 %v668_v58  ;;  %570 = vmatmul.mubr.f32.gmra.mxu1 %v690_v59 }
  0x65   :  { %682 = vmatprep.mubr.msk.f32.mxu0 %vm47_vm1, %v671_v60  ;;  %704 = vmatprep.mubr.msk.f32.mxu1 %vm47_vm1, %v693_v61 }
  0x68   :  { %432 = vmatmul.mubr.f32.gmra.mxu0 %v670_v62  ;;  %575 = vmatmul.mubr.f32.gmra.mxu1 %v692_v63 }
  0x69   :  { %683 = vmatprep.mubr.msk.f32.mxu0 %vm47_vm1, %v673_v0  ;;  %705 = vmatprep.mubr.msk.f32.mxu1 %vm47_vm1, %v695_v1 }
  0x6c   :  { %437 = vmatmul.mubr.f32.gmra.mxu0 %v672_v2  ;;  %580 = vmatmul.mubr.f32.gmra.mxu1 %v694_v3 }
  0x6d   :  { %684 = vmatprep.mubr.msk.f32.mxu0 %vm47_vm1, %v675_v4  ;;  %706 = vmatprep.mubr.msk.f32.mxu1 %vm47_vm1, %v697_v5 }
  0x70   :  { %442 = vmatmul.mubr.f32.gmra.mxu0 %v674_v6  ;;  %585 = vmatmul.mubr.f32.gmra.mxu1 %v696_v7 }
  0x71   :  { %685 = vmatprep.mubr.msk.f32.mxu0 %vm47_vm1, %v677_v8  ;;  %707 = vmatprep.mubr.msk.f32.mxu1 %vm47_vm1, %v699_v9 }
  0x74   :  { %447 = vmatmul.mubr.f32.gmra.mxu0 %v676_v10  ;;  %590 = vmatmul.mubr.f32.gmra.mxu1 %v698_v11 }
  0xe7   :  { %v139_v12 = vpop.f32.mrf.mxu0 }
  0xe9   :  { %v275_v13 = vpop.f32.mrf.mxu1  ;;  %v141_v14 = vpop.f32.mrf.mxu0 }
  0xea   :  { %v309_v40 = vmax.f32 %v139_v12, %v275_v13 }
  0xeb   :  { %v277_v15 = vpop.f32.mrf.mxu1 }
  0xf5   :  { %v144_v16 = vpop.f32.mrf.mxu0 }
  0xf7   :  { %v146_v17 = vpop.f32.mrf.mxu0 }
  0xf9   :  { %v280_v18 = vpop.f32.mrf.mxu1 }
  0xfa   :  { %v310_v47 = vmax.f32 %v144_v16, %v280_v18 }
  0xfb   :  { %v149_v19 = vpop.f32.mrf.mxu0  ;;  %v282_v20 = vpop.f32.mrf.mxu1 }
  0xfd   :  { %v151_v21 = vpop.f32.mrf.mxu0 }
  0xff   :  { %v285_v22 = vpop.f32.mrf.mxu1 }
 0x100   :  { %v311_v55 = vmax.f32 %v149_v19, %v285_v22 }
 0x101   :  { %v154_v23 = vpop.f32.mrf.mxu0  ;;  %v287_v24 = vpop.f32.mrf.mxu1 }
 0x103   :  { %v156_v25 = vpop.f32.mrf.mxu0 }
 0x105   :  { %v290_v26 = vpop.f32.mrf.mxu1 }
 0x106   :  { %v312_v0 = vmax.f32 %v154_v23, %v290_v26 }
 0x107   :  { %v159_v27 = vpop.f32.mrf.mxu0  ;;  %v292_v28 = vpop.f32.mrf.mxu1 }
 0x109   :  { %v161_v29 = vpop.f32.mrf.mxu0 }
 0x10b   :  { %v295_v30 = vpop.f32.mrf.mxu1 }
 0x10c   :  { %v313_v9 = vmax.f32 %v159_v27, %v295_v30 }
 0x10d   :  { %v1178_v31 = vpop.f32.mrf.mxu0  ;;  %v297_v32 = vpop.f32.mrf.mxu1 }
 0x10f   :  { %v166_v33 = vpop.f32.mrf.mxu0 }
 0x111   :  { %v300_v34 = vpop.f32.mrf.mxu1 }
 0x112   :  { %v314_v18 = vmax.f32 %v1178_v31, %v300_v34 }
 0x113   :  { %v1180_v35 = vpop.f32.mrf.mxu0  ;;  %v302_v36 = vpop.f32.mrf.mxu1 }
 0x115   :  { %v171_v37 = vpop.f32.mrf.mxu0 }
 0x117   :  { %v1182_v38 = vpop.f32.mrf.mxu1 }
 0x118   :  { %v315_v27 = vmax.f32 %v1180_v35, %v1182_v38 }
 0x119   :  { %v307_v39 = vpop.f32.mrf.mxu1 }
 0x11c   :  { %v418_v41 = vpop.f32.mrf.mxu0  ;;  %v561_v42 = vpop.f32.mrf.mxu1 }
 0x11d   :  { %v452_v43 = vmax.f32 %v309_v40, %v418_v41 }
 0x11e   :  { %v420_v45 = vpop.f32.mrf.mxu0  ;;  %v563_v46 = vpop.f32.mrf.mxu1 }
 0x11f   :  { %v595_v48 = vmax.f32 %v452_v43, %v561_v42 }
 0x120   :  { %v423_v49 = vpop.f32.mrf.mxu0  ;;  %v566_v50 = vpop.f32.mrf.mxu1 }
 0x121   :  { %v609_v51 = vadd.f32 %v1187_v44, %v595_v48  ;;  %v453_v52 = vmax.f32 %v310_v47, %v423_v49 }
 0x122   :  { %v425_v53 = vpop.f32.mrf.mxu0  ;;  %v568_v54 = vpop.f32.mrf.mxu1 }
 0x123   :  { %v616_v56 = vmax.f32 %v609_v51, 0.0  ;;  %v596_v57 = vmax.f32 %v453_v52, %v566_v50 }
 0x124   :  { %v428_v58 = vpop.f32.mrf.mxu0  ;;  %v571_v59 = vpop.f32.mrf.mxu1 }
 0x125   :  { %623 = vst [vmem:[%s1223_s3] sm:$0xff] %v616_v56  ;;  %v610_v60 = vadd.f32 %v1187_v44, %v596_v57  ;;  %v454_v61 = vmax.f32 %v311_v55, %v428_v58 }
 0x126   :  { %v430_v62 = vpop.f32.mrf.mxu0  ;;  %v573_v63 = vpop.f32.mrf.mxu1 }
 0x127   :  { %v617_v1 = vmax.f32 %v610_v60, 0.0  ;;  %v597_v2 = vmax.f32 %v454_v61, %v571_v59 }
 0x128   :  { %v433_v3 = vpop.f32.mrf.mxu0  ;;  %v576_v4 = vpop.f32.mrf.mxu1 }
 0x129   :  { %624 = vst [vmem:[%s1223_s3 + $0x8] sm:$0xff] %v617_v1  ;;  %v611_v5 = vadd.f32 %v1187_v44, %v597_v2  ;;  %v455_v6 = vmax.f32 %v312_v0, %v433_v3 }
 0x12a   :  { %v435_v7 = vpop.f32.mrf.mxu0  ;;  %v578_v8 = vpop.f32.mrf.mxu1 }
 0x12b   :  { %v618_v10 = vmax.f32 %v611_v5, 0.0  ;;  %v598_v11 = vmax.f32 %v455_v6, %v576_v4 }
 0x12c   :  { %v438_v12 = vpop.f32.mrf.mxu0  ;;  %v581_v13 = vpop.f32.mrf.mxu1 }
 0x12d   :  { %625 = vst [vmem:[%s1223_s3 + $0x10] sm:$0xff] %v618_v10  ;;  %v612_v14 = vadd.f32 %v1187_v44, %v598_v11  ;;  %v456_v15 = vmax.f32 %v313_v9, %v438_v12 }
 0x12e   :  { %v440_v16 = vpop.f32.mrf.mxu0  ;;  %v583_v17 = vpop.f32.mrf.mxu1 }
 0x12f   :  { %v619_v19 = vmax.f32 %v612_v14, 0.0  ;;  %v599_v20 = vmax.f32 %v456_v15, %v581_v13 }
 0x130   :  { %v443_v21 = vpop.f32.mrf.mxu0  ;;  %v586_v22 = vpop.f32.mrf.mxu1 }
 0x131   :  { %626 = vst [vmem:[%s1223_s3 + $0x18] sm:$0xff] %v619_v19  ;;  %v613_v23 = vadd.f32 %v1187_v44, %v599_v20  ;;  %v457_v24 = vmax.f32 %v314_v18, %v443_v21 }
 0x132   :  { %v445_v25 = vpop.f32.mrf.mxu0  ;;  %v588_v26 = vpop.f32.mrf.mxu1 }
 0x133   :  { %v620_v28 = vmax.f32 %v613_v23, 0.0  ;;  %v600_v29 = vmax.f32 %v457_v24, %v586_v22 }
 0x134   :  { %v448_v30 = vpop.f32.mrf.mxu0  ;;  %v591_v31 = vpop.f32.mrf.mxu1 }
 0x135   :  { %627 = vst [vmem:[%s1223_s3 + $0x20] sm:$0xff] %v620_v28  ;;  %v614_v32 = vadd.f32 %v1187_v44, %v600_v29  ;;  %v458_v33 = vmax.f32 %v315_v27, %v448_v30 }
 0x136   :  { %v450_v34 = vpop.f32.mrf.mxu0  ;;  %v593_v36 = vpop.f32.mrf.mxu1 }
 0x137   :  { %v621_v37 = vmax.f32 %v614_v32, 0.0  ;;  %v601_v39 = vmax.f32 %v458_v33, %v591_v31 }
 0x139   :  { %628 = vst [vmem:[%s1223_s3 + $0x28] sm:$0xff] %v621_v37  ;;  %v615_v35 = vadd.f32 %v1187_v44, %v601_v39 }
 0x13b   :  { %v622_v38 = vmax.f32 %v615_v35, 0.0 }
 0x13d   :  { %629 = vst [vmem:[%s1223_s3 + $0x30] sm:$0xff] %v622_v38 }

// kernel: lenet5_forward.5
= control target key start
LH: loop header
LB: loop body
LE: loop exit
PB: predicated region body
PF: predicated region fallthrough
CT: control target
= control target key end

     0   :  { %v569_v1 = vmov 0.0   ;;  %vm87_vm0 = vcmask 130048   ;;  %vm570_vm1 = vmmov 0   ;;  %s933_s1 = inlined_call_operand.vmem [shape: f32[400,128], index: 1, kind: input, shape index: {}]   ;;  %s934_s0 = inlined_call_operand.vmem [shape: f32[8,400], index: 0, kind: input, shape index: {}]   ;;  %s935_s3 = inlined_call_operand.vmem [shape: f32[128,128], index: 3, kind: input, shape index: {}]   ;;  %s936_s5 = inlined_call_operand.vmem [shape: f32[128,128], index: 5, kind: input, shape index: {}]   ;;  %s937_s2 = inlined_call_operand.vmem [shape: f32[1,128], index: 2, kind: input, shape index: {}]   ;;  %s938_s4 = inlined_call_operand.vmem [shape: f32[1,128], index: 4, kind: input, shape index: {}]   ;;  %s939_s6 = inlined_call_operand.vmem [shape: f32[1,128], index: 6, kind: input, shape index: {}]   ;;  %s940_s7 = inlined_call_operand.vmem [shape: f32[8,128], index: 7, kind: output, shape index: {}]  }
   0x1   :  { %v61_v0 = vld [vmem:[%s933_s1 + $0xf8] sm:$0xff]  ;;  %161 = vmatprep.subr.mxu1 %v569_v1  ;;  %v60_v4 = vld [vmem:[%s933_s1 + $0xf0] sm:$0xff]  ;;  %v59_v7 = vld [vmem:[%s933_s1 + $0xe8] sm:$0xff] }
   0x2   :  { %v45_v2 = vld [vmem:[%s933_s1 + $0x78] sm:$0xff]  ;;  %428 = vmatprep.subr.mxu0 %v61_v0  ;;  %v44_v5 = vld [vmem:[%s933_s1 + $0x70] sm:$0xff]  ;;  %v75_v8 = vld [vmem:[%s933_s1 + $0x168] sm:$0xff] }
   0x3   :  { %v77_v3 = vld [vmem:[%s933_s1 + $0x178] sm:$0xff]  ;;  %v76_v6 = vld [vmem:[%s933_s1 + $0x170] sm:$0xff]  ;;  %429 = vmatpush3.msra.mxu0 %v45_v2  ;;  %v43_v9 = vld [vmem:[%s933_s1 + $0x68] sm:$0xff] }
   0x4   :  { %162 = vmatpush1.msra.mxu1 %v77_v3  ;;  %430 = vmatprep.subr.mxu0 %v60_v4  ;;  %v58_v10 = vld [vmem:[%s933_s1 + $0xe0] sm:$0xff]  ;;  %v57_v13 = vld [vmem:[%s933_s1 + $0xd8] sm:$0xff]  ;;  %v56_v16 = vld [vmem:[%s933_s1 + $0xd0] sm:$0xff] }
   0x5   :  { %163 = vmatprep.subr.mxu1 %v569_v1  ;;  %431 = vmatpush3.msra.mxu0 %v44_v5  ;;  %v74_v11 = vld [vmem:[%s933_s1 + $0x160] sm:$0xff]  ;;  %v73_v14 = vld [vmem:[%s933_s1 + $0x158] sm:$0xff]  ;;  %v72_v17 = vld [vmem:[%s933_s1 + $0x150] sm:$0xff] }
   0x6   :  { %164 = vmatpush1.msra.mxu1 %v76_v6  ;;  %432 = vmatprep.subr.mxu0 %v59_v7  ;;  %v42_v12 = vld [vmem:[%s933_s1 + $0x60] sm:$0xff]  ;;  %v41_v15 = vld [vmem:[%s933_s1 + $0x58] sm:$0xff]  ;;  %v40_v18 = vld [vmem:[%s933_s1 + $0x50] sm:$0xff] }
   0x7   :  { %165 = vmatprep.subr.mxu1 %v569_v1  ;;  %433 = vmatpush3.msra.mxu0 %v43_v9  ;;  %v55_v19 = vld [vmem:[%s933_s1 + $0xc8] sm:$0xff]  ;;  %v54_v22 = vld [vmem:[%s933_s1 + $0xc0] sm:$0xff]  ;;  %v53_v25 = vld [vmem:[%s933_s1 + $0xb8] sm:$0xff] }
   0x8   :  { %166 = vmatpush1.msra.mxu1 %v75_v8  ;;  %434 = vmatprep.subr.mxu0 %v58_v10  ;;  %v71_v20 = vld [vmem:[%s933_s1 + $0x148] sm:$0xff]  ;;  %v70_v23 = vld [vmem:[%s933_s1 + $0x140] sm:$0xff]  ;;  %v69_v26 = vld [vmem:[%s933_s1 + $0x138] sm:$0xff] }
   0x9   :  { %167 = vmatprep.subr.mxu1 %v569_v1  ;;  %435 = vmatpush3.msra.mxu0 %v42_v12  ;;  %v39_v21 = vld [vmem:[%s933_s1 + $0x48] sm:$0xff]  ;;  %v38_v24 = vld [vmem:[%s933_s1 + $0x40] sm:$0xff]  ;;  %v37_v27 = vld [vmem:[%s933_s1 + $0x38] sm:$0xff] }
   0xa   :  { %168 = vmatpush1.msra.mxu1 %v74_v11  ;;  %436 = vmatprep.subr.mxu0 %v57_v13  ;;  %v52_v28 = vld [vmem:[%s933_s1 + $0xb0] sm:$0xff]  ;;  %v51_v31 = vld [vmem:[%s933_s1 + $0xa8] sm:$0xff]  ;;  %v50_v34 = vld [vmem:[%s933_s1 + $0xa0] sm:$0xff] }
   0xb   :  { %169 = vmatprep.subr.mxu1 %v569_v1  ;;  %437 = vmatpush3.msra.mxu0 %v41_v15  ;;  %v68_v29 = vld [vmem:[%s933_s1 + $0x130] sm:$0xff]  ;;  %v67_v32 = vld [vmem:[%s933_s1 + $0x128] sm:$0xff]  ;;  %v66_v35 = vld [vmem:[%s933_s1 + $0x120] sm:$0xff] }
   0xc   :  { %170 = vmatpush1.msra.mxu1 %v73_v14  ;;  %438 = vmatprep.subr.mxu0 %v56_v16  ;;  %v36_v30 = vld [vmem:[%s933_s1 + $0x30] sm:$0xff]  ;;  %v35_v33 = vld [vmem:[%s933_s1 + $0x28] sm:$0xff]  ;;  %v34_v36 = vld [vmem:[%s933_s1 + $0x20] sm:$0xff] }
   0xd   :  { %171 = vmatprep.subr.mxu1 %v569_v1  ;;  %439 = vmatpush3.msra.mxu0 %v40_v18  ;;  %v49_v37 = vld [vmem:[%s933_s1 + $0x98] sm:$0xff]  ;;  %v48_v40 = vld [vmem:[%s933_s1 + $0x90] sm:$0xff]  ;;  %v47_v43 = vld [vmem:[%s933_s1 + $0x88] sm:$0xff] }
   0xe   :  { %172 = vmatpush1.msra.mxu1 %v72_v17  ;;  %440 = vmatprep.subr.mxu0 %v55_v19  ;;  %v65_v38 = vld [vmem:[%s933_s1 + $0x118] sm:$0xff]  ;;  %v64_v41 = vld [vmem:[%s933_s1 + $0x110] sm:$0xff]  ;;  %v63_v44 = vld [vmem:[%s933_s1 + $0x108] sm:$0xff] }
   0xf   :  { %173 = vmatprep.subr.mxu1 %v569_v1  ;;  %441 = vmatpush3.msra.mxu0 %v39_v21  ;;  %v33_v39 = vld [vmem:[%s933_s1 + $0x18] sm:$0xff]  ;;  %v32_v42 = vld [vmem:[%s933_s1 + $0x10] sm:$0xff]  ;;  %v31_v45 = vld [vmem:[%s933_s1 + $0x8] sm:$0xff] }
  0x10   :  { %174 = vmatpush1.msra.mxu1 %v71_v20  ;;  %442 = vmatprep.subr.mxu0 %v54_v22  ;;  %v46_v46 = vld [vmem:[%s933_s1 + $0x80] sm:$0xff]  ;;  %v27_v47 = vld [vmem:[%s934_s0 + $0x8] sm:$0xff]  ;;  %v29_v52 = vld [vmem:[%s934_s0 + $0x18] sm:$0xff] }
  0x11   :  { %175 = vmatprep.subr.mxu1 %v569_v1  ;;  %443 = vmatpush3.msra.mxu0 %v38_v24  ;;  %v30_v48 = vld [vmem:[%s933_s1] sm:$0xff]  ;;  %v79_v51 = vld [vmem:[%s933_s1 + $0x188] sm:$0xff]  ;;  %v247_v54 = vld [vmem:[%s935_s3 + $0x78] sm:$0xff] }
  0x12   :  { %176 = vmatpush1.msra.mxu1 %v70_v23  ;;  %444 = vmatprep.subr.mxu0 %v53_v25  ;;  %v62_v49 = vld [vmem:[%s933_s1 + $0x100] sm:$0xff]  ;;  %v28_v55 = vld [vmem:[%s934_s0 + $0x10] sm:$0xff]  ;;  %v245_v57 = vld [vmem:[%s935_s3 + $0x68] sm:$0xff] }
  0x13   :  { %177 = vmatprep.subr.mxu1 %v569_v1  ;;  %445 = vmatpush3.msra.mxu0 %v37_v27  ;;  %v26_v50 = vld [vmem:[%s934_s0] sm:$0xff]  ;;  %v246_v56 = vld [vmem:[%s935_s3 + $0x70] sm:$0xff]  ;;  %v243_v59 = vld [vmem:[%s935_s3 + $0x58] sm:$0xff] }
  0x14   :  { %178 = vmatpush1.msra.mxu1 %v69_v26  ;;  %446 = vmatprep.subr.mxu0 %v52_v28  ;;  %v78_v53 = vld [vmem:[%s933_s1 + $0x180] sm:$0xff]  ;;  %v242_v60 = vld [vmem:[%s935_s3 + $0x50] sm:$0xff]  ;;  %v241_v61 = vld [vmem:[%s935_s3 + $0x48] sm:$0xff] }
  0x15   :  { %179 = vmatprep.subr.mxu1 %v569_v1  ;;  %447 = vmatpush3.msra.mxu0 %v36_v30  ;;  %v244_v58 = vld [vmem:[%s935_s3 + $0x60] sm:$0xff]  ;;  %v239_v63 = vld [vmem:[%s935_s3 + $0x38] sm:$0xff]  ;;  %v238_v0 = vld [vmem:[%s935_s3 + $0x30] sm:$0xff] }
  0x16   :  { %180 = vmatpush1.msra.mxu1 %v68_v29  ;;  %448 = vmatprep.subr.mxu0 %v51_v31  ;;  %v240_v62 = vld [vmem:[%s935_s3 + $0x40] sm:$0xff]  ;;  %v237_v2 = vld [vmem:[%s935_s3 + $0x28] sm:$0xff]  ;;  %v235_v4 = vld [vmem:[%s935_s3 + $0x18] sm:$0xff] }
  0x17   :  { %181 = vmatprep.subr.mxu1 %v569_v1  ;;  %449 = vmatpush3.msra.mxu0 %v35_v33  ;;  %v236_v3 = vld [vmem:[%s935_s3 + $0x20] sm:$0xff]  ;;  %v234_v5 = vld [vmem:[%s935_s3 + $0x10] sm:$0xff]  ;;  %v233_v6 = vld [vmem:[%s935_s3 + $0x8] sm:$0xff] }
  0x18   :  { %182 = vmatpush1.msra.mxu1 %v67_v32  ;;  %450 = vmatprep.subr.mxu0 %v50_v34  ;;  %v232_v7 = vld [vmem:[%s935_s3] sm:$0xff]  ;;  %v341_v8 = vld [vmem:[%s936_s5 + $0x78] sm:$0xff]  ;;  %v340_v9 = vld [vmem:[%s936_s5 + $0x70] sm:$0xff] }
  0x19   :  { %183 = vmatprep.subr.mxu1 %v569_v1  ;;  %451 = vmatpush3.msra.mxu0 %v34_v36  ;;  %v339_v10 = vld [vmem:[%s936_s5 + $0x68] sm:$0xff]  ;;  %v338_v11 = vld [vmem:[%s936_s5 + $0x60] sm:$0xff]  ;;  %v337_v12 = vld [vmem:[%s936_s5 + $0x58] sm:$0xff] }
  0x1a   :  { %184 = vmatpush1.msra.mxu1 %v66_v35  ;;  %452 = vmatprep.subr.mxu0 %v49_v37  ;;  %v336_v13 = vld [vmem:[%s936_s5 + $0x50] sm:$0xff]  ;;  %v335_v14 = vld [vmem:[%s936_s5 + $0x48] sm:$0xff]  ;;  %v334_v15 = vld [vmem:[%s936_s5 + $0x40] sm:$0xff] }
  0x1b   :  { %185 = vmatprep.subr.mxu1 %v569_v1  ;;  %453 = vmatpush3.msra.mxu0 %v33_v39  ;;  %v333_v16 = vld [vmem:[%s936_s5 + $0x38] sm:$0xff]  ;;  %v332_v17 = vld [vmem:[%s936_s5 + $0x30] sm:$0xff]  ;;  %v331_v18 = vld [vmem:[%s936_s5 + $0x28] sm:$0xff] }
  0x1c   :  { %186 = vmatpush1.msra.mxu1 %v65_v38  ;;  %454 = vmatprep.subr.mxu0 %v48_v40  ;;  %v330_v19 = vld [vmem:[%s936_s5 + $0x20] sm:$0xff]  ;;  %v329_v20 = vld [vmem:[%s936_s5 + $0x18] sm:$0xff]  ;;  %v328_v30 = vld [vmem:[%s936_s5 + $0x10] sm:$0xff] }
  0x1d   :  { %187 = vmatprep.subr.mxu1 %v569_v1  ;;  %455 = vmatpush3.msra.mxu0 %v32_v42  ;;  %v424_v23 = vld [vmem:[%s937_s2] ss:$0 sm:$0xff]  ;;  %v327_v31 = vld [vmem:[%s936_s5 + $0x8] sm:$0xff] }
  0x1e   :  { %188 = vmatpush1.msra.mxu1 %v64_v41  ;;  %456 = vmatprep.subr.mxu0 %v47_v43  ;;  %v326_v32 = vld [vmem:[%s936_s5] sm:$0xff] }
  0x1f   :  { %189 = vmatprep.subr.mxu1 %v569_v1  ;;  %457 = vmatpush3.msra.mxu0 %v31_v45  ;;  %v426_v33 = vld [vmem:[%s938_s4] ss:$0 sm:$0xff] }
  0x20   :  { %190 = vmatpush1.msra.mxu1 %v63_v44  ;;  %458 = vmatprep.subr.mxu0 %v46_v46  ;;  %v427_v38 = vld [vmem:[%s939_s6] ss:$0 sm:$0xff] }
  0x21   :  { %191 = vmatprep.subr.mxu1 %v569_v1  ;;  %155 = vmatprep.mubr.f32.mxu0 %v27_v47 }
  0x22   :  { %459 = vmatpush3.msra.mxu0 %v30_v48  ;;  %192 = vmatpush1.msra.mxu1 %v62_v49 }
  0x23   :  { %156 = vmatmul.mubr.f32.vlgmr.msra.gmra.mxu0 %v26_v50  ;;  %221 = vmatprep.subr.mxu1 %v569_v1 }
  0x24   :  { %222 = vmatpush2.msra.mxu1 %v79_v51  ;;  %425 = vmatprep.mubr.msk.f32.mxu1 %vm87_vm0, %v29_v52 }
  0x25   :  { %223 = vmatprep.subr.mxu1 %v569_v1  ;;  %497 = vmatprep.subr.mxu0 %v569_v1 }
  0x26   :  { %224 = vmatpush2.msra.mxu1 %v78_v53  ;;  %498 = vmatpush3.msra.mxu0 %v247_v54 }
  0x27   :  { %226 = vmatmul.mubr.f32.vlgmr.msra.gmra.mxu1 %v28_v55  ;;  %499 = vmatprep.subr.mxu0 %v569_v1 }
  0x28   :  { %500 = vmatpush3.msra.mxu0 %v246_v56  ;;  %532 = vmatprep.subr.mxu1 %v569_v1 }
  0x29   :  { %501 = vmatprep.subr.mxu0 %v569_v1  ;;  %529 = vmatprep.mubr.msk.f32.mxu0 %vm570_vm1, %v569_v1 }
  0x2a   :  { %502 = vmatpush3.msra.mxu0 %v245_v57  ;;  %564 = vmatprep.mubr.msk.f32.mxu1 %vm570_vm1, %v569_v1 }
  0x2b   :  { %503 = vmatprep.subr.mxu0 %v569_v1  ;;  %533 = vmatpush3.msra.mxu1 %v341_v8 }
  0x2c   :  { %504 = vmatpush3.msra.mxu0 %v244_v58  ;;  %534 = vmatprep.subr.mxu1 %v569_v1 }
  0x2d   :  { %505 = vmatprep.subr.mxu0 %v569_v1  ;;  %535 = vmatpush3.msra.mxu1 %v340_v9 }
  0x2e   :  { %506 = vmatpush3.msra.mxu0 %v243_v59  ;;  %536 = vmatprep.subr.mxu1 %v569_v1 }
  0x2f   :  { %507 = vmatprep.subr.mxu0 %v569_v1  ;;  %537 = vmatpush3.msra.mxu1 %v339_v10 }
  0x30   :  { %508 = vmatpush3.msra.mxu0 %v242_v60  ;;  %538 = vmatprep.subr.mxu1 %v569_v1 }
  0x31   :  { %509 = vmatprep.subr.mxu0 %v569_v1  ;;  %539 = vmatpush3.msra.mxu1 %v338_v11 }
  0x32   :  { %510 = vmatpush3.msra.mxu0 %v241_v61  ;;  %540 = vmatprep.subr.mxu1 %v569_v1 }
  0x33   :  { %511 = vmatprep.subr.mxu0 %v569_v1  ;;  %541 = vmatpush3.msra.mxu1 %v337_v12 }
  0x34   :  { %512 = vmatpush3.msra.mxu0 %v240_v62  ;;  %542 = vmatprep.subr.mxu1 %v569_v1 }
  0x35   :  { %513 = vmatprep.subr.mxu0 %v569_v1  ;;  %543 = vmatpush3.msra.mxu1 %v336_v13 }
  0x36   :  { %514 = vmatpush3.msra.mxu0 %v239_v63  ;;  %544 = vmatprep.subr.mxu1 %v569_v1 }
  0x37   :  { %515 = vmatprep.subr.mxu0 %v569_v1  ;;  %545 = vmatpush3.msra.mxu1 %v335_v14 }
  0x38   :  { %516 = vmatpush3.msra.mxu0 %v238_v0  ;;  %546 = vmatprep.subr.mxu1 %v569_v1 }
  0x39   :  { %517 = vmatprep.subr.mxu0 %v569_v1  ;;  %547 = vmatpush3.msra.mxu1 %v334_v15 }
  0x3a   :  { %518 = vmatpush3.msra.mxu0 %v237_v2  ;;  %548 = vmatprep.subr.mxu1 %v569_v1 }
  0x3b   :  { %519 = vmatprep.subr.mxu0 %v569_v1  ;;  %549 = vmatpush3.msra.mxu1 %v333_v16 }
  0x3c   :  { %520 = vmatpush3.msra.mxu0 %v236_v3  ;;  %550 = vmatprep.subr.mxu1 %v569_v1 }
  0x3d   :  { %521 = vmatprep.subr.mxu0 %v569_v1  ;;  %551 = vmatpush3.msra.mxu1 %v332_v17 }
  0x3e   :  { %522 = vmatpush3.msra.mxu0 %v235_v4  ;;  %552 = vmatprep.subr.mxu1 %v569_v1 }
  0x3f   :  { %523 = vmatprep.subr.mxu0 %v569_v1  ;;  %553 = vmatpush3.msra.mxu1 %v331_v18 }
  0x40   :  { %524 = vmatpush3.msra.mxu0 %v234_v5  ;;  %554 = vmatprep.subr.mxu1 %v569_v1 }
  0x41   :  { %525 = vmatprep.subr.mxu0 %v569_v1  ;;  %555 = vmatpush3.msra.mxu1 %v330_v19 }
  0x42   :  { %526 = vmatpush3.msra.mxu0 %v233_v6  ;;  %556 = vmatprep.subr.mxu1 %v569_v1 }
  0x43   :  { %527 = vmatprep.subr.mxu0 %v569_v1  ;;  %557 = vmatpush3.msra.mxu1 %v329_v20 }
  0x44   :  { %528 = vmatpush3.msra.mxu0 %v232_v7  ;;  %558 = vmatprep.subr.mxu1 %v569_v1 }
  0x45   :  { %559 = vmatpush3.msra.mxu1 %v328_v30 }
  0x46   :  { %560 = vmatprep.subr.mxu1 %v569_v1 }
  0x47   :  { %561 = vmatpush3.msra.mxu1 %v327_v31 }
  0x48   :  { %562 = vmatprep.subr.mxu1 %v569_v1 }
  0x49   :  { %563 = vmatpush3.msra.mxu1 %v326_v32 }
  0xe3   :  { %v460_v21 = vpop.f32.mrf.mxu0 }
  0xe5   :  { %v461_v22 = vpop.f32.mrf.mxu0 }
  0xe6   :  { %v462_v24 = vadd.f32 %v461_v22, %v460_v21 }
  0xe7   :  { %v227_v25 = vpop.f32.mrf.mxu1 }
  0xe8   :  { %v158_v26 = vadd.f32 %v462_v24, %v424_v23 }
  0xe9   :  { %v229_v27 = vpop.f32.mrf.mxu1 }
  0xea   :  { %v228_v28 = vadd.f32 %v227_v25, %v158_v26 }
  0xec   :  { %v231_v29 = vmax.f32 %v228_v28, 0.0 }
  0xee   :  { %530 = vmatmul.mubr.f32.vlgmr.msra.gmra.mxu0 %v231_v29 }
 0x1ae   :  { %v321_v34 = vpop.f32.mrf.mxu0 }
 0x1af   :  { %v322_v35 = vadd.f32 %v426_v33, %v321_v34 }
 0x1b0   :  { %v531_v36 = vpop.f32.mrf.mxu0 }
 0x1b1   :  { %v325_v37 = vmax.f32 %v322_v35, 0.0 }
 0x1b3   :  { %565 = vmatmul.mubr.f32.vlgmr.msra.gmra.mxu1 %v325_v37 }
 0x273   :  { %v415_v39 = vpop.f32.mrf.mxu1 }
 0x274   :  { %v416_v1 = vadd.f32 %v427_v38, %v415_v39 }
 0x275   :  { %v566_v40 = vpop.f32.mrf.mxu1 }
 0x276   :  { %419 = vst [vmem:[%s940_s7] sm:$0xff] %v416_v1 }

</bundles_post_ra>
